<compile_context>
chip_gen: v7x
topology: tpu7x:2x2x1
jax: 0.10.0
libtpu: 0.0.40
codegen_flags: <defaults>
</compile_context>

<pallas_src>
import jax
import jax.numpy as jnp
from jax.experimental import pallas as pl
from jax.experimental.pallas import tpu as pltpu


# ---------------------------------------------------------------------------
# Pallas kernels
# ---------------------------------------------------------------------------

def _make_conv_kernel(has_scale, has_res, has_pool):
    """Fused conv-as-matmul kernel: o = epilogue(W @ X).

    W: (Cout, K) bf16, X: (K, tm) bf16 -> f32 accumulation on the MXU.
    Optional epilogue (f32 VPU work that rides under the MXU):
      * scale/bias + ReLU     (folded BatchNorm + ReLU of the next pre-act)
      * residual add          (PreAct block shortcut)
      * ReLU + pooling matmul (final backbone ReLU + global average pool)
    """
    def kernel(*refs):
        refs = list(refs)
        w_ref = refs.pop(0)
        x_ref = refs.pop(0)
        s_ref = refs.pop(0) if has_scale else None
        b_ref = refs.pop(0) if has_scale else None
        r_ref = refs.pop(0) if has_res else None
        p_ref = refs.pop(0) if has_pool else None
        o_ref = refs.pop(0)

        acc = jnp.dot(w_ref[...], x_ref[...],
                      preferred_element_type=jnp.float32)
        if has_scale:                       # y = relu(y * scale + bias)
            acc = jnp.maximum(acc * s_ref[...] + b_ref[...], 0.0)
        if has_res:                         # y = y + shortcut
            acc = acc + r_ref[...]
        if has_pool:                        # final relu + global avg pool
            acc = jnp.maximum(acc, 0.0)
            acc = jnp.dot(acc, p_ref[...],
                          preferred_element_type=jnp.float32)
        o_ref[...] = acc.astype(o_ref.dtype)
    return kernel


def _bn_relu_kernel(x_ref, s_ref, b_ref, o_ref):
    # y = relu(x * scale + bias); math in f32, stored as bf16 for the MXU.
    o_ref[...] = jnp.maximum(
        x_ref[...] * s_ref[...] + b_ref[...], 0.0).astype(o_ref.dtype)


# ---------------------------------------------------------------------------
# Pallas wrappers
# ---------------------------------------------------------------------------

def _pick_tile(m):
    """Lane-axis tile: 256 on the big layers (>=2 parallel grid steps so v7x's
    two TensorCores both get work), otherwise the full axis (tiny late stages).
    """
    if m % 256 == 0 and m > 256:
        return 256
    if m % 128 == 0 and m > 128:
        return 128
    return m


def conv_mm(wmat, patches, *, scale=None, bias=None, residual=None,
            pool=None, out_dtype=jnp.float32):
    """(Cout, K) @ (K, M) with optional fused epilogue; M (spatial) on lanes."""
    cout, k = wmat.shape
    k2, m = patches.shape
    assert k == k2
    has_scale = scale is not None
    has_res = residual is not None
    has_pool = pool is not None
    # Pooling reduces over the whole spatial axis -> single M tile in that case.
    tm = m if has_pool else _pick_tile(m)
    assert m % tm == 0

    in_specs = [pl.BlockSpec((cout, k), lambda i: (0, 0)),
                pl.BlockSpec((k, tm), lambda i: (0, i))]
    args = [wmat.astype(jnp.bfloat16), patches.astype(jnp.bfloat16)]
    if has_scale:
        in_specs += [pl.BlockSpec((cout, 1), lambda i: (0, 0)),
                     pl.BlockSpec((cout, 1), lambda i: (0, 0))]
        args += [scale, bias]
    if has_res:
        in_specs.append(pl.BlockSpec((cout, tm), lambda i: (0, i)))
        args.append(residual)
    if has_pool:
        npool = pool.shape[1]
        in_specs.append(pl.BlockSpec((m, npool), lambda i: (0, 0)))
        args.append(pool)
        out_shape = jax.ShapeDtypeStruct((cout, npool), out_dtype)
        out_spec = pl.BlockSpec((cout, npool), lambda i: (0, 0))
    else:
        out_shape = jax.ShapeDtypeStruct((cout, m), out_dtype)
        out_spec = pl.BlockSpec((cout, tm), lambda i: (0, i))

    return pl.pallas_call(
        _make_conv_kernel(has_scale, has_res, has_pool),
        out_shape=out_shape,
        grid=(m // tm,),
        in_specs=in_specs,
        out_specs=out_spec,
        compiler_params=pltpu.CompilerParams(
            dimension_semantics=("parallel",)),
    )(*args)


def bn_relu(x, scale, bias):
    """x: (C, N, H, W) f32; scale/bias: (C, 1). Returns bf16 (C, N, H, W)."""
    c, n, h, w = x.shape
    m = n * h * w
    tm = _pick_tile(m)
    assert m % tm == 0
    y = pl.pallas_call(
        _bn_relu_kernel,
        out_shape=jax.ShapeDtypeStruct((c, m), jnp.bfloat16),
        grid=(m // tm,),
        in_specs=[pl.BlockSpec((c, tm), lambda i: (0, i)),
                  pl.BlockSpec((c, 1), lambda i: (0, 0)),
                  pl.BlockSpec((c, 1), lambda i: (0, 0))],
        out_specs=pl.BlockSpec((c, tm), lambda i: (0, i)),
        compiler_params=pltpu.CompilerParams(
            dimension_semantics=("parallel",)),
    )(x.reshape(c, m), scale, bias)
    return y.reshape(c, n, h, w)


# ---------------------------------------------------------------------------
# Plain-JAX glue: channel-major im2col and the pooling matrix
# ---------------------------------------------------------------------------

def im2col(x, k, stride, pad):
    """x: (C, N, H, W) -> patches (k*k*C, N*Ho*Wo), rows ordered (di, dj, c)
    to match weight mats built as transpose(w, (3,0,1,2)).reshape(Cout, k*k*C).
    """
    c, n, h, w = x.shape
    if pad:
        x = jnp.pad(x, ((0, 0), (0, 0), (pad, pad), (pad, pad)))
    hp, wp = x.shape[2], x.shape[3]
    ho = (hp - k) // stride + 1
    wo = (wp - k) // stride + 1
    cols = []
    for di in range(k):
        for dj in range(k):
            cols.append(
                x[:, :, di:di + stride * ho:stride,
                     dj:dj + stride * wo:stride].reshape(c, n * ho * wo))
    return jnp.concatenate(cols, axis=0), (n, ho, wo)


def _pool_matrix(n, hw):
    """(N*hw, N) block-averaging matrix: pooled[c, n] = mean_hw y[c, n, :, :]."""
    return jnp.repeat(jnp.eye(n, dtype=jnp.float32), hw, axis=0) / float(hw)


# ---------------------------------------------------------------------------
# Model: pre-activation basic block + backbone forward
# ---------------------------------------------------------------------------

def preact_block_forward(x, blk, pool=None):
    """PreAct basic block. x: (Cin, N, H, W) f32.

    out = conv3x3(relu(bn2(conv3x3_s(relu(bn1(x)))))) + shortcut
    bn2+relu is fused into the first conv's epilogue, the residual add (and,
    for the final block, the backbone relu + avgpool) into the second conv's.
    """
    stride = blk["stride"]
    cin, n, h, w = x.shape
    a1 = bn_relu(x, blk["bn1_scale"], blk["bn1_bias"])           # bf16 pre-act

    if "w_sc_mat" in blk:                                        # projection
        p_sc, _ = im2col(a1, 1, stride, 0)
        shortcut = conv_mm(blk["w_sc_mat"], p_sc)                # (Cout, M) f32
    else:                                                        # identity
        shortcut = x.reshape(cin, n * h * w)

    p1, (n1, ho, wo) = im2col(a1, 3, stride, 1)
    a2 = conv_mm(blk["w1_mat"], p1,
                 scale=blk["bn2_scale"], bias=blk["bn2_bias"],
                 out_dtype=jnp.bfloat16)                         # relu(bn2(conv1))
    cmid = blk["w1_mat"].shape[0]
    p2, _ = im2col(a2.reshape(cmid, n1, ho, wo), 3, 1, 1)
    cout = blk["w2_mat"].shape[0]
    if pool is None:
        y = conv_mm(blk["w2_mat"], p2, residual=shortcut)        # conv2 + shortcut
        return y.reshape(cout, n1, ho, wo)
    # Final block: also fuse the backbone relu + adaptive avgpool(1,1).
    return conv_mm(blk["w2_mat"], p2, residual=shortcut, pool=pool)  # (Cout, N)


def backbone_forward(x_nchw, params):
    # Accept NCHW like PyTorch; compute channel-major (C, N*H*W) so the large
    # spatial axis sits on the 128-lane dimension (lane-dense stores).
    x = jnp.transpose(x_nchw, (1, 0, 2, 3)).astype(jnp.float32)      # (C, N, H, W)

    p0, (n0, h0, w0) = im2col(x, 3, 1, 1)
    x = conv_mm(params["conv1_mat"], p0).reshape(-1, n0, h0, w0)     # stem conv

    stages = params["stages"]
    feats = None
    for si, stage in enumerate(stages):
        for bi, blk in enumerate(stage):
            is_last = (si == len(stages) - 1) and (bi == len(stage) - 1)
            if not is_last:
                x = preact_block_forward(x, blk)
            else:
                _, nb, hb, wb = x.shape
                ho = (hb + 2 - 3) // blk["stride"] + 1
                wo = (wb + 2 - 3) // blk["stride"] + 1
                feats = preact_block_forward(
                    x, blk, pool=_pool_matrix(nb, ho * wo))          # (Cout, N)
    return jnp.transpose(feats, (1, 0))                              # (N, Cout)


# ---------------------------------------------------------------------------
# Deterministic synthetic parameters
# ---------------------------------------------------------------------------

def make_params(key, in_ch=3, base=8, blocks_per_stage=2):
    keys = iter(jax.random.split(key, 256))

    def conv_mat(k, cin, cout):
        scale = (2.0 / (k * k * cin)) ** 0.5
        w = jax.random.normal(next(keys), (k, k, cin, cout), jnp.float32) * scale
        # (k, k, cin, cout) -> (cout, k*k*cin), columns ordered (di, dj, cin).
        return jnp.transpose(w, (3, 0, 1, 2)).reshape(cout, k * k * cin)

    def bn_params(c):
        # Fresh BatchNorm2d in eval mode: running_mean=0, running_var=1, eps=1e-5,
        # folded into a per-channel affine y = x*scale + bias.
        gamma = 1.0 + 0.1 * jax.random.normal(next(keys), (c,), jnp.float32)
        beta = 0.1 * jax.random.normal(next(keys), (c,), jnp.float32)
        mean = jnp.zeros((c,), jnp.float32)
        var = jnp.ones((c,), jnp.float32)
        eps = 1e-5
        scale = gamma / jnp.sqrt(var + eps)
        bias = beta - mean * scale
        return scale.reshape(c, 1), bias.reshape(c, 1)

    params = {"conv1_mat": conv_mat(3, in_ch, base), "stages": []}
    in_c = base
    for out_c, stride0 in zip([base, 2 * base, 4 * base, 8 * base], [1, 2, 2, 2]):
        stage = []
        for bi in range(blocks_per_stage):
            stride = stride0 if bi == 0 else 1
            blk = {"stride": stride}
            blk["bn1_scale"], blk["bn1_bias"] = bn_params(in_c)
            blk["w1_mat"] = conv_mat(3, in_c, out_c)
            blk["bn2_scale"], blk["bn2_bias"] = bn_params(out_c)
            blk["w2_mat"] = conv_mat(3, out_c, out_c)
            if stride != 1 or in_c != out_c:
                blk["w_sc_mat"] = conv_mat(1, in_c, out_c)
            stage.append(blk)
            in_c = out_c
        params["stages"].append(stage)
    return params


# ---------------------------------------------------------------------------
# Main
# ---------------------------------------------------------------------------

if __name__ == "__main__":
    key = jax.random.PRNGKey(0)
    kx, kp = jax.random.split(key)

    # NCHW input, matching the PyTorch module convention.
    x = jax.random.normal(kx, (2, 3, 16, 16), jnp.float32)
    params = make_params(kp, in_ch=3, base=8, blocks_per_stage=2)

    fwd = jax.jit(lambda inp: backbone_forward(inp, params))
    out = jax.block_until_ready(fwd(x))

    assert out.shape == (2, 8 * 8), out.shape        # (batch, 8*base) features
    assert out.dtype == jnp.float32
    assert bool(jnp.all(jnp.isfinite(out)))
    print("KERNEL_OK")
</pallas_src>

<mosaic_0001>
module attributes {stable_mosaic.version = 11 : i64} {
  func.func @kernel(%arg0: i32, %arg1: memref<8x27xbf16, #tpu.memory_space<vmem>>, %arg2: memref<27x256xbf16, #tpu.memory_space<vmem>>, %arg3: memref<8x256xf32, #tpu.memory_space<vmem>>) attributes {dimension_semantics = [#tpu.dimension_semantics<parallel>], iteration_bounds = array<i64: 2>, scalar_prefetch = 0 : i64, scratch_operands = 0 : i64, tpu.core_type = #tpu.core_type<tc>, window_params = [{pipeline_mode = #tpu.pipeline_mode<synchronous>, transform_indices = @transform_0, window_bounds = array<i64: 8, 27>}, {transform_indices = @transform_1, window_bounds = array<i64: 27, 256>}, {transform_indices = @transform_2, window_bounds = array<i64: 8, 256>}]} {
    %c0 = arith.constant 0 : index
    %c0_0 = arith.constant 0 : index
    %0 = vector.load %arg1[%c0, %c0_0] : memref<8x27xbf16, #tpu.memory_space<vmem>>, vector<8x27xbf16>
    %c0_1 = arith.constant 0 : index
    %c0_2 = arith.constant 0 : index
    %1 = vector.load %arg2[%c0_1, %c0_2] : memref<27x256xbf16, #tpu.memory_space<vmem>>, vector<27x256xbf16>
    %cst = arith.constant dense<0.000000e+00> : vector<8x256xf32>
    %2 = tpu.matmul %0, %1, %cst {dimension_numbers = #tpu.dot_dimension_numbers<[1], [0], [0], [1], [0, 0, 1, 1], [], []>} : vector<8x27xbf16>, vector<27x256xbf16>, vector<8x256xf32> -> vector<8x256xf32>
    %c0_3 = arith.constant 0 : index
    %c0_4 = arith.constant 0 : index
    %3 = vector.load %arg3[%c0_3, %c0_4] : memref<8x256xf32, #tpu.memory_space<vmem>>, vector<8x256xf32>
    tpu.vector_store %arg3[%c0_3, %c0_4], %2 {strides = array<i32>} : memref<8x256xf32, #tpu.memory_space<vmem>>, vector<8x256xf32>,
    return
  }
  func.func @transform_0(%arg0: i32) -> (i32, i32) {
    %c0_i32 = arith.constant 0 : i32
    %c0_i32_0 = arith.constant 0 : i32
    %c0_i32_1 = arith.constant 0 : i32
    return %c0_i32, %c0_i32_0 : i32, i32
  }
  func.func @transform_1(%arg0: i32) -> (i32, i32) {
    %c0_i32 = arith.constant 0 : i32
    %c0_i32_0 = arith.constant 0 : i32
    return %c0_i32, %arg0 : i32, i32
  }
  func.func @transform_2(%arg0: i32) -> (i32, i32) {
    %c0_i32 = arith.constant 0 : i32
    %c0_i32_0 = arith.constant 0 : i32
    return %c0_i32, %arg0 : i32, i32
  }
}

module attributes {stable_mosaic.version = 11 : i64} {
  func.func @_bn_relu_kernel(%arg0: i32, %arg1: memref<8x256xf32, #tpu.memory_space<vmem>>, %arg2: memref<8x1xf32, #tpu.memory_space<vmem>>, %arg3: memref<8x1xf32, #tpu.memory_space<vmem>>, %arg4: memref<8x256xbf16, #tpu.memory_space<vmem>>) attributes {dimension_semantics = [#tpu.dimension_semantics<parallel>], iteration_bounds = array<i64: 2>, scalar_prefetch = 0 : i64, scratch_operands = 0 : i64, tpu.core_type = #tpu.core_type<tc>, window_params = [{transform_indices = @transform_0, window_bounds = array<i64: 8, 256>}, {pipeline_mode = #tpu.pipeline_mode<synchronous>, transform_indices = @transform_1, window_bounds = array<i64: 8, 1>}, {pipeline_mode = #tpu.pipeline_mode<synchronous>, transform_indices = @transform_2, window_bounds = array<i64: 8, 1>}, {transform_indices = @transform_3, window_bounds = array<i64: 8, 256>}]} {
    %c0 = arith.constant 0 : index
    %c0_0 = arith.constant 0 : index
    %0 = vector.load %arg1[%c0, %c0_0] : memref<8x256xf32, #tpu.memory_space<vmem>>, vector<8x256xf32>
    %c0_1 = arith.constant 0 : index
    %c0_2 = arith.constant 0 : index
    %1 = vector.load %arg2[%c0_1, %c0_2] : memref<8x1xf32, #tpu.memory_space<vmem>>, vector<8x1xf32>
    %2 = vector.broadcast %1 : vector<8x1xf32> to vector<8x256xf32>
    %3 = arith.mulf %0, %2 : vector<8x256xf32>
    %c0_3 = arith.constant 0 : index
    %c0_4 = arith.constant 0 : index
    %4 = vector.load %arg3[%c0_3, %c0_4] : memref<8x1xf32, #tpu.memory_space<vmem>>, vector<8x1xf32>
    %5 = vector.broadcast %4 : vector<8x1xf32> to vector<8x256xf32>
    %6 = arith.addf %3, %5 : vector<8x256xf32>
    %cst = arith.constant 0.000000e+00 : f32
    %7 = vector.broadcast %cst : f32 to vector<8x256xf32>
    %8 = arith.maximumf %6, %7 : vector<8x256xf32>
    %9 = arith.truncf %8 : vector<8x256xf32> to vector<8x256xbf16>
    %c0_5 = arith.constant 0 : index
    %c0_6 = arith.constant 0 : index
    %10 = vector.load %arg4[%c0_5, %c0_6] : memref<8x256xbf16, #tpu.memory_space<vmem>>, vector<8x256xbf16>
    tpu.vector_store %arg4[%c0_5, %c0_6], %9 {strides = array<i32>} : memref<8x256xbf16, #tpu.memory_space<vmem>>, vector<8x256xbf16>,
    return
  }
  func.func @transform_0(%arg0: i32) -> (i32, i32) {
    %c0_i32 = arith.constant 0 : i32
    %c0_i32_0 = arith.constant 0 : i32
    return %c0_i32, %arg0 : i32, i32
  }
  func.func @transform_1(%arg0: i32) -> (i32, i32) {
    %c0_i32 = arith.constant 0 : i32
    %c0_i32_0 = arith.constant 0 : i32
    %c0_i32_1 = arith.constant 0 : i32
    return %c0_i32, %c0_i32_0 : i32, i32
  }
  func.func @transform_2(%arg0: i32) -> (i32, i32) {
    %c0_i32 = arith.constant 0 : i32
    %c0_i32_0 = arith.constant 0 : i32
    %c0_i32_1 = arith.constant 0 : i32
    return %c0_i32, %c0_i32_0 : i32, i32
  }
  func.func @transform_3(%arg0: i32) -> (i32, i32) {
    %c0_i32 = arith.constant 0 : i32
    %c0_i32_0 = arith.constant 0 : i32
    return %c0_i32, %arg0 : i32, i32
  }
}

module attributes {stable_mosaic.version = 11 : i64} {
  func.func @kernel(%arg0: i32, %arg1: memref<8x72xbf16, #tpu.memory_space<vmem>>, %arg2: memref<72x256xbf16, #tpu.memory_space<vmem>>, %arg3: memref<8x1xf32, #tpu.memory_space<vmem>>, %arg4: memref<8x1xf32, #tpu.memory_space<vmem>>, %arg5: memref<8x256xbf16, #tpu.memory_space<vmem>>) attributes {dimension_semantics = [#tpu.dimension_semantics<parallel>], iteration_bounds = array<i64: 2>, scalar_prefetch = 0 : i64, scratch_operands = 0 : i64, tpu.core_type = #tpu.core_type<tc>, window_params = [{pipeline_mode = #tpu.pipeline_mode<synchronous>, transform_indices = @transform_0, window_bounds = array<i64: 8, 72>}, {transform_indices = @transform_1, window_bounds = array<i64: 72, 256>}, {pipeline_mode = #tpu.pipeline_mode<synchronous>, transform_indices = @transform_2, window_bounds = array<i64: 8, 1>}, {pipeline_mode = #tpu.pipeline_mode<synchronous>, transform_indices = @transform_3, window_bounds = array<i64: 8, 1>}, {transform_indices = @transform_4, window_bounds = array<i64: 8, 256>}]} {
    %c0 = arith.constant 0 : index
    %c0_0 = arith.constant 0 : index
    %0 = vector.load %arg1[%c0, %c0_0] : memref<8x72xbf16, #tpu.memory_space<vmem>>, vector<8x72xbf16>
    %c0_1 = arith.constant 0 : index
    %c0_2 = arith.constant 0 : index
    %1 = vector.load %arg2[%c0_1, %c0_2] : memref<72x256xbf16, #tpu.memory_space<vmem>>, vector<72x256xbf16>
    %cst = arith.constant dense<0.000000e+00> : vector<8x256xf32>
    %2 = tpu.matmul %0, %1, %cst {dimension_numbers = #tpu.dot_dimension_numbers<[1], [0], [0], [1], [0, 0, 1, 1], [], []>} : vector<8x72xbf16>, vector<72x256xbf16>, vector<8x256xf32> -> vector<8x256xf32>
    %c0_3 = arith.constant 0 : index
    %c0_4 = arith.constant 0 : index
    %3 = vector.load %arg3[%c0_3, %c0_4] : memref<8x1xf32, #tpu.memory_space<vmem>>, vector<8x1xf32>
    %4 = vector.broadcast %3 : vector<8x1xf32> to vector<8x256xf32>
    %5 = arith.mulf %2, %4 : vector<8x256xf32>
    %c0_5 = arith.constant 0 : index
    %c0_6 = arith.constant 0 : index
    %6 = vector.load %arg4[%c0_5, %c0_6] : memref<8x1xf32, #tpu.memory_space<vmem>>, vector<8x1xf32>
    %7 = vector.broadcast %6 : vector<8x1xf32> to vector<8x256xf32>
    %8 = arith.addf %5, %7 : vector<8x256xf32>
    %cst_7 = arith.constant 0.000000e+00 : f32
    %9 = vector.broadcast %cst_7 : f32 to vector<8x256xf32>
    %10 = arith.maximumf %8, %9 : vector<8x256xf32>
    %11 = arith.truncf %10 : vector<8x256xf32> to vector<8x256xbf16>
    %c0_8 = arith.constant 0 : index
    %c0_9 = arith.constant 0 : index
    %12 = vector.load %arg5[%c0_8, %c0_9] : memref<8x256xbf16, #tpu.memory_space<vmem>>, vector<8x256xbf16>
    tpu.vector_store %arg5[%c0_8, %c0_9], %11 {strides = array<i32>} : memref<8x256xbf16, #tpu.memory_space<vmem>>, vector<8x256xbf16>,
    return
  }
  func.func @transform_0(%arg0: i32) -> (i32, i32) {
    %c0_i32 = arith.constant 0 : i32
    %c0_i32_0 = arith.constant 0 : i32
    %c0_i32_1 = arith.constant 0 : i32
    return %c0_i32, %c0_i32_0 : i32, i32
  }
  func.func @transform_1(%arg0: i32) -> (i32, i32) {
    %c0_i32 = arith.constant 0 : i32
    %c0_i32_0 = arith.constant 0 : i32
    return %c0_i32, %arg0 : i32, i32
  }
  func.func @transform_2(%arg0: i32) -> (i32, i32) {
    %c0_i32 = arith.constant 0 : i32
    %c0_i32_0 = arith.constant 0 : i32
    %c0_i32_1 = arith.constant 0 : i32
    return %c0_i32, %c0_i32_0 : i32, i32
  }
  func.func @transform_3(%arg0: i32) -> (i32, i32) {
    %c0_i32 = arith.constant 0 : i32
    %c0_i32_0 = arith.constant 0 : i32
    %c0_i32_1 = arith.constant 0 : i32
    return %c0_i32, %c0_i32_0 : i32, i32
  }
  func.func @transform_4(%arg0: i32) -> (i32, i32) {
    %c0_i32 = arith.constant 0 : i32
    %c0_i32_0 = arith.constant 0 : i32
    return %c0_i32, %arg0 : i32, i32
  }
}

module attributes {stable_mosaic.version = 11 : i64} {
  func.func @kernel(%arg0: i32, %arg1: memref<8x72xbf16, #tpu.memory_space<vmem>>, %arg2: memref<72x256xbf16, #tpu.memory_space<vmem>>, %arg3: memref<8x256xf32, #tpu.memory_space<vmem>>, %arg4: memref<8x256xf32, #tpu.memory_space<vmem>>) attributes {dimension_semantics = [#tpu.dimension_semantics<parallel>], iteration_bounds = array<i64: 2>, scalar_prefetch = 0 : i64, scratch_operands = 0 : i64, tpu.core_type = #tpu.core_type<tc>, window_params = [{pipeline_mode = #tpu.pipeline_mode<synchronous>, transform_indices = @transform_0, window_bounds = array<i64: 8, 72>}, {transform_indices = @transform_1, window_bounds = array<i64: 72, 256>}, {transform_indices = @transform_2, window_bounds = array<i64: 8, 256>}, {transform_indices = @transform_3, window_bounds = array<i64: 8, 256>}]} {
    %c0 = arith.constant 0 : index
    %c0_0 = arith.constant 0 : index
    %0 = vector.load %arg1[%c0, %c0_0] : memref<8x72xbf16, #tpu.memory_space<vmem>>, vector<8x72xbf16>
    %c0_1 = arith.constant 0 : index
    %c0_2 = arith.constant 0 : index
    %1 = vector.load %arg2[%c0_1, %c0_2] : memref<72x256xbf16, #tpu.memory_space<vmem>>, vector<72x256xbf16>
    %cst = arith.constant dense<0.000000e+00> : vector<8x256xf32>
    %2 = tpu.matmul %0, %1, %cst {dimension_numbers = #tpu.dot_dimension_numbers<[1], [0], [0], [1], [0, 0, 1, 1], [], []>} : vector<8x72xbf16>, vector<72x256xbf16>, vector<8x256xf32> -> vector<8x256xf32>
    %c0_3 = arith.constant 0 : index
    %c0_4 = arith.constant 0 : index
    %3 = vector.load %arg3[%c0_3, %c0_4] : memref<8x256xf32, #tpu.memory_space<vmem>>, vector<8x256xf32>
    %4 = arith.addf %2, %3 : vector<8x256xf32>
    %c0_5 = arith.constant 0 : index
    %c0_6 = arith.constant 0 : index
    %5 = vector.load %arg4[%c0_5, %c0_6] : memref<8x256xf32, #tpu.memory_space<vmem>>, vector<8x256xf32>
    tpu.vector_store %arg4[%c0_5, %c0_6], %4 {strides = array<i32>} : memref<8x256xf32, #tpu.memory_space<vmem>>, vector<8x256xf32>,
    return
  }
  func.func @transform_0(%arg0: i32) -> (i32, i32) {
    %c0_i32 = arith.constant 0 : i32
    %c0_i32_0 = arith.constant 0 : i32
    %c0_i32_1 = arith.constant 0 : i32
    return %c0_i32, %c0_i32_0 : i32, i32
  }
  func.func @transform_1(%arg0: i32) -> (i32, i32) {
    %c0_i32 = arith.constant 0 : i32
    %c0_i32_0 = arith.constant 0 : i32
    return %c0_i32, %arg0 : i32, i32
  }
  func.func @transform_2(%arg0: i32) -> (i32, i32) {
    %c0_i32 = arith.constant 0 : i32
    %c0_i32_0 = arith.constant 0 : i32
    return %c0_i32, %arg0 : i32, i32
  }
  func.func @transform_3(%arg0: i32) -> (i32, i32) {
    %c0_i32 = arith.constant 0 : i32
    %c0_i32_0 = arith.constant 0 : i32
    return %c0_i32, %arg0 : i32, i32
  }
}

module attributes {stable_mosaic.version = 11 : i64} {
  func.func @kernel(%arg0: i32, %arg1: memref<16x72xbf16, #tpu.memory_space<vmem>>, %arg2: memref<72x128xbf16, #tpu.memory_space<vmem>>, %arg3: memref<16x1xf32, #tpu.memory_space<vmem>>, %arg4: memref<16x1xf32, #tpu.memory_space<vmem>>, %arg5: memref<16x128xbf16, #tpu.memory_space<vmem>>) attributes {dimension_semantics = [#tpu.dimension_semantics<parallel>], iteration_bounds = array<i64: 1>, scalar_prefetch = 0 : i64, scratch_operands = 0 : i64, tpu.core_type = #tpu.core_type<tc>, window_params = [{pipeline_mode = #tpu.pipeline_mode<synchronous>, transform_indices = @transform_0, window_bounds = array<i64: 16, 72>}, {transform_indices = @transform_1, window_bounds = array<i64: 72, 128>}, {pipeline_mode = #tpu.pipeline_mode<synchronous>, transform_indices = @transform_2, window_bounds = array<i64: 16, 1>}, {pipeline_mode = #tpu.pipeline_mode<synchronous>, transform_indices = @transform_3, window_bounds = array<i64: 16, 1>}, {transform_indices = @transform_4, window_bounds = array<i64: 16, 128>}]} {
    %c0 = arith.constant 0 : index
    %c0_0 = arith.constant 0 : index
    %0 = vector.load %arg1[%c0, %c0_0] : memref<16x72xbf16, #tpu.memory_space<vmem>>, vector<16x72xbf16>
    %c0_1 = arith.constant 0 : index
    %c0_2 = arith.constant 0 : index
    %1 = vector.load %arg2[%c0_1, %c0_2] : memref<72x128xbf16, #tpu.memory_space<vmem>>, vector<72x128xbf16>
    %cst = arith.constant dense<0.000000e+00> : vector<16x128xf32>
    %2 = tpu.matmul %0, %1, %cst {dimension_numbers = #tpu.dot_dimension_numbers<[1], [0], [0], [1], [0, 0, 1, 1], [], []>} : vector<16x72xbf16>, vector<72x128xbf16>, vector<16x128xf32> -> vector<16x128xf32>
    %c0_3 = arith.constant 0 : index
    %c0_4 = arith.constant 0 : index
    %3 = vector.load %arg3[%c0_3, %c0_4] : memref<16x1xf32, #tpu.memory_space<vmem>>, vector<16x1xf32>
    %4 = vector.broadcast %3 : vector<16x1xf32> to vector<16x128xf32>
    %5 = arith.mulf %2, %4 : vector<16x128xf32>
    %c0_5 = arith.constant 0 : index
    %c0_6 = arith.constant 0 : index
    %6 = vector.load %arg4[%c0_5, %c0_6] : memref<16x1xf32, #tpu.memory_space<vmem>>, vector<16x1xf32>
    %7 = vector.broadcast %6 : vector<16x1xf32> to vector<16x128xf32>
    %8 = arith.addf %5, %7 : vector<16x128xf32>
    %cst_7 = arith.constant 0.000000e+00 : f32
    %9 = vector.broadcast %cst_7 : f32 to vector<16x128xf32>
    %10 = arith.maximumf %8, %9 : vector<16x128xf32>
    %11 = arith.truncf %10 : vector<16x128xf32> to vector<16x128xbf16>
    %c0_8 = arith.constant 0 : index
    %c0_9 = arith.constant 0 : index
    %12 = vector.load %arg5[%c0_8, %c0_9] : memref<16x128xbf16, #tpu.memory_space<vmem>>, vector<16x128xbf16>
    tpu.vector_store %arg5[%c0_8, %c0_9], %11 {strides = array<i32>} : memref<16x128xbf16, #tpu.memory_space<vmem>>, vector<16x128xbf16>,
    return
  }
  func.func @transform_0(%arg0: i32) -> (i32, i32) {
    %c0_i32 = arith.constant 0 : i32
    %c0_i32_0 = arith.constant 0 : i32
    %c0_i32_1 = arith.constant 0 : i32
    return %c0_i32, %c0_i32_0 : i32, i32
  }
  func.func @transform_1(%arg0: i32) -> (i32, i32) {
    %c0_i32 = arith.constant 0 : i32
    %c0_i32_0 = arith.constant 0 : i32
    return %c0_i32, %arg0 : i32, i32
  }
  func.func @transform_2(%arg0: i32) -> (i32, i32) {
    %c0_i32 = arith.constant 0 : i32
    %c0_i32_0 = arith.constant 0 : i32
    %c0_i32_1 = arith.constant 0 : i32
    return %c0_i32, %c0_i32_0 : i32, i32
  }
  func.func @transform_3(%arg0: i32) -> (i32, i32) {
    %c0_i32 = arith.constant 0 : i32
    %c0_i32_0 = arith.constant 0 : i32
    %c0_i32_1 = arith.constant 0 : i32
    return %c0_i32, %c0_i32_0 : i32, i32
  }
  func.func @transform_4(%arg0: i32) -> (i32, i32) {
    %c0_i32 = arith.constant 0 : i32
    %c0_i32_0 = arith.constant 0 : i32
    return %c0_i32, %arg0 : i32, i32
  }
}

module attributes {stable_mosaic.version = 11 : i64} {
  func.func @kernel(%arg0: i32, %arg1: memref<16x144xbf16, #tpu.memory_space<vmem>>, %arg2: memref<144x128xbf16, #tpu.memory_space<vmem>>, %arg3: memref<16x128xf32, #tpu.memory_space<vmem>>, %arg4: memref<16x128xf32, #tpu.memory_space<vmem>>) attributes {dimension_semantics = [#tpu.dimension_semantics<parallel>], iteration_bounds = array<i64: 1>, scalar_prefetch = 0 : i64, scratch_operands = 0 : i64, tpu.core_type = #tpu.core_type<tc>, window_params = [{pipeline_mode = #tpu.pipeline_mode<synchronous>, transform_indices = @transform_0, window_bounds = array<i64: 16, 144>}, {transform_indices = @transform_1, window_bounds = array<i64: 144, 128>}, {transform_indices = @transform_2, window_bounds = array<i64: 16, 128>}, {transform_indices = @transform_3, window_bounds = array<i64: 16, 128>}]} {
    %c0 = arith.constant 0 : index
    %c0_0 = arith.constant 0 : index
    %0 = vector.load %arg1[%c0, %c0_0] : memref<16x144xbf16, #tpu.memory_space<vmem>>, vector<16x144xbf16>
    %c0_1 = arith.constant 0 : index
    %c0_2 = arith.constant 0 : index
    %1 = vector.load %arg2[%c0_1, %c0_2] : memref<144x128xbf16, #tpu.memory_space<vmem>>, vector<144x128xbf16>
    %cst = arith.constant dense<0.000000e+00> : vector<16x128xf32>
    %2 = tpu.matmul %0, %1, %cst {dimension_numbers = #tpu.dot_dimension_numbers<[1], [0], [0], [1], [0, 0, 1, 1], [], []>} : vector<16x144xbf16>, vector<144x128xbf16>, vector<16x128xf32> -> vector<16x128xf32>
    %c0_3 = arith.constant 0 : index
    %c0_4 = arith.constant 0 : index
    %3 = vector.load %arg3[%c0_3, %c0_4] : memref<16x128xf32, #tpu.memory_space<vmem>>, vector<16x128xf32>
    %4 = arith.addf %2, %3 : vector<16x128xf32>
    %c0_5 = arith.constant 0 : index
    %c0_6 = arith.constant 0 : index
    %5 = vector.load %arg4[%c0_5, %c0_6] : memref<16x128xf32, #tpu.memory_space<vmem>>, vector<16x128xf32>
    tpu.vector_store %arg4[%c0_5, %c0_6], %4 {strides = array<i32>} : memref<16x128xf32, #tpu.memory_space<vmem>>, vector<16x128xf32>,
    return
  }
  func.func @transform_0(%arg0: i32) -> (i32, i32) {
    %c0_i32 = arith.constant 0 : i32
    %c0_i32_0 = arith.constant 0 : i32
    %c0_i32_1 = arith.constant 0 : i32
    return %c0_i32, %c0_i32_0 : i32, i32
  }
  func.func @transform_1(%arg0: i32) -> (i32, i32) {
    %c0_i32 = arith.constant 0 : i32
    %c0_i32_0 = arith.constant 0 : i32
    return %c0_i32, %arg0 : i32, i32
  }
  func.func @transform_2(%arg0: i32) -> (i32, i32) {
    %c0_i32 = arith.constant 0 : i32
    %c0_i32_0 = arith.constant 0 : i32
    return %c0_i32, %arg0 : i32, i32
  }
  func.func @transform_3(%arg0: i32) -> (i32, i32) {
    %c0_i32 = arith.constant 0 : i32
    %c0_i32_0 = arith.constant 0 : i32
    return %c0_i32, %arg0 : i32, i32
  }
}

module attributes {stable_mosaic.version = 11 : i64} {
  func.func @kernel(%arg0: i32, %arg1: memref<16x8xbf16, #tpu.memory_space<vmem>>, %arg2: memref<8x128xbf16, #tpu.memory_space<vmem>>, %arg3: memref<16x128xf32, #tpu.memory_space<vmem>>) attributes {dimension_semantics = [#tpu.dimension_semantics<parallel>], iteration_bounds = array<i64: 1>, scalar_prefetch = 0 : i64, scratch_operands = 0 : i64, tpu.core_type = #tpu.core_type<tc>, window_params = [{pipeline_mode = #tpu.pipeline_mode<synchronous>, transform_indices = @transform_0, window_bounds = array<i64: 16, 8>}, {transform_indices = @transform_1, window_bounds = array<i64: 8, 128>}, {transform_indices = @transform_2, window_bounds = array<i64: 16, 128>}]} {
    %c0 = arith.constant 0 : index
    %c0_0 = arith.constant 0 : index
    %0 = vector.load %arg1[%c0, %c0_0] : memref<16x8xbf16, #tpu.memory_space<vmem>>, vector<16x8xbf16>
    %c0_1 = arith.constant 0 : index
    %c0_2 = arith.constant 0 : index
    %1 = vector.load %arg2[%c0_1, %c0_2] : memref<8x128xbf16, #tpu.memory_space<vmem>>, vector<8x128xbf16>
    %cst = arith.constant dense<0.000000e+00> : vector<16x128xf32>
    %2 = tpu.matmul %0, %1, %cst {dimension_numbers = #tpu.dot_dimension_numbers<[1], [0], [0], [1], [0, 0, 1, 1], [], []>} : vector<16x8xbf16>, vector<8x128xbf16>, vector<16x128xf32> -> vector<16x128xf32>
    %c0_3 = arith.constant 0 : index
    %c0_4 = arith.constant 0 : index
    %3 = vector.load %arg3[%c0_3, %c0_4] : memref<16x128xf32, #tpu.memory_space<vmem>>, vector<16x128xf32>
    tpu.vector_store %arg3[%c0_3, %c0_4], %2 {strides = array<i32>} : memref<16x128xf32, #tpu.memory_space<vmem>>, vector<16x128xf32>,
    return
  }
  func.func @transform_0(%arg0: i32) -> (i32, i32) {
    %c0_i32 = arith.constant 0 : i32
    %c0_i32_0 = arith.constant 0 : i32
    %c0_i32_1 = arith.constant 0 : i32
    return %c0_i32, %c0_i32_0 : i32, i32
  }
  func.func @transform_1(%arg0: i32) -> (i32, i32) {
    %c0_i32 = arith.constant 0 : i32
    %c0_i32_0 = arith.constant 0 : i32
    return %c0_i32, %arg0 : i32, i32
  }
  func.func @transform_2(%arg0: i32) -> (i32, i32) {
    %c0_i32 = arith.constant 0 : i32
    %c0_i32_0 = arith.constant 0 : i32
    return %c0_i32, %arg0 : i32, i32
  }
}

module attributes {stable_mosaic.version = 11 : i64} {
  func.func @_bn_relu_kernel(%arg0: i32, %arg1: memref<16x128xf32, #tpu.memory_space<vmem>>, %arg2: memref<16x1xf32, #tpu.memory_space<vmem>>, %arg3: memref<16x1xf32, #tpu.memory_space<vmem>>, %arg4: memref<16x128xbf16, #tpu.memory_space<vmem>>) attributes {dimension_semantics = [#tpu.dimension_semantics<parallel>], iteration_bounds = array<i64: 1>, scalar_prefetch = 0 : i64, scratch_operands = 0 : i64, tpu.core_type = #tpu.core_type<tc>, window_params = [{transform_indices = @transform_0, window_bounds = array<i64: 16, 128>}, {pipeline_mode = #tpu.pipeline_mode<synchronous>, transform_indices = @transform_1, window_bounds = array<i64: 16, 1>}, {pipeline_mode = #tpu.pipeline_mode<synchronous>, transform_indices = @transform_2, window_bounds = array<i64: 16, 1>}, {transform_indices = @transform_3, window_bounds = array<i64: 16, 128>}]} {
    %c0 = arith.constant 0 : index
    %c0_0 = arith.constant 0 : index
    %0 = vector.load %arg1[%c0, %c0_0] : memref<16x128xf32, #tpu.memory_space<vmem>>, vector<16x128xf32>
    %c0_1 = arith.constant 0 : index
    %c0_2 = arith.constant 0 : index
    %1 = vector.load %arg2[%c0_1, %c0_2] : memref<16x1xf32, #tpu.memory_space<vmem>>, vector<16x1xf32>
    %2 = vector.broadcast %1 : vector<16x1xf32> to vector<16x128xf32>
    %3 = arith.mulf %0, %2 : vector<16x128xf32>
    %c0_3 = arith.constant 0 : index
    %c0_4 = arith.constant 0 : index
    %4 = vector.load %arg3[%c0_3, %c0_4] : memref<16x1xf32, #tpu.memory_space<vmem>>, vector<16x1xf32>
    %5 = vector.broadcast %4 : vector<16x1xf32> to vector<16x128xf32>
    %6 = arith.addf %3, %5 : vector<16x128xf32>
    %cst = arith.constant 0.000000e+00 : f32
    %7 = vector.broadcast %cst : f32 to vector<16x128xf32>
    %8 = arith.maximumf %6, %7 : vector<16x128xf32>
    %9 = arith.truncf %8 : vector<16x128xf32> to vector<16x128xbf16>
    %c0_5 = arith.constant 0 : index
    %c0_6 = arith.constant 0 : index
    %10 = vector.load %arg4[%c0_5, %c0_6] : memref<16x128xbf16, #tpu.memory_space<vmem>>, vector<16x128xbf16>
    tpu.vector_store %arg4[%c0_5, %c0_6], %9 {strides = array<i32>} : memref<16x128xbf16, #tpu.memory_space<vmem>>, vector<16x128xbf16>,
    return
  }
  func.func @transform_0(%arg0: i32) -> (i32, i32) {
    %c0_i32 = arith.constant 0 : i32
    %c0_i32_0 = arith.constant 0 : i32
    return %c0_i32, %arg0 : i32, i32
  }
  func.func @transform_1(%arg0: i32) -> (i32, i32) {
    %c0_i32 = arith.constant 0 : i32
    %c0_i32_0 = arith.constant 0 : i32
    %c0_i32_1 = arith.constant 0 : i32
    return %c0_i32, %c0_i32_0 : i32, i32
  }
  func.func @transform_2(%arg0: i32) -> (i32, i32) {
    %c0_i32 = arith.constant 0 : i32
    %c0_i32_0 = arith.constant 0 : i32
    %c0_i32_1 = arith.constant 0 : i32
    return %c0_i32, %c0_i32_0 : i32, i32
  }
  func.func @transform_3(%arg0: i32) -> (i32, i32) {
    %c0_i32 = arith.constant 0 : i32
    %c0_i32_0 = arith.constant 0 : i32
    return %c0_i32, %arg0 : i32, i32
  }
}

module attributes {stable_mosaic.version = 11 : i64} {
  func.func @kernel(%arg0: i32, %arg1: memref<16x144xbf16, #tpu.memory_space<vmem>>, %arg2: memref<144x128xbf16, #tpu.memory_space<vmem>>, %arg3: memref<16x1xf32, #tpu.memory_space<vmem>>, %arg4: memref<16x1xf32, #tpu.memory_space<vmem>>, %arg5: memref<16x128xbf16, #tpu.memory_space<vmem>>) attributes {dimension_semantics = [#tpu.dimension_semantics<parallel>], iteration_bounds = array<i64: 1>, scalar_prefetch = 0 : i64, scratch_operands = 0 : i64, tpu.core_type = #tpu.core_type<tc>, window_params = [{pipeline_mode = #tpu.pipeline_mode<synchronous>, transform_indices = @transform_0, window_bounds = array<i64: 16, 144>}, {transform_indices = @transform_1, window_bounds = array<i64: 144, 128>}, {pipeline_mode = #tpu.pipeline_mode<synchronous>, transform_indices = @transform_2, window_bounds = array<i64: 16, 1>}, {pipeline_mode = #tpu.pipeline_mode<synchronous>, transform_indices = @transform_3, window_bounds = array<i64: 16, 1>}, {transform_indices = @transform_4, window_bounds = array<i64: 16, 128>}]} {
    %c0 = arith.constant 0 : index
    %c0_0 = arith.constant 0 : index
    %0 = vector.load %arg1[%c0, %c0_0] : memref<16x144xbf16, #tpu.memory_space<vmem>>, vector<16x144xbf16>
    %c0_1 = arith.constant 0 : index
    %c0_2 = arith.constant 0 : index
    %1 = vector.load %arg2[%c0_1, %c0_2] : memref<144x128xbf16, #tpu.memory_space<vmem>>, vector<144x128xbf16>
    %cst = arith.constant dense<0.000000e+00> : vector<16x128xf32>
    %2 = tpu.matmul %0, %1, %cst {dimension_numbers = #tpu.dot_dimension_numbers<[1], [0], [0], [1], [0, 0, 1, 1], [], []>} : vector<16x144xbf16>, vector<144x128xbf16>, vector<16x128xf32> -> vector<16x128xf32>
    %c0_3 = arith.constant 0 : index
    %c0_4 = arith.constant 0 : index
    %3 = vector.load %arg3[%c0_3, %c0_4] : memref<16x1xf32, #tpu.memory_space<vmem>>, vector<16x1xf32>
    %4 = vector.broadcast %3 : vector<16x1xf32> to vector<16x128xf32>
    %5 = arith.mulf %2, %4 : vector<16x128xf32>
    %c0_5 = arith.constant 0 : index
    %c0_6 = arith.constant 0 : index
    %6 = vector.load %arg4[%c0_5, %c0_6] : memref<16x1xf32, #tpu.memory_space<vmem>>, vector<16x1xf32>
    %7 = vector.broadcast %6 : vector<16x1xf32> to vector<16x128xf32>
    %8 = arith.addf %5, %7 : vector<16x128xf32>
    %cst_7 = arith.constant 0.000000e+00 : f32
    %9 = vector.broadcast %cst_7 : f32 to vector<16x128xf32>
    %10 = arith.maximumf %8, %9 : vector<16x128xf32>
    %11 = arith.truncf %10 : vector<16x128xf32> to vector<16x128xbf16>
    %c0_8 = arith.constant 0 : index
    %c0_9 = arith.constant 0 : index
    %12 = vector.load %arg5[%c0_8, %c0_9] : memref<16x128xbf16, #tpu.memory_space<vmem>>, vector<16x128xbf16>
    tpu.vector_store %arg5[%c0_8, %c0_9], %11 {strides = array<i32>} : memref<16x128xbf16, #tpu.memory_space<vmem>>, vector<16x128xbf16>,
    return
  }
  func.func @transform_0(%arg0: i32) -> (i32, i32) {
    %c0_i32 = arith.constant 0 : i32
    %c0_i32_0 = arith.constant 0 : i32
    %c0_i32_1 = arith.constant 0 : i32
    return %c0_i32, %c0_i32_0 : i32, i32
  }
  func.func @transform_1(%arg0: i32) -> (i32, i32) {
    %c0_i32 = arith.constant 0 : i32
    %c0_i32_0 = arith.constant 0 : i32
    return %c0_i32, %arg0 : i32, i32
  }
  func.func @transform_2(%arg0: i32) -> (i32, i32) {
    %c0_i32 = arith.constant 0 : i32
    %c0_i32_0 = arith.constant 0 : i32
    %c0_i32_1 = arith.constant 0 : i32
    return %c0_i32, %c0_i32_0 : i32, i32
  }
  func.func @transform_3(%arg0: i32) -> (i32, i32) {
    %c0_i32 = arith.constant 0 : i32
    %c0_i32_0 = arith.constant 0 : i32
    %c0_i32_1 = arith.constant 0 : i32
    return %c0_i32, %c0_i32_0 : i32, i32
  }
  func.func @transform_4(%arg0: i32) -> (i32, i32) {
    %c0_i32 = arith.constant 0 : i32
    %c0_i32_0 = arith.constant 0 : i32
    return %c0_i32, %arg0 : i32, i32
  }
}

module attributes {stable_mosaic.version = 11 : i64} {
  func.func @kernel(%arg0: i32, %arg1: memref<32x144xbf16, #tpu.memory_space<vmem>>, %arg2: memref<144x32xbf16, #tpu.memory_space<vmem>>, %arg3: memref<32x1xf32, #tpu.memory_space<vmem>>, %arg4: memref<32x1xf32, #tpu.memory_space<vmem>>, %arg5: memref<32x32xbf16, #tpu.memory_space<vmem>>) attributes {dimension_semantics = [#tpu.dimension_semantics<parallel>], iteration_bounds = array<i64: 1>, scalar_prefetch = 0 : i64, scratch_operands = 0 : i64, tpu.core_type = #tpu.core_type<tc>, window_params = [{pipeline_mode = #tpu.pipeline_mode<synchronous>, transform_indices = @transform_0, window_bounds = array<i64: 32, 144>}, {transform_indices = @transform_1, window_bounds = array<i64: 144, 32>}, {pipeline_mode = #tpu.pipeline_mode<synchronous>, transform_indices = @transform_2, window_bounds = array<i64: 32, 1>}, {pipeline_mode = #tpu.pipeline_mode<synchronous>, transform_indices = @transform_3, window_bounds = array<i64: 32, 1>}, {transform_indices = @transform_4, window_bounds = array<i64: 32, 32>}]} {
    %c0 = arith.constant 0 : index
    %c0_0 = arith.constant 0 : index
    %0 = vector.load %arg1[%c0, %c0_0] : memref<32x144xbf16, #tpu.memory_space<vmem>>, vector<32x144xbf16>
    %c0_1 = arith.constant 0 : index
    %c0_2 = arith.constant 0 : index
    %1 = vector.load %arg2[%c0_1, %c0_2] : memref<144x32xbf16, #tpu.memory_space<vmem>>, vector<144x32xbf16>
    %cst = arith.constant dense<0.000000e+00> : vector<32x32xf32>
    %2 = tpu.matmul %0, %1, %cst {dimension_numbers = #tpu.dot_dimension_numbers<[1], [0], [0], [1], [0, 0, 1, 1], [], []>} : vector<32x144xbf16>, vector<144x32xbf16>, vector<32x32xf32> -> vector<32x32xf32>
    %c0_3 = arith.constant 0 : index
    %c0_4 = arith.constant 0 : index
    %3 = vector.load %arg3[%c0_3, %c0_4] : memref<32x1xf32, #tpu.memory_space<vmem>>, vector<32x1xf32>
    %4 = vector.broadcast %3 : vector<32x1xf32> to vector<32x32xf32>
    %5 = arith.mulf %2, %4 : vector<32x32xf32>
    %c0_5 = arith.constant 0 : index
    %c0_6 = arith.constant 0 : index
    %6 = vector.load %arg4[%c0_5, %c0_6] : memref<32x1xf32, #tpu.memory_space<vmem>>, vector<32x1xf32>
    %7 = vector.broadcast %6 : vector<32x1xf32> to vector<32x32xf32>
    %8 = arith.addf %5, %7 : vector<32x32xf32>
    %cst_7 = arith.constant 0.000000e+00 : f32
    %9 = vector.broadcast %cst_7 : f32 to vector<32x32xf32>
    %10 = arith.maximumf %8, %9 : vector<32x32xf32>
    %11 = arith.truncf %10 : vector<32x32xf32> to vector<32x32xbf16>
    %c0_8 = arith.constant 0 : index
    %c0_9 = arith.constant 0 : index
    %12 = vector.load %arg5[%c0_8, %c0_9] : memref<32x32xbf16, #tpu.memory_space<vmem>>, vector<32x32xbf16>
    tpu.vector_store %arg5[%c0_8, %c0_9], %11 {strides = array<i32>} : memref<32x32xbf16, #tpu.memory_space<vmem>>, vector<32x32xbf16>,
    return
  }
  func.func @transform_0(%arg0: i32) -> (i32, i32) {
    %c0_i32 = arith.constant 0 : i32
    %c0_i32_0 = arith.constant 0 : i32
    %c0_i32_1 = arith.constant 0 : i32
    return %c0_i32, %c0_i32_0 : i32, i32
  }
  func.func @transform_1(%arg0: i32) -> (i32, i32) {
    %c0_i32 = arith.constant 0 : i32
    %c0_i32_0 = arith.constant 0 : i32
    return %c0_i32, %arg0 : i32, i32
  }
  func.func @transform_2(%arg0: i32) -> (i32, i32) {
    %c0_i32 = arith.constant 0 : i32
    %c0_i32_0 = arith.constant 0 : i32
    %c0_i32_1 = arith.constant 0 : i32
    return %c0_i32, %c0_i32_0 : i32, i32
  }
  func.func @transform_3(%arg0: i32) -> (i32, i32) {
    %c0_i32 = arith.constant 0 : i32
    %c0_i32_0 = arith.constant 0 : i32
    %c0_i32_1 = arith.constant 0 : i32
    return %c0_i32, %c0_i32_0 : i32, i32
  }
  func.func @transform_4(%arg0: i32) -> (i32, i32) {
    %c0_i32 = arith.constant 0 : i32
    %c0_i32_0 = arith.constant 0 : i32
    return %c0_i32, %arg0 : i32, i32
  }
}

module attributes {stable_mosaic.version = 11 : i64} {
  func.func @kernel(%arg0: i32, %arg1: memref<32x16xbf16, #tpu.memory_space<vmem>>, %arg2: memref<16x32xbf16, #tpu.memory_space<vmem>>, %arg3: memref<32x32xf32, #tpu.memory_space<vmem>>) attributes {dimension_semantics = [#tpu.dimension_semantics<parallel>], iteration_bounds = array<i64: 1>, scalar_prefetch = 0 : i64, scratch_operands = 0 : i64, tpu.core_type = #tpu.core_type<tc>, window_params = [{pipeline_mode = #tpu.pipeline_mode<synchronous>, transform_indices = @transform_0, window_bounds = array<i64: 32, 16>}, {transform_indices = @transform_1, window_bounds = array<i64: 16, 32>}, {transform_indices = @transform_2, window_bounds = array<i64: 32, 32>}]} {
    %c0 = arith.constant 0 : index
    %c0_0 = arith.constant 0 : index
    %0 = vector.load %arg1[%c0, %c0_0] : memref<32x16xbf16, #tpu.memory_space<vmem>>, vector<32x16xbf16>
    %c0_1 = arith.constant 0 : index
    %c0_2 = arith.constant 0 : index
    %1 = vector.load %arg2[%c0_1, %c0_2] : memref<16x32xbf16, #tpu.memory_space<vmem>>, vector<16x32xbf16>
    %cst = arith.constant dense<0.000000e+00> : vector<32x32xf32>
    %2 = tpu.matmul %0, %1, %cst {dimension_numbers = #tpu.dot_dimension_numbers<[1], [0], [0], [1], [0, 0, 1, 1], [], []>} : vector<32x16xbf16>, vector<16x32xbf16>, vector<32x32xf32> -> vector<32x32xf32>
    %c0_3 = arith.constant 0 : index
    %c0_4 = arith.constant 0 : index
    %3 = vector.load %arg3[%c0_3, %c0_4] : memref<32x32xf32, #tpu.memory_space<vmem>>, vector<32x32xf32>
    tpu.vector_store %arg3[%c0_3, %c0_4], %2 {strides = array<i32>} : memref<32x32xf32, #tpu.memory_space<vmem>>, vector<32x32xf32>,
    return
  }
  func.func @transform_0(%arg0: i32) -> (i32, i32) {
    %c0_i32 = arith.constant 0 : i32
    %c0_i32_0 = arith.constant 0 : i32
    %c0_i32_1 = arith.constant 0 : i32
    return %c0_i32, %c0_i32_0 : i32, i32
  }
  func.func @transform_1(%arg0: i32) -> (i32, i32) {
    %c0_i32 = arith.constant 0 : i32
    %c0_i32_0 = arith.constant 0 : i32
    return %c0_i32, %arg0 : i32, i32
  }
  func.func @transform_2(%arg0: i32) -> (i32, i32) {
    %c0_i32 = arith.constant 0 : i32
    %c0_i32_0 = arith.constant 0 : i32
    return %c0_i32, %arg0 : i32, i32
  }
}

module attributes {stable_mosaic.version = 11 : i64} {
  func.func @kernel(%arg0: i32, %arg1: memref<32x288xbf16, #tpu.memory_space<vmem>>, %arg2: memref<288x32xbf16, #tpu.memory_space<vmem>>, %arg3: memref<32x32xf32, #tpu.memory_space<vmem>>, %arg4: memref<32x32xf32, #tpu.memory_space<vmem>>) attributes {dimension_semantics = [#tpu.dimension_semantics<parallel>], iteration_bounds = array<i64: 1>, scalar_prefetch = 0 : i64, scratch_operands = 0 : i64, tpu.core_type = #tpu.core_type<tc>, window_params = [{pipeline_mode = #tpu.pipeline_mode<synchronous>, transform_indices = @transform_0, window_bounds = array<i64: 32, 288>}, {transform_indices = @transform_1, window_bounds = array<i64: 288, 32>}, {transform_indices = @transform_2, window_bounds = array<i64: 32, 32>}, {transform_indices = @transform_3, window_bounds = array<i64: 32, 32>}]} {
    %c0 = arith.constant 0 : index
    %c0_0 = arith.constant 0 : index
    %0 = vector.load %arg1[%c0, %c0_0] : memref<32x288xbf16, #tpu.memory_space<vmem>>, vector<32x288xbf16>
    %c0_1 = arith.constant 0 : index
    %c0_2 = arith.constant 0 : index
    %1 = vector.load %arg2[%c0_1, %c0_2] : memref<288x32xbf16, #tpu.memory_space<vmem>>, vector<288x32xbf16>
    %cst = arith.constant dense<0.000000e+00> : vector<32x32xf32>
    %2 = tpu.matmul %0, %1, %cst {dimension_numbers = #tpu.dot_dimension_numbers<[1], [0], [0], [1], [0, 0, 1, 1], [], []>} : vector<32x288xbf16>, vector<288x32xbf16>, vector<32x32xf32> -> vector<32x32xf32>
    %c0_3 = arith.constant 0 : index
    %c0_4 = arith.constant 0 : index
    %3 = vector.load %arg3[%c0_3, %c0_4] : memref<32x32xf32, #tpu.memory_space<vmem>>, vector<32x32xf32>
    %4 = arith.addf %2, %3 : vector<32x32xf32>
    %c0_5 = arith.constant 0 : index
    %c0_6 = arith.constant 0 : index
    %5 = vector.load %arg4[%c0_5, %c0_6] : memref<32x32xf32, #tpu.memory_space<vmem>>, vector<32x32xf32>
    tpu.vector_store %arg4[%c0_5, %c0_6], %4 {strides = array<i32>} : memref<32x32xf32, #tpu.memory_space<vmem>>, vector<32x32xf32>,
    return
  }
  func.func @transform_0(%arg0: i32) -> (i32, i32) {
    %c0_i32 = arith.constant 0 : i32
    %c0_i32_0 = arith.constant 0 : i32
    %c0_i32_1 = arith.constant 0 : i32
    return %c0_i32, %c0_i32_0 : i32, i32
  }
  func.func @transform_1(%arg0: i32) -> (i32, i32) {
    %c0_i32 = arith.constant 0 : i32
    %c0_i32_0 = arith.constant 0 : i32
    return %c0_i32, %arg0 : i32, i32
  }
  func.func @transform_2(%arg0: i32) -> (i32, i32) {
    %c0_i32 = arith.constant 0 : i32
    %c0_i32_0 = arith.constant 0 : i32
    return %c0_i32, %arg0 : i32, i32
  }
  func.func @transform_3(%arg0: i32) -> (i32, i32) {
    %c0_i32 = arith.constant 0 : i32
    %c0_i32_0 = arith.constant 0 : i32
    return %c0_i32, %arg0 : i32, i32
  }
}

module attributes {stable_mosaic.version = 11 : i64} {
  func.func @_bn_relu_kernel(%arg0: i32, %arg1: memref<32x32xf32, #tpu.memory_space<vmem>>, %arg2: memref<32x1xf32, #tpu.memory_space<vmem>>, %arg3: memref<32x1xf32, #tpu.memory_space<vmem>>, %arg4: memref<32x32xbf16, #tpu.memory_space<vmem>>) attributes {dimension_semantics = [#tpu.dimension_semantics<parallel>], iteration_bounds = array<i64: 1>, scalar_prefetch = 0 : i64, scratch_operands = 0 : i64, tpu.core_type = #tpu.core_type<tc>, window_params = [{transform_indices = @transform_0, window_bounds = array<i64: 32, 32>}, {pipeline_mode = #tpu.pipeline_mode<synchronous>, transform_indices = @transform_1, window_bounds = array<i64: 32, 1>}, {pipeline_mode = #tpu.pipeline_mode<synchronous>, transform_indices = @transform_2, window_bounds = array<i64: 32, 1>}, {transform_indices = @transform_3, window_bounds = array<i64: 32, 32>}]} {
    %c0 = arith.constant 0 : index
    %c0_0 = arith.constant 0 : index
    %0 = vector.load %arg1[%c0, %c0_0] : memref<32x32xf32, #tpu.memory_space<vmem>>, vector<32x32xf32>
    %c0_1 = arith.constant 0 : index
    %c0_2 = arith.constant 0 : index
    %1 = vector.load %arg2[%c0_1, %c0_2] : memref<32x1xf32, #tpu.memory_space<vmem>>, vector<32x1xf32>
    %2 = vector.broadcast %1 : vector<32x1xf32> to vector<32x32xf32>
    %3 = arith.mulf %0, %2 : vector<32x32xf32>
    %c0_3 = arith.constant 0 : index
    %c0_4 = arith.constant 0 : index
    %4 = vector.load %arg3[%c0_3, %c0_4] : memref<32x1xf32, #tpu.memory_space<vmem>>, vector<32x1xf32>
    %5 = vector.broadcast %4 : vector<32x1xf32> to vector<32x32xf32>
    %6 = arith.addf %3, %5 : vector<32x32xf32>
    %cst = arith.constant 0.000000e+00 : f32
    %7 = vector.broadcast %cst : f32 to vector<32x32xf32>
    %8 = arith.maximumf %6, %7 : vector<32x32xf32>
    %9 = arith.truncf %8 : vector<32x32xf32> to vector<32x32xbf16>
    %c0_5 = arith.constant 0 : index
    %c0_6 = arith.constant 0 : index
    %10 = vector.load %arg4[%c0_5, %c0_6] : memref<32x32xbf16, #tpu.memory_space<vmem>>, vector<32x32xbf16>
    tpu.vector_store %arg4[%c0_5, %c0_6], %9 {strides = array<i32>} : memref<32x32xbf16, #tpu.memory_space<vmem>>, vector<32x32xbf16>,
    return
  }
  func.func @transform_0(%arg0: i32) -> (i32, i32) {
    %c0_i32 = arith.constant 0 : i32
    %c0_i32_0 = arith.constant 0 : i32
    return %c0_i32, %arg0 : i32, i32
  }
  func.func @transform_1(%arg0: i32) -> (i32, i32) {
    %c0_i32 = arith.constant 0 : i32
    %c0_i32_0 = arith.constant 0 : i32
    %c0_i32_1 = arith.constant 0 : i32
    return %c0_i32, %c0_i32_0 : i32, i32
  }
  func.func @transform_2(%arg0: i32) -> (i32, i32) {
    %c0_i32 = arith.constant 0 : i32
    %c0_i32_0 = arith.constant 0 : i32
    %c0_i32_1 = arith.constant 0 : i32
    return %c0_i32, %c0_i32_0 : i32, i32
  }
  func.func @transform_3(%arg0: i32) -> (i32, i32) {
    %c0_i32 = arith.constant 0 : i32
    %c0_i32_0 = arith.constant 0 : i32
    return %c0_i32, %arg0 : i32, i32
  }
}

module attributes {stable_mosaic.version = 11 : i64} {
  func.func @kernel(%arg0: i32, %arg1: memref<32x288xbf16, #tpu.memory_space<vmem>>, %arg2: memref<288x32xbf16, #tpu.memory_space<vmem>>, %arg3: memref<32x1xf32, #tpu.memory_space<vmem>>, %arg4: memref<32x1xf32, #tpu.memory_space<vmem>>, %arg5: memref<32x32xbf16, #tpu.memory_space<vmem>>) attributes {dimension_semantics = [#tpu.dimension_semantics<parallel>], iteration_bounds = array<i64: 1>, scalar_prefetch = 0 : i64, scratch_operands = 0 : i64, tpu.core_type = #tpu.core_type<tc>, window_params = [{pipeline_mode = #tpu.pipeline_mode<synchronous>, transform_indices = @transform_0, window_bounds = array<i64: 32, 288>}, {transform_indices = @transform_1, window_bounds = array<i64: 288, 32>}, {pipeline_mode = #tpu.pipeline_mode<synchronous>, transform_indices = @transform_2, window_bounds = array<i64: 32, 1>}, {pipeline_mode = #tpu.pipeline_mode<synchronous>, transform_indices = @transform_3, window_bounds = array<i64: 32, 1>}, {transform_indices = @transform_4, window_bounds = array<i64: 32, 32>}]} {
    %c0 = arith.constant 0 : index
    %c0_0 = arith.constant 0 : index
    %0 = vector.load %arg1[%c0, %c0_0] : memref<32x288xbf16, #tpu.memory_space<vmem>>, vector<32x288xbf16>
    %c0_1 = arith.constant 0 : index
    %c0_2 = arith.constant 0 : index
    %1 = vector.load %arg2[%c0_1, %c0_2] : memref<288x32xbf16, #tpu.memory_space<vmem>>, vector<288x32xbf16>
    %cst = arith.constant dense<0.000000e+00> : vector<32x32xf32>
    %2 = tpu.matmul %0, %1, %cst {dimension_numbers = #tpu.dot_dimension_numbers<[1], [0], [0], [1], [0, 0, 1, 1], [], []>} : vector<32x288xbf16>, vector<288x32xbf16>, vector<32x32xf32> -> vector<32x32xf32>
    %c0_3 = arith.constant 0 : index
    %c0_4 = arith.constant 0 : index
    %3 = vector.load %arg3[%c0_3, %c0_4] : memref<32x1xf32, #tpu.memory_space<vmem>>, vector<32x1xf32>
    %4 = vector.broadcast %3 : vector<32x1xf32> to vector<32x32xf32>
    %5 = arith.mulf %2, %4 : vector<32x32xf32>
    %c0_5 = arith.constant 0 : index
    %c0_6 = arith.constant 0 : index
    %6 = vector.load %arg4[%c0_5, %c0_6] : memref<32x1xf32, #tpu.memory_space<vmem>>, vector<32x1xf32>
    %7 = vector.broadcast %6 : vector<32x1xf32> to vector<32x32xf32>
    %8 = arith.addf %5, %7 : vector<32x32xf32>
    %cst_7 = arith.constant 0.000000e+00 : f32
    %9 = vector.broadcast %cst_7 : f32 to vector<32x32xf32>
    %10 = arith.maximumf %8, %9 : vector<32x32xf32>
    %11 = arith.truncf %10 : vector<32x32xf32> to vector<32x32xbf16>
    %c0_8 = arith.constant 0 : index
    %c0_9 = arith.constant 0 : index
    %12 = vector.load %arg5[%c0_8, %c0_9] : memref<32x32xbf16, #tpu.memory_space<vmem>>, vector<32x32xbf16>
    tpu.vector_store %arg5[%c0_8, %c0_9], %11 {strides = array<i32>} : memref<32x32xbf16, #tpu.memory_space<vmem>>, vector<32x32xbf16>,
    return
  }
  func.func @transform_0(%arg0: i32) -> (i32, i32) {
    %c0_i32 = arith.constant 0 : i32
    %c0_i32_0 = arith.constant 0 : i32
    %c0_i32_1 = arith.constant 0 : i32
    return %c0_i32, %c0_i32_0 : i32, i32
  }
  func.func @transform_1(%arg0: i32) -> (i32, i32) {
    %c0_i32 = arith.constant 0 : i32
    %c0_i32_0 = arith.constant 0 : i32
    return %c0_i32, %arg0 : i32, i32
  }
  func.func @transform_2(%arg0: i32) -> (i32, i32) {
    %c0_i32 = arith.constant 0 : i32
    %c0_i32_0 = arith.constant 0 : i32
    %c0_i32_1 = arith.constant 0 : i32
    return %c0_i32, %c0_i32_0 : i32, i32
  }
  func.func @transform_3(%arg0: i32) -> (i32, i32) {
    %c0_i32 = arith.constant 0 : i32
    %c0_i32_0 = arith.constant 0 : i32
    %c0_i32_1 = arith.constant 0 : i32
    return %c0_i32, %c0_i32_0 : i32, i32
  }
  func.func @transform_4(%arg0: i32) -> (i32, i32) {
    %c0_i32 = arith.constant 0 : i32
    %c0_i32_0 = arith.constant 0 : i32
    return %c0_i32, %arg0 : i32, i32
  }
}

module attributes {stable_mosaic.version = 11 : i64} {
  func.func @kernel(%arg0: i32, %arg1: memref<64x288xbf16, #tpu.memory_space<vmem>>, %arg2: memref<288x8xbf16, #tpu.memory_space<vmem>>, %arg3: memref<64x1xf32, #tpu.memory_space<vmem>>, %arg4: memref<64x1xf32, #tpu.memory_space<vmem>>, %arg5: memref<64x8xbf16, #tpu.memory_space<vmem>>) attributes {dimension_semantics = [#tpu.dimension_semantics<parallel>], iteration_bounds = array<i64: 1>, scalar_prefetch = 0 : i64, scratch_operands = 0 : i64, tpu.core_type = #tpu.core_type<tc>, window_params = [{pipeline_mode = #tpu.pipeline_mode<synchronous>, transform_indices = @transform_0, window_bounds = array<i64: 64, 288>}, {transform_indices = @transform_1, window_bounds = array<i64: 288, 8>}, {pipeline_mode = #tpu.pipeline_mode<synchronous>, transform_indices = @transform_2, window_bounds = array<i64: 64, 1>}, {pipeline_mode = #tpu.pipeline_mode<synchronous>, transform_indices = @transform_3, window_bounds = array<i64: 64, 1>}, {transform_indices = @transform_4, window_bounds = array<i64: 64, 8>}]} {
    %c0 = arith.constant 0 : index
    %c0_0 = arith.constant 0 : index
    %0 = vector.load %arg1[%c0, %c0_0] : memref<64x288xbf16, #tpu.memory_space<vmem>>, vector<64x288xbf16>
    %c0_1 = arith.constant 0 : index
    %c0_2 = arith.constant 0 : index
    %1 = vector.load %arg2[%c0_1, %c0_2] : memref<288x8xbf16, #tpu.memory_space<vmem>>, vector<288x8xbf16>
    %cst = arith.constant dense<0.000000e+00> : vector<64x8xf32>
    %2 = tpu.matmul %0, %1, %cst {dimension_numbers = #tpu.dot_dimension_numbers<[1], [0], [0], [1], [0, 0, 1, 1], [], []>} : vector<64x288xbf16>, vector<288x8xbf16>, vector<64x8xf32> -> vector<64x8xf32>
    %c0_3 = arith.constant 0 : index
    %c0_4 = arith.constant 0 : index
    %3 = vector.load %arg3[%c0_3, %c0_4] : memref<64x1xf32, #tpu.memory_space<vmem>>, vector<64x1xf32>
    %4 = vector.broadcast %3 : vector<64x1xf32> to vector<64x8xf32>
    %5 = arith.mulf %2, %4 : vector<64x8xf32>
    %c0_5 = arith.constant 0 : index
    %c0_6 = arith.constant 0 : index
    %6 = vector.load %arg4[%c0_5, %c0_6] : memref<64x1xf32, #tpu.memory_space<vmem>>, vector<64x1xf32>
    %7 = vector.broadcast %6 : vector<64x1xf32> to vector<64x8xf32>
    %8 = arith.addf %5, %7 : vector<64x8xf32>
    %cst_7 = arith.constant 0.000000e+00 : f32
    %9 = vector.broadcast %cst_7 : f32 to vector<64x8xf32>
    %10 = arith.maximumf %8, %9 : vector<64x8xf32>
    %11 = arith.truncf %10 : vector<64x8xf32> to vector<64x8xbf16>
    %c0_8 = arith.constant 0 : index
    %c0_9 = arith.constant 0 : index
    %12 = vector.load %arg5[%c0_8, %c0_9] : memref<64x8xbf16, #tpu.memory_space<vmem>>, vector<64x8xbf16>
    tpu.vector_store %arg5[%c0_8, %c0_9], %11 {strides = array<i32>} : memref<64x8xbf16, #tpu.memory_space<vmem>>, vector<64x8xbf16>,
    return
  }
  func.func @transform_0(%arg0: i32) -> (i32, i32) {
    %c0_i32 = arith.constant 0 : i32
    %c0_i32_0 = arith.constant 0 : i32
    %c0_i32_1 = arith.constant 0 : i32
    return %c0_i32, %c0_i32_0 : i32, i32
  }
  func.func @transform_1(%arg0: i32) -> (i32, i32) {
    %c0_i32 = arith.constant 0 : i32
    %c0_i32_0 = arith.constant 0 : i32
    return %c0_i32, %arg0 : i32, i32
  }
  func.func @transform_2(%arg0: i32) -> (i32, i32) {
    %c0_i32 = arith.constant 0 : i32
    %c0_i32_0 = arith.constant 0 : i32
    %c0_i32_1 = arith.constant 0 : i32
    return %c0_i32, %c0_i32_0 : i32, i32
  }
  func.func @transform_3(%arg0: i32) -> (i32, i32) {
    %c0_i32 = arith.constant 0 : i32
    %c0_i32_0 = arith.constant 0 : i32
    %c0_i32_1 = arith.constant 0 : i32
    return %c0_i32, %c0_i32_0 : i32, i32
  }
  func.func @transform_4(%arg0: i32) -> (i32, i32) {
    %c0_i32 = arith.constant 0 : i32
    %c0_i32_0 = arith.constant 0 : i32
    return %c0_i32, %arg0 : i32, i32
  }
}

module attributes {stable_mosaic.version = 11 : i64} {
  func.func @kernel(%arg0: i32, %arg1: memref<64x32xbf16, #tpu.memory_space<vmem>>, %arg2: memref<32x8xbf16, #tpu.memory_space<vmem>>, %arg3: memref<64x8xf32, #tpu.memory_space<vmem>>) attributes {dimension_semantics = [#tpu.dimension_semantics<parallel>], iteration_bounds = array<i64: 1>, scalar_prefetch = 0 : i64, scratch_operands = 0 : i64, tpu.core_type = #tpu.core_type<tc>, window_params = [{pipeline_mode = #tpu.pipeline_mode<synchronous>, transform_indices = @transform_0, window_bounds = array<i64: 64, 32>}, {transform_indices = @transform_1, window_bounds = array<i64: 32, 8>}, {transform_indices = @transform_2, window_bounds = array<i64: 64, 8>}]} {
    %c0 = arith.constant 0 : index
    %c0_0 = arith.constant 0 : index
    %0 = vector.load %arg1[%c0, %c0_0] : memref<64x32xbf16, #tpu.memory_space<vmem>>, vector<64x32xbf16>
    %c0_1 = arith.constant 0 : index
    %c0_2 = arith.constant 0 : index
    %1 = vector.load %arg2[%c0_1, %c0_2] : memref<32x8xbf16, #tpu.memory_space<vmem>>, vector<32x8xbf16>
    %cst = arith.constant dense<0.000000e+00> : vector<64x8xf32>
    %2 = tpu.matmul %0, %1, %cst {dimension_numbers = #tpu.dot_dimension_numbers<[1], [0], [0], [1], [0, 0, 1, 1], [], []>} : vector<64x32xbf16>, vector<32x8xbf16>, vector<64x8xf32> -> vector<64x8xf32>
    %c0_3 = arith.constant 0 : index
    %c0_4 = arith.constant 0 : index
    %3 = vector.load %arg3[%c0_3, %c0_4] : memref<64x8xf32, #tpu.memory_space<vmem>>, vector<64x8xf32>
    tpu.vector_store %arg3[%c0_3, %c0_4], %2 {strides = array<i32>} : memref<64x8xf32, #tpu.memory_space<vmem>>, vector<64x8xf32>,
    return
  }
  func.func @transform_0(%arg0: i32) -> (i32, i32) {
    %c0_i32 = arith.constant 0 : i32
    %c0_i32_0 = arith.constant 0 : i32
    %c0_i32_1 = arith.constant 0 : i32
    return %c0_i32, %c0_i32_0 : i32, i32
  }
  func.func @transform_1(%arg0: i32) -> (i32, i32) {
    %c0_i32 = arith.constant 0 : i32
    %c0_i32_0 = arith.constant 0 : i32
    return %c0_i32, %arg0 : i32, i32
  }
  func.func @transform_2(%arg0: i32) -> (i32, i32) {
    %c0_i32 = arith.constant 0 : i32
    %c0_i32_0 = arith.constant 0 : i32
    return %c0_i32, %arg0 : i32, i32
  }
}

module attributes {stable_mosaic.version = 11 : i64} {
  func.func @kernel(%arg0: i32, %arg1: memref<64x576xbf16, #tpu.memory_space<vmem>>, %arg2: memref<576x8xbf16, #tpu.memory_space<vmem>>, %arg3: memref<64x8xf32, #tpu.memory_space<vmem>>, %arg4: memref<64x8xf32, #tpu.memory_space<vmem>>) attributes {dimension_semantics = [#tpu.dimension_semantics<parallel>], iteration_bounds = array<i64: 1>, scalar_prefetch = 0 : i64, scratch_operands = 0 : i64, tpu.core_type = #tpu.core_type<tc>, window_params = [{pipeline_mode = #tpu.pipeline_mode<synchronous>, transform_indices = @transform_0, window_bounds = array<i64: 64, 576>}, {transform_indices = @transform_1, window_bounds = array<i64: 576, 8>}, {transform_indices = @transform_2, window_bounds = array<i64: 64, 8>}, {transform_indices = @transform_3, window_bounds = array<i64: 64, 8>}]} {
    %c0 = arith.constant 0 : index
    %c0_0 = arith.constant 0 : index
    %0 = vector.load %arg1[%c0, %c0_0] : memref<64x576xbf16, #tpu.memory_space<vmem>>, vector<64x576xbf16>
    %c0_1 = arith.constant 0 : index
    %c0_2 = arith.constant 0 : index
    %1 = vector.load %arg2[%c0_1, %c0_2] : memref<576x8xbf16, #tpu.memory_space<vmem>>, vector<576x8xbf16>
    %cst = arith.constant dense<0.000000e+00> : vector<64x8xf32>
    %2 = tpu.matmul %0, %1, %cst {dimension_numbers = #tpu.dot_dimension_numbers<[1], [0], [0], [1], [0, 0, 1, 1], [], []>} : vector<64x576xbf16>, vector<576x8xbf16>, vector<64x8xf32> -> vector<64x8xf32>
    %c0_3 = arith.constant 0 : index
    %c0_4 = arith.constant 0 : index
    %3 = vector.load %arg3[%c0_3, %c0_4] : memref<64x8xf32, #tpu.memory_space<vmem>>, vector<64x8xf32>
    %4 = arith.addf %2, %3 : vector<64x8xf32>
    %c0_5 = arith.constant 0 : index
    %c0_6 = arith.constant 0 : index
    %5 = vector.load %arg4[%c0_5, %c0_6] : memref<64x8xf32, #tpu.memory_space<vmem>>, vector<64x8xf32>
    tpu.vector_store %arg4[%c0_5, %c0_6], %4 {strides = array<i32>} : memref<64x8xf32, #tpu.memory_space<vmem>>, vector<64x8xf32>,
    return
  }
  func.func @transform_0(%arg0: i32) -> (i32, i32) {
    %c0_i32 = arith.constant 0 : i32
    %c0_i32_0 = arith.constant 0 : i32
    %c0_i32_1 = arith.constant 0 : i32
    return %c0_i32, %c0_i32_0 : i32, i32
  }
  func.func @transform_1(%arg0: i32) -> (i32, i32) {
    %c0_i32 = arith.constant 0 : i32
    %c0_i32_0 = arith.constant 0 : i32
    return %c0_i32, %arg0 : i32, i32
  }
  func.func @transform_2(%arg0: i32) -> (i32, i32) {
    %c0_i32 = arith.constant 0 : i32
    %c0_i32_0 = arith.constant 0 : i32
    return %c0_i32, %arg0 : i32, i32
  }
  func.func @transform_3(%arg0: i32) -> (i32, i32) {
    %c0_i32 = arith.constant 0 : i32
    %c0_i32_0 = arith.constant 0 : i32
    return %c0_i32, %arg0 : i32, i32
  }
}

module attributes {stable_mosaic.version = 11 : i64} {
  func.func @_bn_relu_kernel(%arg0: i32, %arg1: memref<64x8xf32, #tpu.memory_space<vmem>>, %arg2: memref<64x1xf32, #tpu.memory_space<vmem>>, %arg3: memref<64x1xf32, #tpu.memory_space<vmem>>, %arg4: memref<64x8xbf16, #tpu.memory_space<vmem>>) attributes {dimension_semantics = [#tpu.dimension_semantics<parallel>], iteration_bounds = array<i64: 1>, scalar_prefetch = 0 : i64, scratch_operands = 0 : i64, tpu.core_type = #tpu.core_type<tc>, window_params = [{transform_indices = @transform_0, window_bounds = array<i64: 64, 8>}, {pipeline_mode = #tpu.pipeline_mode<synchronous>, transform_indices = @transform_1, window_bounds = array<i64: 64, 1>}, {pipeline_mode = #tpu.pipeline_mode<synchronous>, transform_indices = @transform_2, window_bounds = array<i64: 64, 1>}, {transform_indices = @transform_3, window_bounds = array<i64: 64, 8>}]} {
    %c0 = arith.constant 0 : index
    %c0_0 = arith.constant 0 : index
    %0 = vector.load %arg1[%c0, %c0_0] : memref<64x8xf32, #tpu.memory_space<vmem>>, vector<64x8xf32>
    %c0_1 = arith.constant 0 : index
    %c0_2 = arith.constant 0 : index
    %1 = vector.load %arg2[%c0_1, %c0_2] : memref<64x1xf32, #tpu.memory_space<vmem>>, vector<64x1xf32>
    %2 = vector.broadcast %1 : vector<64x1xf32> to vector<64x8xf32>
    %3 = arith.mulf %0, %2 : vector<64x8xf32>
    %c0_3 = arith.constant 0 : index
    %c0_4 = arith.constant 0 : index
    %4 = vector.load %arg3[%c0_3, %c0_4] : memref<64x1xf32, #tpu.memory_space<vmem>>, vector<64x1xf32>
    %5 = vector.broadcast %4 : vector<64x1xf32> to vector<64x8xf32>
    %6 = arith.addf %3, %5 : vector<64x8xf32>
    %cst = arith.constant 0.000000e+00 : f32
    %7 = vector.broadcast %cst : f32 to vector<64x8xf32>
    %8 = arith.maximumf %6, %7 : vector<64x8xf32>
    %9 = arith.truncf %8 : vector<64x8xf32> to vector<64x8xbf16>
    %c0_5 = arith.constant 0 : index
    %c0_6 = arith.constant 0 : index
    %10 = vector.load %arg4[%c0_5, %c0_6] : memref<64x8xbf16, #tpu.memory_space<vmem>>, vector<64x8xbf16>
    tpu.vector_store %arg4[%c0_5, %c0_6], %9 {strides = array<i32>} : memref<64x8xbf16, #tpu.memory_space<vmem>>, vector<64x8xbf16>,
    return
  }
  func.func @transform_0(%arg0: i32) -> (i32, i32) {
    %c0_i32 = arith.constant 0 : i32
    %c0_i32_0 = arith.constant 0 : i32
    return %c0_i32, %arg0 : i32, i32
  }
  func.func @transform_1(%arg0: i32) -> (i32, i32) {
    %c0_i32 = arith.constant 0 : i32
    %c0_i32_0 = arith.constant 0 : i32
    %c0_i32_1 = arith.constant 0 : i32
    return %c0_i32, %c0_i32_0 : i32, i32
  }
  func.func @transform_2(%arg0: i32) -> (i32, i32) {
    %c0_i32 = arith.constant 0 : i32
    %c0_i32_0 = arith.constant 0 : i32
    %c0_i32_1 = arith.constant 0 : i32
    return %c0_i32, %c0_i32_0 : i32, i32
  }
  func.func @transform_3(%arg0: i32) -> (i32, i32) {
    %c0_i32 = arith.constant 0 : i32
    %c0_i32_0 = arith.constant 0 : i32
    return %c0_i32, %arg0 : i32, i32
  }
}

module attributes {stable_mosaic.version = 11 : i64} {
  func.func @kernel(%arg0: i32, %arg1: memref<64x576xbf16, #tpu.memory_space<vmem>>, %arg2: memref<576x8xbf16, #tpu.memory_space<vmem>>, %arg3: memref<64x1xf32, #tpu.memory_space<vmem>>, %arg4: memref<64x1xf32, #tpu.memory_space<vmem>>, %arg5: memref<64x8xbf16, #tpu.memory_space<vmem>>) attributes {dimension_semantics = [#tpu.dimension_semantics<parallel>], iteration_bounds = array<i64: 1>, scalar_prefetch = 0 : i64, scratch_operands = 0 : i64, tpu.core_type = #tpu.core_type<tc>, window_params = [{pipeline_mode = #tpu.pipeline_mode<synchronous>, transform_indices = @transform_0, window_bounds = array<i64: 64, 576>}, {transform_indices = @transform_1, window_bounds = array<i64: 576, 8>}, {pipeline_mode = #tpu.pipeline_mode<synchronous>, transform_indices = @transform_2, window_bounds = array<i64: 64, 1>}, {pipeline_mode = #tpu.pipeline_mode<synchronous>, transform_indices = @transform_3, window_bounds = array<i64: 64, 1>}, {transform_indices = @transform_4, window_bounds = array<i64: 64, 8>}]} {
    %c0 = arith.constant 0 : index
    %c0_0 = arith.constant 0 : index
    %0 = vector.load %arg1[%c0, %c0_0] : memref<64x576xbf16, #tpu.memory_space<vmem>>, vector<64x576xbf16>
    %c0_1 = arith.constant 0 : index
    %c0_2 = arith.constant 0 : index
    %1 = vector.load %arg2[%c0_1, %c0_2] : memref<576x8xbf16, #tpu.memory_space<vmem>>, vector<576x8xbf16>
    %cst = arith.constant dense<0.000000e+00> : vector<64x8xf32>
    %2 = tpu.matmul %0, %1, %cst {dimension_numbers = #tpu.dot_dimension_numbers<[1], [0], [0], [1], [0, 0, 1, 1], [], []>} : vector<64x576xbf16>, vector<576x8xbf16>, vector<64x8xf32> -> vector<64x8xf32>
    %c0_3 = arith.constant 0 : index
    %c0_4 = arith.constant 0 : index
    %3 = vector.load %arg3[%c0_3, %c0_4] : memref<64x1xf32, #tpu.memory_space<vmem>>, vector<64x1xf32>
    %4 = vector.broadcast %3 : vector<64x1xf32> to vector<64x8xf32>
    %5 = arith.mulf %2, %4 : vector<64x8xf32>
    %c0_5 = arith.constant 0 : index
    %c0_6 = arith.constant 0 : index
    %6 = vector.load %arg4[%c0_5, %c0_6] : memref<64x1xf32, #tpu.memory_space<vmem>>, vector<64x1xf32>
    %7 = vector.broadcast %6 : vector<64x1xf32> to vector<64x8xf32>
    %8 = arith.addf %5, %7 : vector<64x8xf32>
    %cst_7 = arith.constant 0.000000e+00 : f32
    %9 = vector.broadcast %cst_7 : f32 to vector<64x8xf32>
    %10 = arith.maximumf %8, %9 : vector<64x8xf32>
    %11 = arith.truncf %10 : vector<64x8xf32> to vector<64x8xbf16>
    %c0_8 = arith.constant 0 : index
    %c0_9 = arith.constant 0 : index
    %12 = vector.load %arg5[%c0_8, %c0_9] : memref<64x8xbf16, #tpu.memory_space<vmem>>, vector<64x8xbf16>
    tpu.vector_store %arg5[%c0_8, %c0_9], %11 {strides = array<i32>} : memref<64x8xbf16, #tpu.memory_space<vmem>>, vector<64x8xbf16>,
    return
  }
  func.func @transform_0(%arg0: i32) -> (i32, i32) {
    %c0_i32 = arith.constant 0 : i32
    %c0_i32_0 = arith.constant 0 : i32
    %c0_i32_1 = arith.constant 0 : i32
    return %c0_i32, %c0_i32_0 : i32, i32
  }
  func.func @transform_1(%arg0: i32) -> (i32, i32) {
    %c0_i32 = arith.constant 0 : i32
    %c0_i32_0 = arith.constant 0 : i32
    return %c0_i32, %arg0 : i32, i32
  }
  func.func @transform_2(%arg0: i32) -> (i32, i32) {
    %c0_i32 = arith.constant 0 : i32
    %c0_i32_0 = arith.constant 0 : i32
    %c0_i32_1 = arith.constant 0 : i32
    return %c0_i32, %c0_i32_0 : i32, i32
  }
  func.func @transform_3(%arg0: i32) -> (i32, i32) {
    %c0_i32 = arith.constant 0 : i32
    %c0_i32_0 = arith.constant 0 : i32
    %c0_i32_1 = arith.constant 0 : i32
    return %c0_i32, %c0_i32_0 : i32, i32
  }
  func.func @transform_4(%arg0: i32) -> (i32, i32) {
    %c0_i32 = arith.constant 0 : i32
    %c0_i32_0 = arith.constant 0 : i32
    return %c0_i32, %arg0 : i32, i32
  }
}

module attributes {stable_mosaic.version = 11 : i64} {
  func.func @kernel(%arg0: i32, %arg1: memref<64x576xbf16, #tpu.memory_space<vmem>>, %arg2: memref<576x8xbf16, #tpu.memory_space<vmem>>, %arg3: memref<64x8xf32, #tpu.memory_space<vmem>>, %arg4: memref<8x2xf32, #tpu.memory_space<vmem>>, %arg5: memref<64x2xf32, #tpu.memory_space<vmem>>) attributes {dimension_semantics = [#tpu.dimension_semantics<parallel>], iteration_bounds = array<i64: 1>, scalar_prefetch = 0 : i64, scratch_operands = 0 : i64, tpu.core_type = #tpu.core_type<tc>, window_params = [{pipeline_mode = #tpu.pipeline_mode<synchronous>, transform_indices = @transform_0, window_bounds = array<i64: 64, 576>}, {transform_indices = @transform_1, window_bounds = array<i64: 576, 8>}, {transform_indices = @transform_2, window_bounds = array<i64: 64, 8>}, {pipeline_mode = #tpu.pipeline_mode<synchronous>, transform_indices = @transform_3, window_bounds = array<i64: 8, 2>}, {pipeline_mode = #tpu.pipeline_mode<synchronous>, transform_indices = @transform_4, window_bounds = array<i64: 64, 2>}]} {
    %c0 = arith.constant 0 : index
    %c0_0 = arith.constant 0 : index
    %0 = vector.load %arg1[%c0, %c0_0] : memref<64x576xbf16, #tpu.memory_space<vmem>>, vector<64x576xbf16>
    %c0_1 = arith.constant 0 : index
    %c0_2 = arith.constant 0 : index
    %1 = vector.load %arg2[%c0_1, %c0_2] : memref<576x8xbf16, #tpu.memory_space<vmem>>, vector<576x8xbf16>
    %cst = arith.constant dense<0.000000e+00> : vector<64x8xf32>
    %2 = tpu.matmul %0, %1, %cst {dimension_numbers = #tpu.dot_dimension_numbers<[1], [0], [0], [1], [0, 0, 1, 1], [], []>} : vector<64x576xbf16>, vector<576x8xbf16>, vector<64x8xf32> -> vector<64x8xf32>
    %c0_3 = arith.constant 0 : index
    %c0_4 = arith.constant 0 : index
    %3 = vector.load %arg3[%c0_3, %c0_4] : memref<64x8xf32, #tpu.memory_space<vmem>>, vector<64x8xf32>
    %4 = arith.addf %2, %3 : vector<64x8xf32>
    %cst_5 = arith.constant 0.000000e+00 : f32
    %5 = vector.broadcast %cst_5 : f32 to vector<64x8xf32>
    %6 = arith.maximumf %4, %5 : vector<64x8xf32>
    %c0_6 = arith.constant 0 : index
    %c0_7 = arith.constant 0 : index
    %7 = vector.load %arg4[%c0_6, %c0_7] : memref<8x2xf32, #tpu.memory_space<vmem>>, vector<8x2xf32>
    %cst_8 = arith.constant dense<0.000000e+00> : vector<64x2xf32>
    %8 = tpu.matmul %6, %7, %cst_8 {dimension_numbers = #tpu.dot_dimension_numbers<[1], [0], [0], [1], [0, 0, 1, 1], [], []>} : vector<64x8xf32>, vector<8x2xf32>, vector<64x2xf32> -> vector<64x2xf32>
    %c0_9 = arith.constant 0 : index
    %c0_10 = arith.constant 0 : index
    %9 = vector.load %arg5[%c0_9, %c0_10] : memref<64x2xf32, #tpu.memory_space<vmem>>, vector<64x2xf32>
    tpu.vector_store %arg5[%c0_9, %c0_10], %8 {strides = array<i32>} : memref<64x2xf32, #tpu.memory_space<vmem>>, vector<64x2xf32>,
    return
  }
  func.func @transform_0(%arg0: i32) -> (i32, i32) {
    %c0_i32 = arith.constant 0 : i32
    %c0_i32_0 = arith.constant 0 : i32
    %c0_i32_1 = arith.constant 0 : i32
    return %c0_i32, %c0_i32_0 : i32, i32
  }
  func.func @transform_1(%arg0: i32) -> (i32, i32) {
    %c0_i32 = arith.constant 0 : i32
    %c0_i32_0 = arith.constant 0 : i32
    return %c0_i32, %arg0 : i32, i32
  }
  func.func @transform_2(%arg0: i32) -> (i32, i32) {
    %c0_i32 = arith.constant 0 : i32
    %c0_i32_0 = arith.constant 0 : i32
    return %c0_i32, %arg0 : i32, i32
  }
  func.func @transform_3(%arg0: i32) -> (i32, i32) {
    %c0_i32 = arith.constant 0 : i32
    %c0_i32_0 = arith.constant 0 : i32
    %c0_i32_1 = arith.constant 0 : i32
    return %c0_i32, %c0_i32_0 : i32, i32
  }
  func.func @transform_4(%arg0: i32) -> (i32, i32) {
    %c0_i32 = arith.constant 0 : i32
    %c0_i32_0 = arith.constant 0 : i32
    %c0_i32_1 = arith.constant 0 : i32
    return %c0_i32, %c0_i32_0 : i32, i32
  }
}

</mosaic_0001>

<bundles_post_ra>
// kernel: _lambda_.29
= control target key start
LH: loop header
LB: loop body
LE: loop exit
PB: predicated region body
PF: predicated region fallthrough
CT: control target
= control target key end

     0   :  { %s311_s12 = smov 0   ;;  %s334_s0 = inlined_call_operand.vmem [shape: f32[8,512], index: 0, kind: input, shape index: {}]   ;;  %s335_s1 = inlined_call_operand.vmem [shape: f32[8,1], index: 1, kind: input, shape index: {}]   ;;  %s336_s2 = inlined_call_operand.vmem [shape: f32[8,1], index: 2, kind: input, shape index: {}]   ;;  %s337_s3 = inlined_call_operand.vmem [shape: bf16[8,512], index: 3, kind: output, shape index: {}]  }
   0x1 LB: > { %s259_s13 = sadd.s32 4294967295, %s288_s12   ;;  %p263_p0 = scmp.ge.s32.totalorder %s288_s12, 1  ;;  %s288_s12 = sphi %s311_s12, %s13_s12  }
   0x2   : > { %p138_p1 = scmp.lt.s32.totalorder %s288_s12, 3 }
   0x4   : > { %p139_p2 = pnand %p263_p0, %p138_p1 }
   0x5   : > { %v176_v0 = vld [vmem:[%s335_s1] sm:$0xff] (!%p139_p2)  ;;  %v290_v1 = vmov (!%p139_p2), 0   ;;  %s264_s18 = sshll.u32 (!%p139_p2), %s259_s13, 1 }
   0x6   : > { %142 = sbr.rel (%p139_p2) target bundleno = 146 (0x92), region = 32  ;;  %281 = vset.pattern.permute.xlu0 (!%p139_p2), %v290_v1  ;;  %v184_v2 = vld [vmem:[%s336_s2] sm:$0xff] (!%p139_p2)  ;;  %p163_p3 = scmp.lt.s32.totalorder (!%p139_p2), %s264_s18, 3 }
   0x7   : > { %179 = vperm.xlu0 (!%p139_p2), %281, %v176_v0  }
   0xb   : > { %187 = vperm.xlu0 (!%p139_p2), %281, %v184_v2  }
   0xd   : > { %s339_s18 = smov (!%p163_p3, %s264_s18), 3 }
   0xe   : > { %s265_s19 = sshll.u32 %s339_s18, 3  ;;  %s267_s23 = sshll.u32 %s339_s18, 2 }
   0xf   : > { %s166_s22 = scalar_lea.vmem %s334_s0, %s265_s19  ;;  %s172_s26 = scalar_lea.vmem %s337_s3, %s267_s23 }
  0x10   : > { %v174_v4 = vld [vmem:[%s166_s22] sm:$0xff]  ;;  %v175_v5 = vld [vmem:[%s166_s22 + $0x8] sm:$0xff] }
  0x86   : > { %v180_v3 = vpop.permute.xlu0 %179 }
  0x87   : > { %v182_v6 = vmul.f32 %v180_v3, %v174_v4  ;;  %v183_v7 = vmul.f32 %v180_v3, %v175_v5 }
  0x8a   : > { %v188_v8 = vpop.permute.xlu0 %187 }
  0x8b   : > { %v190_v9 = vadd.f32 %v188_v8, %v182_v6  ;;  %v191_v10 = vadd.f32 %v188_v8, %v183_v7 }
  0x8d   : > { %v192_v11 = vmax.f32 %v190_v9, 0.0  ;;  %v193_v12 = vmax.f32 %v191_v10, 0.0 }
  0x8f   : > { %v271_v13 = vpack.c.bf16 %v193_v12, %v192_v11 }
  0x91   : > { %202 = vst [vmem:[%s172_s26] sm:$0xff] %v271_v13 }
  0x92 PF: > { %s13_s12 = sadd.s32 1, %s288_s12  }
  0x93   : > { %p10_p4 = scmp.ge.s32.totalorder %s13_s12, 4  }
  0x95   :  { %12 = sbr.rel (!%p10_p4) target bundleno = 1 (0x1), region = 62 }

// kernel: _lambda_.28
= control target key start
LH: loop header
LB: loop body
LE: loop exit
PB: predicated region body
PF: predicated region fallthrough
CT: control target
= control target key end

     0   :  { %s428_s9 = smov 0   ;;  %s430_s10 = smov 0   ;;  %s483_s0 = inlined_call_operand.vmem [shape: bf16[8,27], index: 0, kind: input, shape index: {}]   ;;  %s484_s1 = inlined_call_operand.vmem [shape: bf16[27,512], index: 1, kind: input, shape index: {}]   ;;  %s485_s2 = inlined_call_operand.vmem [shape: f32[8,512], index: 2, kind: output, shape index: {}]  }
   0x1   :  { %s432_s11 = smov 0  }
   0x2 LB: > { %s336_s12 = sadd.s32 4294967295, %s409_s11   ;;  %s445_s13 = sadd.s32 1, %s409_s11   ;;  %s409_s11 = sphi %s432_s11, %s488_s11   ;;  %s405_s10 = sphi %s430_s10, %s487_s10   ;;  %s401_s9 = sphi %s428_s9, %s486_s9  }
   0x3   : > { %s37_s14 = ssub.s32 %s409_s11, %s445_s13  ;;  %s40_s15 = sadd.s32 1, %s405_s10 }
   0x4   : > { %p38_p0 = scmp.eq.s32.totalorder %s37_s14, 0  ;;  %p47_p1 = scmp.ne.s32.totalorder %s405_s10, %s401_s9 }
   0x5   : > { %p48_p2 = scmp.eq.s32.totalorder %s409_s11, 0  ;;  %p339_p4 = scmp.ge.s32.totalorder %s409_s11, 2 }
   0x6   : > { %s454_s16 = scalar_select %p38_p0, %s405_s10, %s40_s15  }
   0x7   : > { %p49_p3 = por %p48_p2, %p47_p1  ;;  %102 = sbr.rel (%p339_p4) target bundleno = 21 (0x15), region = 20 }
   0xe   : > { %105 = sbr.rel (!%p49_p3) target bundleno = 21 (0x15), region = 24  ;;  %s107_s17 = sand.u32 (%p49_p3), 1, %s405_s10  }
   0xf   : > { %s354_s18 = sshll.u32 (%p49_p3), %s409_s11, 3  ;;  %s340_s19 = sshll.u32 (%p49_p3), %s107_s17, 5 }
  0x10   : > { %s112_s22 = scalar_lea.vmem (%p49_p3), %s484_s1, %s354_s18  ;;  %s109_s23 = scalar_lea.vmem (%p49_p3), [#allocation2], %s340_s19 }
  0x11   : > { %v146_v0 = vld [vmem:[%s112_s22] sm:$0xff] (%p49_p3)  ;;  %v148_v1 = vld [vmem:[%s112_s22 + $0x10] sm:$0xff] (%p49_p3) }
  0x12   : > { %v150_v2 = vld [vmem:[%s112_s22 + $0x20] sm:$0xff] (%p49_p3)  ;;  %147 = vst [vmem:[%s109_s23] sm:$0xff] (%p49_p3), %v146_v0  ;;  %149 = vst [vmem:[%s109_s23 + $0x8] sm:$0xff] (%p49_p3), %v148_v1  ;;  %v152_v3 = vld [vmem:[%s112_s22 + $0x30] sm:$0xff] (%p49_p3) }
  0x13   : > { %151 = vst [vmem:[%s109_s23 + $0x10] sm:$0xff] (%p49_p3), %v150_v2  ;;  %153 = vst [vmem:[%s109_s23 + $0x18] sm:$0xff] (%p49_p3), %v152_v3 }
  0x15 PF: > { %p343_p5 = scmp.ge.s32.totalorder %s409_s11, 1  ;;  %p158_p6 = scmp.lt.s32.totalorder %s409_s11, 3 }
  0x17   : > { %p159_p7 = pnand %p343_p5, %p158_p6 }
  0x18   : > { %s165_s24 = sand.u32 (!%p159_p7), 1, %s401_s9   ;;  %vm221_vm0 = vcmask (!%p159_p7), 1044480   ;;  %vm222_vm1 = vcmask (!%p159_p7), 1045504   ;;  %v411_v4 = vmov (!%p159_p7), 65535   ;;  %v412_v6 = vmov (!%p159_p7), 0   ;;  %s345_s29 = sshll.u32 (!%p159_p7), %s336_s12, 1 }
  0x19   : > { %162 = sbr.rel (%p159_p7) target bundleno = 251 (0xfb), region = 62  ;;  %s344_s25 = sshll.u32 (!%p159_p7), %s165_s24, 5  ;;  %v223_v5 = vsel (!%p159_p7), %vm221_vm0, 4294967295, %v411_v4  ;;  %263 = vmatprep.mubr.bf16.mxu0 (!%p159_p7), %v412_v6  ;;  %v194_v14 = vld [vmem:[%s483_s0] sm:$0xf] (!%p159_p7)  ;;  %vm217_vm2 = vcmask (!%p159_p7), 220160  }
  0x1a   : > { %s167_s26 = scalar_lea.vmem (!%p159_p7), [#allocation2], %s344_s25  ;;  %v224_v9 = vsel (!%p159_p7), %vm222_vm1, %v223_v5, 0  ;;  %p188_p8 = scmp.lt.s32.totalorder (!%p159_p7), %s345_s29, 3 }
  0x1b   : > { %v381_v7 = vld [vmem:[%s167_s26 + $0x4] ss:$8 sps:$4 sm:$0xff] (!%p159_p7)   ;;  %v383_v8 = vld [vmem:[%s167_s26] ss:$8 sps:$4 sm:$0xff] (!%p159_p7)  }
  0x1c   : > { %231 = vmatprep.subr.bf16.mxu0 (!%p159_p7), %v381_v7  ;;  %v384_v10 = vld [vmem:[%s167_s26 + $0x14] ss:$8 sps:$4 sm:$0x3f] (!%p159_p7)   ;;  %v386_v11 = vld [vmem:[%s167_s26 + $0x10] ss:$8 sps:$4 sm:$0x3f] (!%p159_p7)  }
  0x1d   : > { %232 = vmatpush1.bf16.msra.mxu0 (!%p159_p7), %v383_v8  ;;  %v229_v12 = vand.u32 (!%p159_p7), %v384_v10, %v224_v9  ;;  %v226_v13 = vand.u32 (!%p159_p7), %v386_v11, %v224_v9 }
  0x1f   : > { %233 = vmatprep.subr.bf16.mxu0 (!%p159_p7), %v229_v12 }
  0x20   : > { %s490_s29 = smov (!%p188_p8, %s345_s29), 3 }
  0x21   : > { %234 = vmatpush1.bf16.msra.mxu0 %v226_v13  ;;  %s346_s30 = sshll.u32 %s490_s29, 3 }
  0x22   : > { %s191_s5 = scalar_lea.vmem %s485_s2, %s346_s30 }
  0x24   : > { %351 = vmatmul.mubr.msk.bf16.vlgmr.msra.gmra.mrb[0].mxu0 %vm217_vm2, %v194_v14 }
  0xf7   : > { %v265_v15 = vpop.f32.mrb[0].mxu0 }
  0xf8   : > { %272 = vst [vmem:[%s191_s5] sm:$0xff] %v265_v15  ;;  %v267_v16 = vpop.f32.mrb[1].mxu0 }
  0xf9   : > { %273 = vst [vmem:[%s191_s5 + $0x8] sm:$0xff] %v267_v16  ;;  %v269_v17 = vpop.f32.mrb[2].mxu0 }
  0xfa   : > { %v270_v18 = vpop.f32.mrb[3].mxu0 }
  0xfb PF: > { %p9_p9 = scmp.ge.s32.totalorder %s445_s13, 4   ;;  %s486_s9 = smov %s405_s10 }
  0xfc   : > { %s487_s10 = smov %s454_s16  ;;  %s488_s11 = smov %s445_s13 }
  0xfd   :  { %11 = sbr.rel (!%p9_p9) target bundleno = 2 (0x2), region = 101 }

// kernel: _lambda_.30
= control target key start
LH: loop header
LB: loop body
LE: loop exit
PB: predicated region body
PF: predicated region fallthrough
CT: control target
= control target key end

     0   :  { %s582_s15 = smov 0   ;;  %s584_s16 = smov 0   ;;  %s643_s0 = inlined_call_operand.vmem [shape: bf16[8,72], index: 0, kind: input, shape index: {}]   ;;  %s644_s1 = inlined_call_operand.vmem [shape: bf16[72,512], index: 1, kind: input, shape index: {}]   ;;  %s645_s2 = inlined_call_operand.vmem [shape: f32[8,1], index: 2, kind: input, shape index: {}]   ;;  %s646_s3 = inlined_call_operand.vmem [shape: f32[8,1], index: 3, kind: input, shape index: {}]   ;;  %s647_s4 = inlined_call_operand.vmem [shape: bf16[8,512], index: 4, kind: output, shape index: {}]  }
   0x1   :  { %s586_s17 = smov 0  }
   0x2 LB: > { %s464_s18 = sadd.s32 4294967295, %s554_s17   ;;  %s599_s19 = sadd.s32 1, %s554_s17   ;;  %s554_s17 = sphi %s586_s17, %s650_s17   ;;  %s550_s16 = sphi %s584_s16, %s649_s16   ;;  %s546_s15 = sphi %s582_s15, %s648_s15  }
   0x3   : > { %s39_s20 = ssub.s32 %s554_s17, %s599_s19  ;;  %s42_s21 = sadd.s32 1, %s550_s16 }
   0x4   : > { %p40_p0 = scmp.eq.s32.totalorder %s39_s20, 0  ;;  %p49_p1 = scmp.ne.s32.totalorder %s550_s16, %s546_s15 }
   0x5   : > { %p50_p2 = scmp.eq.s32.totalorder %s554_s17, 0  ;;  %p467_p4 = scmp.ge.s32.totalorder %s554_s17, 2 }
   0x6   : > { %s608_s22 = scalar_select %p40_p0, %s550_s16, %s42_s21  }
   0x7   : > { %p51_p3 = por %p50_p2, %p49_p1  ;;  %152 = sbr.rel (%p467_p4) target bundleno = 23 (0x17), region = 28 }
   0xe   : > { %155 = sbr.rel (!%p51_p3) target bundleno = 23 (0x17), region = 32  ;;  %s157_s23 = sand.u32 (%p51_p3), 1, %s550_s16  }
   0xf   : > { %s488_s24 = sshll.u32 (%p51_p3), %s554_s17, 3  ;;  %s490_s25 = smul.u32 (%p51_p3), 72, %s157_s23 }
  0x10   : > { %s162_s28 = scalar_lea.vmem (%p51_p3), %s644_s1, %s488_s24 }
  0x11   : > { %v206_v0 = vld [vmem:[%s162_s28] sm:$0xff] (%p51_p3)  ;;  %v208_v1 = vld [vmem:[%s162_s28 + $0x10] sm:$0xff] (%p51_p3)  ;;  %s159_s29 = scalar_lea.vmem (%p51_p3), [#allocation2], %s490_s25 }
  0x12   : > { %v210_v2 = vld [vmem:[%s162_s28 + $0x20] sm:$0xff] (%p51_p3)  ;;  %v212_v3 = vld [vmem:[%s162_s28 + $0x30] sm:$0xff] (%p51_p3)  ;;  %207 = vst [vmem:[%s159_s29] sm:$0xff] (%p51_p3), %v206_v0  ;;  %209 = vst [vmem:[%s159_s29 + $0x8] sm:$0xff] (%p51_p3), %v208_v1 }
  0x13   : > { %v214_v4 = vld [vmem:[%s162_s28 + $0x40] sm:$0xff] (%p51_p3)  ;;  %v216_v5 = vld [vmem:[%s162_s28 + $0x50] sm:$0xff] (%p51_p3)  ;;  %211 = vst [vmem:[%s159_s29 + $0x10] sm:$0xff] (%p51_p3), %v210_v2  ;;  %213 = vst [vmem:[%s159_s29 + $0x18] sm:$0xff] (%p51_p3), %v212_v3 }
  0x14   : > { %215 = vst [vmem:[%s159_s29 + $0x20] sm:$0xff] (%p51_p3), %v214_v4  ;;  %217 = vst [vmem:[%s159_s29 + $0x28] sm:$0xff] (%p51_p3), %v216_v5  ;;  %v218_v6 = vld [vmem:[%s162_s28 + $0x60] sm:$0xff] (%p51_p3)  ;;  %v220_v7 = vld [vmem:[%s162_s28 + $0x70] sm:$0xff] (%p51_p3) }
  0x15   : > { %v222_v8 = vld [vmem:[%s162_s28 + $0x80] sm:$0xff]  ;;  %219 = vst [vmem:[%s159_s29 + $0x30] sm:$0xff] %v218_v6  ;;  %221 = vst [vmem:[%s159_s29 + $0x38] sm:$0xff] %v220_v7 }
  0x16   : > { %223 = vst [vmem:[%s159_s29 + $0x40] sm:$0xff] %v222_v8 }
  0x17 PF: > { %p470_p5 = scmp.ge.s32.totalorder %s554_s17, 1  ;;  %p228_p6 = scmp.lt.s32.totalorder %s554_s17, 3 }
  0x19   : > { %p229_p7 = pnand %p470_p5, %p228_p6 }
  0x1a   : > { %s235_s30 = sand.u32 (!%p229_p7), 1, %s546_s15   ;;  %v556_v9 = vmov (!%p229_p7), 0   ;;  %v375_v10 = vld [vmem:[%s645_s2] sm:$0xff] (!%p229_p7)  ;;  %vm327_vm0 = vcmask (!%p229_p7), 1043456   ;;  %vm323_vm1 = vcmask (!%p229_p7), 588800   ;;  %s471_s13 = sshll.u32 (!%p229_p7), %s464_s18, 1 }
  0x1b   : > { %232 = sbr.rel (%p229_p7) target bundleno = 274 (0x112), region = 70  ;;  %366 = vmatprep.mubr.bf16.mxu0 (!%p229_p7), %v556_v9  ;;  %517 = vset.pattern.permute.xlu0 (!%p229_p7), %v556_v9  ;;  %v383_v11 = vld [vmem:[%s646_s3] sm:$0xff] (!%p229_p7)  ;;  %p262_p8 = scmp.lt.s32.totalorder (!%p229_p7), %s471_s13, 3 }
  0x1c   : > { %s491_s5 = smul.u32 (!%p229_p7), 72, %s235_s30  ;;  %378 = vperm.xlu0 (!%p229_p7), %517, %v375_v10   ;;  %v268_v24 = vld [vmem:[%s643_s0] sm:$0xf] (!%p229_p7) }
  0x1e   : > { %s237_s10 = scalar_lea.vmem (!%p229_p7), [#allocation2], %s491_s5 }
  0x1f   : > { %v518_v12 = vld [vmem:[%s237_s10 + $0x4] ss:$8 sps:$4 sm:$0xff] (!%p229_p7)   ;;  %v520_v13 = vld [vmem:[%s237_s10] ss:$8 sps:$4 sm:$0xff] (!%p229_p7)   ;;  %v521_v14 = vld [vmem:[%s237_s10 + $0x14] ss:$8 sps:$4 sm:$0xff] (!%p229_p7)  }
  0x20   : > { %334 = vmatprep.subr.bf16.mxu0 (!%p229_p7), %v518_v12  ;;  %386 = vperm.xlu0 (!%p229_p7), %517, %v383_v11   ;;  %v523_v15 = vld [vmem:[%s237_s10 + $0x10] ss:$8 sps:$4 sm:$0xff] (!%p229_p7)   ;;  %v524_v16 = vld [vmem:[%s237_s10 + $0x24] ss:$8 sps:$4 sm:$0xff] (!%p229_p7)   ;;  %v526_v17 = vld [vmem:[%s237_s10 + $0x20] ss:$8 sps:$4 sm:$0xff] (!%p229_p7)  }
  0x21   : > { %335 = vmatpush1.bf16.msra.mxu0 (!%p229_p7), %v520_v13  ;;  %v527_v18 = vld [vmem:[%s237_s10 + $0x34] ss:$8 sps:$4 sm:$0xff] (!%p229_p7)   ;;  %v277_v19 = vld [vmem:[%s237_s10 + $0x40] sm:$0xff] (!%p229_p7)  ;;  %v529_v20 = vld [vmem:[%s237_s10 + $0x30] ss:$8 sps:$4 sm:$0xff] (!%p229_p7)  }
  0x22   : > { %336 = vmatprep.subr.bf16.mxu0 %v521_v14  ;;  %v482_v21 = vcombine.high %v277_v19, %v277_v19  ;;  %v481_v22 = vcombine.low %v277_v19, %v277_v19  ;;  %s652_s13 = smov (!%p262_p8, %s471_s13), 3 }
  0x23   : > { %s472_s14 = sshll.u32 %s652_s13, 2 }
  0x24   : > { %v329_v23 = vsel %vm327_vm0, %v481_v22, 0  ;;  %s265_s17 = scalar_lea.vmem %s647_s4, %s472_s14 }
  0x25   : > { %337 = vmatpush1.bf16.msra.mxu0 %v523_v15 }
  0x26   : > { %338 = vmatprep.subr.bf16.mxu0 %v524_v16 }
  0x29   : > { %339 = vmatpush1.bf16.msra.mxu0 %v526_v17 }
  0x2a   : > { %340 = vmatprep.subr.bf16.mxu0 %v527_v18 }
  0x2d   : > { %341 = vmatpush1.bf16.msra.mxu0 %v529_v20 }
  0x2e   : > { %483 = vmatprep.subr.msk.bf16.mxu0 %vm327_vm0, %v482_v21 }
  0x31   : > { %343 = vmatpush1.bf16.msra.mxu0 %v329_v23 }
  0x34   : > { %484 = vmatmul.mubr.msk.bf16.vlgmr.msra.gmra.mrb[0].mxu0 %vm323_vm1, %v268_v24 }
  0x9b   : > { %v379_v25 = vpop.permute.xlu0 %378 }
  0x9f   : > { %v387_v29 = vpop.permute.xlu0 %386 }
 0x107   : > { %v368_v26 = vpop.f32.mrb[0].mxu0 }
 0x108   : > { %v381_v27 = vmul.f32 %v379_v25, %v368_v26  ;;  %v370_v28 = vpop.f32.mrb[1].mxu0 }
 0x109   : > { %v382_v30 = vmul.f32 %v379_v25, %v370_v28  ;;  %v372_v31 = vpop.f32.mrb[2].mxu0 }
 0x10a   : > { %v389_v32 = vadd.f32 %v387_v29, %v381_v27  ;;  %v373_v33 = vpop.f32.mrb[3].mxu0 }
 0x10b   : > { %v390_v34 = vadd.f32 %v387_v29, %v382_v30 }
 0x10c   : > { %v391_v35 = vmax.f32 %v389_v32, 0.0 }
 0x10d   : > { %v392_v36 = vmax.f32 %v390_v34, 0.0 }
 0x10f   : > { %v489_v37 = vpack.c.bf16 %v392_v36, %v391_v35 }
 0x111   : > { %401 = vst [vmem:[%s265_s17] sm:$0xff] %v489_v37 }
 0x112 PF: > { %p11_p9 = scmp.ge.s32.totalorder %s599_s19, 4   ;;  %s648_s15 = smov %s550_s16 }
 0x113   : > { %s649_s16 = smov %s608_s22  ;;  %s650_s17 = smov %s599_s19 }
 0x114   :  { %13 = sbr.rel (!%p11_p9) target bundleno = 2 (0x2), region = 109 }

// kernel: _lambda_.31
= control target key start
LH: loop header
LB: loop body
LE: loop exit
PB: predicated region body
PF: predicated region fallthrough
CT: control target
= control target key end

     0   :  { %s560_s12 = smov 0   ;;  %s562_s13 = smov 0   ;;  %s618_s0 = inlined_call_operand.vmem [shape: bf16[8,72], index: 0, kind: input, shape index: {}]   ;;  %s619_s1 = inlined_call_operand.vmem [shape: bf16[72,512], index: 1, kind: input, shape index: {}]   ;;  %s620_s2 = inlined_call_operand.vmem [shape: f32[8,512], index: 2, kind: input, shape index: {}]   ;;  %s621_s3 = inlined_call_operand.vmem [shape: f32[8,512], index: 3, kind: output, shape index: {}]  }
   0x1   :  { %s564_s14 = smov 0  }
   0x2 LB: > { %s448_s15 = sadd.s32 4294967295, %s537_s14   ;;  %s577_s16 = sadd.s32 1, %s537_s14   ;;  %s537_s14 = sphi %s564_s14, %s624_s14   ;;  %s533_s13 = sphi %s562_s13, %s623_s13   ;;  %s529_s12 = sphi %s560_s12, %s622_s12  }
   0x3   : > { %s38_s17 = ssub.s32 %s537_s14, %s577_s16  ;;  %s41_s18 = sadd.s32 1, %s533_s13 }
   0x4   : > { %p39_p0 = scmp.eq.s32.totalorder %s38_s17, 0  ;;  %p48_p1 = scmp.ne.s32.totalorder %s533_s13, %s529_s12 }
   0x5   : > { %p49_p2 = scmp.eq.s32.totalorder %s537_s14, 0  ;;  %p451_p4 = scmp.ge.s32.totalorder %s537_s14, 2 }
   0x6   : > { %s586_s19 = scalar_select %p39_p0, %s533_s13, %s41_s18  }
   0x7   : > { %p50_p3 = por %p49_p2, %p48_p1  ;;  %129 = sbr.rel (%p451_p4) target bundleno = 23 (0x17), region = 20 }
   0xe   : > { %132 = sbr.rel (!%p50_p3) target bundleno = 23 (0x17), region = 24  ;;  %s134_s20 = sand.u32 (%p50_p3), 1, %s533_s13  }
   0xf   : > { %s473_s21 = sshll.u32 (%p50_p3), %s537_s14, 3  ;;  %s474_s22 = smul.u32 (%p50_p3), 72, %s134_s20 }
  0x10   : > { %s139_s25 = scalar_lea.vmem (%p50_p3), %s619_s1, %s473_s21 }
  0x11   : > { %v183_v0 = vld [vmem:[%s139_s25] sm:$0xff] (%p50_p3)  ;;  %v185_v1 = vld [vmem:[%s139_s25 + $0x10] sm:$0xff] (%p50_p3)  ;;  %s136_s26 = scalar_lea.vmem (%p50_p3), [#allocation2], %s474_s22 }
  0x12   : > { %v187_v2 = vld [vmem:[%s139_s25 + $0x20] sm:$0xff] (%p50_p3)  ;;  %v189_v3 = vld [vmem:[%s139_s25 + $0x30] sm:$0xff] (%p50_p3)  ;;  %184 = vst [vmem:[%s136_s26] sm:$0xff] (%p50_p3), %v183_v0  ;;  %186 = vst [vmem:[%s136_s26 + $0x8] sm:$0xff] (%p50_p3), %v185_v1 }
  0x13   : > { %v191_v4 = vld [vmem:[%s139_s25 + $0x40] sm:$0xff] (%p50_p3)  ;;  %v193_v5 = vld [vmem:[%s139_s25 + $0x50] sm:$0xff] (%p50_p3)  ;;  %188 = vst [vmem:[%s136_s26 + $0x10] sm:$0xff] (%p50_p3), %v187_v2  ;;  %190 = vst [vmem:[%s136_s26 + $0x18] sm:$0xff] (%p50_p3), %v189_v3 }
  0x14   : > { %192 = vst [vmem:[%s136_s26 + $0x20] sm:$0xff] (%p50_p3), %v191_v4  ;;  %194 = vst [vmem:[%s136_s26 + $0x28] sm:$0xff] (%p50_p3), %v193_v5  ;;  %v195_v6 = vld [vmem:[%s139_s25 + $0x60] sm:$0xff] (%p50_p3)  ;;  %v197_v7 = vld [vmem:[%s139_s25 + $0x70] sm:$0xff] (%p50_p3) }
  0x15   : > { %v199_v8 = vld [vmem:[%s139_s25 + $0x80] sm:$0xff]  ;;  %196 = vst [vmem:[%s136_s26 + $0x30] sm:$0xff] %v195_v6  ;;  %198 = vst [vmem:[%s136_s26 + $0x38] sm:$0xff] %v197_v7 }
  0x16   : > { %200 = vst [vmem:[%s136_s26 + $0x40] sm:$0xff] %v199_v8 }
  0x17 PF: > { %p454_p5 = scmp.ge.s32.totalorder %s537_s14, 1  ;;  %p214_p6 = scmp.lt.s32.totalorder %s537_s14, 3 }
  0x19   : > { %p215_p7 = pnand %p454_p5, %p214_p6 }
  0x1a   : > { %s221_s27 = sand.u32 (!%p215_p7), 1, %s529_s12   ;;  %v539_v9 = vmov (!%p215_p7), 0   ;;  %vm324_vm0 = vcmask (!%p215_p7), 1043456   ;;  %v263_v22 = vld [vmem:[%s618_s0] sm:$0xf] (!%p215_p7)  ;;  %vm320_vm1 = vcmask (!%p215_p7), 588800  }
  0x1b   : > { %218 = sbr.rel (%p215_p7) target bundleno = 268 (0x10c), region = 66  ;;  %363 = vmatprep.mubr.bf16.mxu0 (!%p215_p7), %v539_v9  ;;  %s455_s5 = sshll.u32 (!%p215_p7), %s448_s15, 1 }
  0x1c   : > { %s475_s28 = smul.u32 (!%p215_p7), 72, %s221_s27  ;;  %p251_p8 = scmp.lt.s32.totalorder (!%p215_p7), %s455_s5, 3 }
  0x1e   : > { %s223_s29 = scalar_lea.vmem (!%p215_p7), [#allocation2], %s475_s28 }
  0x1f   : > { %v501_v10 = vld [vmem:[%s223_s29 + $0x4] ss:$8 sps:$4 sm:$0xff] (!%p215_p7)   ;;  %v503_v11 = vld [vmem:[%s223_s29] ss:$8 sps:$4 sm:$0xff] (!%p215_p7)   ;;  %v504_v12 = vld [vmem:[%s223_s29 + $0x14] ss:$8 sps:$4 sm:$0xff] (!%p215_p7)  }
  0x20   : > { %331 = vmatprep.subr.bf16.mxu0 (!%p215_p7), %v501_v10  ;;  %v506_v13 = vld [vmem:[%s223_s29 + $0x10] ss:$8 sps:$4 sm:$0xff] (!%p215_p7)   ;;  %v507_v14 = vld [vmem:[%s223_s29 + $0x24] ss:$8 sps:$4 sm:$0xff] (!%p215_p7)   ;;  %v509_v15 = vld [vmem:[%s223_s29 + $0x20] ss:$8 sps:$4 sm:$0xff] (!%p215_p7)  }
  0x21   : > { %332 = vmatpush1.bf16.msra.mxu0 (!%p215_p7), %v503_v11  ;;  %v510_v16 = vld [vmem:[%s223_s29 + $0x34] ss:$8 sps:$4 sm:$0xff] (!%p215_p7)   ;;  %v272_v17 = vld [vmem:[%s223_s29 + $0x40] sm:$0xff] (!%p215_p7)  ;;  %v512_v18 = vld [vmem:[%s223_s29 + $0x30] ss:$8 sps:$4 sm:$0xff] (!%p215_p7)  }
  0x22   : > { %333 = vmatprep.subr.bf16.mxu0 %v504_v12  ;;  %v468_v19 = vcombine.high %v272_v17, %v272_v17  ;;  %v467_v20 = vcombine.low %v272_v17, %v272_v17  ;;  %s626_s5 = smov (!%p251_p8, %s455_s5), 3 }
  0x23   : > { %s456_s6 = sshll.u32 %s626_s5, 3 }
  0x24   : > { %v326_v21 = vsel %vm324_vm0, %v467_v20, 0  ;;  %s254_s9 = scalar_lea.vmem %s620_s2, %s456_s6  ;;  %s260_s12 = scalar_lea.vmem %s621_s3, %s456_s6 }
  0x25   : > { %334 = vmatpush1.bf16.msra.mxu0 %v506_v13  ;;  %v273_v23 = vld [vmem:[%s254_s9] sm:$0xff]  ;;  %v274_v24 = vld [vmem:[%s254_s9 + $0x8] sm:$0xff] }
  0x26   : > { %335 = vmatprep.subr.bf16.mxu0 %v507_v14 }
  0x29   : > { %336 = vmatpush1.bf16.msra.mxu0 %v509_v15 }
  0x2a   : > { %337 = vmatprep.subr.bf16.mxu0 %v510_v16 }
  0x2d   : > { %338 = vmatpush1.bf16.msra.mxu0 %v512_v18 }
  0x2e   : > { %469 = vmatprep.subr.msk.bf16.mxu0 %vm324_vm0, %v468_v19 }
  0x31   : > { %340 = vmatpush1.bf16.msra.mxu0 %v326_v21 }
  0x34   : > { %470 = vmatmul.mubr.msk.bf16.vlgmr.msra.gmra.mrb[0].mxu0 %vm320_vm1, %v263_v22 }
 0x107   : > { %v365_v25 = vpop.f32.mrb[0].mxu0 }
 0x108   : > { %v366_v26 = vadd.f32 %v365_v25, %v273_v23  ;;  %v367_v27 = vpop.f32.mrb[1].mxu0 }
 0x109   : > { %v368_v28 = vadd.f32 %v367_v27, %v274_v24  ;;  %v369_v29 = vpop.f32.mrb[2].mxu0 }
 0x10a   : > { %372 = vst [vmem:[%s260_s12] sm:$0xff] %v366_v26  ;;  %v370_v30 = vpop.f32.mrb[3].mxu0 }
 0x10b   : > { %373 = vst [vmem:[%s260_s12 + $0x8] sm:$0xff] %v368_v28 }
 0x10c PF: > { %p10_p9 = scmp.ge.s32.totalorder %s577_s16, 4   ;;  %s622_s12 = smov %s533_s13 }
 0x10d   : > { %s623_s13 = smov %s586_s19  ;;  %s624_s14 = smov %s577_s16 }
 0x10e   :  { %12 = sbr.rel (!%p10_p9) target bundleno = 2 (0x2), region = 108 }

// kernel: _lambda_.37
= control target key start
LH: loop header
LB: loop body
LE: loop exit
PB: predicated region body
PF: predicated region fallthrough
CT: control target
= control target key end

     0   :  { %v201_v0 = vmov 0.0   ;;  %vm202_vm0 = vmmov 0   ;;  %v203_v2 = vmov 0   ;;  %vm65_vm1 = vcmask 1043456   ;;  %s262_s1 = inlined_call_operand.vmem [shape: bf16[72,128], index: 1, kind: input, shape index: {}]   ;;  %s263_s2 = inlined_call_operand.vmem [shape: f32[16,1], index: 2, kind: input, shape index: {}]   ;;  %s264_s0 = inlined_call_operand.vmem [shape: bf16[16,72], index: 0, kind: input, shape index: {}]   ;;  %s265_s3 = inlined_call_operand.vmem [shape: f32[16,1], index: 3, kind: input, shape index: {}]   ;;  %s266_s4 = inlined_call_operand.vmem [shape: bf16[16,128], index: 4, kind: output, shape index: {}]  }
   0x1   :  { %176 = vmatprep.subr.bf16.mxu0 %v201_v0  ;;  %v195_v1 = vld [vmem:[%s262_s1] sm:$0xff]   ;;  %186 = vmatprep.mubr.msk.bf16.mxu0 %vm202_vm0, %v201_v0  ;;  %v196_v3 = vld [vmem:[%s262_s1 + $0x8] sm:$0xff]   ;;  %v197_v5 = vld [vmem:[%s262_s1 + $0x10] sm:$0xff]   ;;  %vm61_vm2 = vcmask 588800  }
   0x2   :  { %193 = vset.pattern.permute.xlu0 %v203_v2  ;;  %194 = vset.pattern.permute.xlu1 %v203_v2  ;;  %v110_v4 = vld [vmem:[%s263_s2] sm:$0xff]  ;;  %v111_v7 = vld [vmem:[%s263_s2 + $0x8] sm:$0xff]  ;;  %v198_v9 = vld [vmem:[%s262_s1 + $0x18] sm:$0xff]  }
   0x3   :  { %177 = vmatpush3.bf16.msra.mxu0 %v195_v1  ;;  %114 = vperm.xlu0 %193, %v110_v4   ;;  %v124_v6 = vld [vmem:[%s265_s3] sm:$0xff]  ;;  %v125_v8 = vld [vmem:[%s265_s3 + $0x8] sm:$0xff] }
   0x4   :  { %178 = vmatprep.subr.bf16.mxu0 %v201_v0  ;;  %128 = vperm.xlu1 %194, %v124_v6   ;;  %v199_v10 = vld [vmem:[%s262_s1 + $0x20] ss:$0 sps:$4 sm:$0xff]  }
   0x5   :  { %v67_v11 = vsel %vm65_vm1, %v199_v10, 0  ;;  %v200_v12 = vld [vmem:[%s264_s0] sm:$0xff]  }
   0x7   :  { %179 = vmatpush3.bf16.msra.mxu0 %v196_v3  ;;  %119 = vperm.xlu0 %193, %v111_v7  }
   0x8   :  { %180 = vmatprep.subr.bf16.mxu0 %v201_v0  ;;  %133 = vperm.xlu1 %194, %v125_v8  }
   0xb   :  { %181 = vmatpush3.bf16.msra.mxu0 %v197_v5 }
   0xc   :  { %182 = vmatprep.subr.bf16.mxu0 %v201_v0 }
   0xf   :  { %183 = vmatpush3.bf16.msra.mxu0 %v198_v9 }
  0x10   :  { %184 = vmatprep.subr.bf16.mxu0 %v201_v0 }
  0x13   :  { %185 = vmatpush3.bf16.msra.mxu0 %v67_v11 }
  0x16   :  { %187 = vmatmul.mubr.msk.bf16.vlgmr.msra.gmra.mrb[0].mxu0 %vm61_vm2, %v200_v12 }
  0x82   :  { %v115_v13 = vpop.permute.xlu0 %114 }
  0x83   :  { %v129_v14 = vpop.permute.xlu1 %128 }
  0x86   :  { %v120_v18 = vpop.permute.xlu0 %119 }
  0x87   :  { %v134_v23 = vpop.permute.xlu1 %133 }
  0xe9   :  { %v103_v15 = vpop.f32.mrb[0].mxu0 }
  0xea   :  { %v122_v16 = vmul.f32 %v115_v13, %v103_v15  ;;  %v188_v17 = vpop.f32.mrb[1].mxu0 }
  0xeb   :  { %v106_v19 = vpop.f32.mrb[2].mxu0 }
  0xec   :  { %v136_v20 = vadd.f32 %v129_v14, %v122_v16  ;;  %v123_v21 = vmul.f32 %v120_v18, %v106_v19  ;;  %v189_v22 = vpop.f32.mrb[3].mxu0 }
  0xee   :  { %v137_v24 = vadd.f32 %v134_v23, %v123_v21  ;;  %v138_v25 = vmax.f32 %v136_v20, 0.0 }
  0xf0   :  { %v139_v26 = vmax.f32 %v137_v24, 0.0 }
  0xf2   :  { %v168_v27 = vpack.c.bf16 %v139_v26, %v138_v25 }
  0xf4   :  { %169 = vst [vmem:[%s266_s4] sm:$0xff] %v168_v27  }

// kernel: _lambda_.38
= control target key start
LH: loop header
LB: loop body
LE: loop exit
PB: predicated region body
PF: predicated region fallthrough
CT: control target
= control target key end

     0   :  { %v176_v0 = vmov 0   ;;  %vm100_vm0 = vcmask 130048   ;;  %s242_s1 = inlined_call_operand.vmem [shape: bf16[144,128], index: 1, kind: input, shape index: {}]   ;;  %s243_s0 = inlined_call_operand.vmem [shape: bf16[16,144], index: 0, kind: input, shape index: {}]   ;;  %s244_s2 = inlined_call_operand.vmem [shape: f32[16,128], index: 2, kind: input, shape index: {}]   ;;  %s245_s3 = inlined_call_operand.vmem [shape: f32[16,128], index: 3, kind: output, shape index: {}]  }
   0x1   :  { %104 = vmatprep.subr.bf16.mxu0 %v176_v0  ;;  %v164_v1 = vld [vmem:[%s242_s1] sm:$0xff]   ;;  %v165_v2 = vld [vmem:[%s242_s1 + $0x8] sm:$0xff]   ;;  %v166_v3 = vld [vmem:[%s242_s1 + $0x10] sm:$0xff]  }
   0x2   :  { %105 = vmatpush1.bf16.msra.mxu0 %v164_v1  ;;  %v167_v4 = vld [vmem:[%s242_s1 + $0x18] sm:$0xff]   ;;  %v175_v5 = vld [vmem:[%s243_s0 + $0x4] ss:$8 sps:$4 sm:$0xff]   ;;  %v170_v8 = vld [vmem:[%s242_s1 + $0x30] sm:$0xff]  }
   0x3   :  { %106 = vmatprep.subr.bf16.mxu0 %v176_v0  ;;  %162 = vmatprep.mubr.msk.bf16.mxu0 %vm100_vm0, %v175_v5  ;;  %v168_v6 = vld [vmem:[%s242_s1 + $0x20] sm:$0xff]   ;;  %v169_v7 = vld [vmem:[%s242_s1 + $0x28] sm:$0xff]   ;;  %v171_v9 = vld [vmem:[%s242_s1 + $0x38] sm:$0xff]  }
   0x4   :  { %v172_v10 = vld [vmem:[%s242_s1 + $0x40] sm:$0xff]   ;;  %v36_v14 = vld [vmem:[%s244_s2 + $0x8] sm:$0xff] }
   0x5   :  { %v173_v11 = vld [vmem:[%s243_s0] ss:$8 sps:$4 sm:$0xff]  }
   0x6   :  { %107 = vmatpush1.bf16.msra.mxu0 %v165_v2  ;;  %v35_v12 = vld [vmem:[%s244_s2] sm:$0xff] }
   0x7   :  { %108 = vmatprep.subr.bf16.mxu0 %v176_v0 }
   0xa   :  { %109 = vmatpush1.bf16.msra.mxu0 %v166_v3 }
   0xb   :  { %110 = vmatprep.subr.bf16.mxu0 %v176_v0 }
   0xe   :  { %111 = vmatpush1.bf16.msra.mxu0 %v167_v4 }
   0xf   :  { %112 = vmatprep.subr.bf16.mxu0 %v176_v0 }
  0x12   :  { %113 = vmatpush1.bf16.msra.mxu0 %v168_v6 }
  0x13   :  { %114 = vmatprep.subr.bf16.mxu0 %v176_v0 }
  0x16   :  { %115 = vmatpush1.bf16.msra.mxu0 %v169_v7 }
  0x17   :  { %116 = vmatprep.subr.bf16.mxu0 %v176_v0 }
  0x1a   :  { %117 = vmatpush1.bf16.msra.mxu0 %v170_v8 }
  0x1b   :  { %118 = vmatprep.subr.bf16.mxu0 %v176_v0 }
  0x1e   :  { %119 = vmatpush1.bf16.msra.mxu0 %v171_v9 }
  0x1f   :  { %120 = vmatprep.subr.bf16.mxu0 %v176_v0 }
  0x22   :  { %121 = vmatpush1.bf16.msra.mxu0 %v172_v10 }
  0x25   :  { %137 = vmatmul.mubr.bf16.vlgmr.msra.gmra.mrb[0].mxu0 %v173_v11 }
  0xf8   :  { %v138_v13 = vpop.f32.mrb[0].mxu0 }
  0xf9   :  { %v139_v15 = vadd.f32 %v138_v13, %v35_v12  ;;  %v140_v16 = vpop.f32.mrb[1].mxu0 }
  0xfa   :  { %v141_v17 = vpop.f32.mrb[2].mxu0 }
  0xfb   :  { %145 = vst [vmem:[%s245_s3] sm:$0xff] %v139_v15  ;;  %v142_v18 = vadd.f32 %v141_v17, %v36_v14  ;;  %v143_v19 = vpop.f32.mrb[3].mxu0 }
  0xfd   :  { %146 = vst [vmem:[%s245_s3 + $0x8] sm:$0xff] %v142_v18 }

// kernel: _lambda_.36
= control target key start
LH: loop header
LB: loop body
LE: loop exit
PB: predicated region body
PF: predicated region fallthrough
CT: control target
= control target key end

     0   :  { %vm24_vm0 = vcmask 1043456   ;;  %v88_v0 = vmov 0.0   ;;  %vm89_vm1 = vmmov 0   ;;  %vm20_vm2 = vcmask 64512   ;;  %s117_s1 = inlined_call_operand.vmem [shape: bf16[8,128], index: 1, kind: input, shape index: {}]   ;;  %s118_s0 = inlined_call_operand.vmem [shape: bf16[16,8], index: 0, kind: input, shape index: {}]   ;;  %s119_s2 = inlined_call_operand.vmem [shape: f32[16,128], index: 2, kind: output, shape index: {}]  }
   0x1   :  { %79 = vmatprep.subr.bf16.mxu0 %v88_v0  ;;  %v14_v1 = vld [vmem:[%s117_s1] sm:$0xf]  ;;  %81 = vmatprep.mubr.msk.bf16.mxu0 %vm89_vm1, %v88_v0 }
   0x2   :  { %v26_v2 = vsel %vm24_vm0, %v14_v1, 0  ;;  %v87_v3 = vld [vmem:[%s118_s0] sm:$0xff]  }
   0x3   :  { %80 = vmatpush3.bf16.msra.mxu0 %v26_v2 }
   0x6   :  { %82 = vmatmul.mubr.msk.bf16.vlgmr.msra.gmra.mrb[0].mxu0 %vm20_vm2, %v87_v3 }
  0xd9   :  { %v62_v4 = vpop.f32.mrb[0].mxu0 }
  0xda   :  { %69 = vst [vmem:[%s119_s2] sm:$0xff] %v62_v4  ;;  %v83_v5 = vpop.f32.mrb[1].mxu0 }
  0xdb   :  { %v65_v6 = vpop.f32.mrb[2].mxu0 }
  0xdc   :  { %70 = vst [vmem:[%s119_s2 + $0x8] sm:$0xff] %v65_v6  ;;  %v84_v7 = vpop.f32.mrb[3].mxu0 }

// kernel: _lambda_.39
= control target key start
LH: loop header
LB: loop body
LE: loop exit
PB: predicated region body
PF: predicated region fallthrough
CT: control target
= control target key end

     0   :  { %v72_v0 = vmov 0   ;;  %s114_s2 = inlined_call_operand.vmem [shape: f32[16,1], index: 2, kind: input, shape index: {}]   ;;  %s115_s1 = inlined_call_operand.vmem [shape: f32[16,1], index: 1, kind: input, shape index: {}]   ;;  %s116_s0 = inlined_call_operand.vmem [shape: f32[16,128], index: 0, kind: input, shape index: {}]   ;;  %s117_s3 = inlined_call_operand.vmem [shape: bf16[16,128], index: 3, kind: output, shape index: {}]  }
   0x1   :  { %71 = vset.pattern.permute.xlu1 %v72_v0  ;;  %70 = vset.pattern.permute.xlu0 %v72_v0  ;;  %v30_v1 = vld [vmem:[%s114_s2] sm:$0xff]  ;;  %v31_v3 = vld [vmem:[%s114_s2 + $0x8] sm:$0xff] }
   0x2   :  { %v16_v2 = vld [vmem:[%s115_s1] sm:$0xff]  ;;  %34 = vperm.xlu1 %71, %v30_v1   ;;  %v17_v4 = vld [vmem:[%s115_s1 + $0x8] sm:$0xff] }
   0x3   :  { %20 = vperm.xlu0 %70, %v16_v2   ;;  %v14_v5 = vld [vmem:[%s116_s0] sm:$0xff]  ;;  %v15_v9 = vld [vmem:[%s116_s0 + $0x8] sm:$0xff] }
   0x6   :  { %39 = vperm.xlu1 %71, %v31_v3  }
   0x7   :  { %25 = vperm.xlu0 %70, %v17_v4  }
  0x81   :  { %v35_v6 = vpop.permute.xlu1 %34 }
  0x82   :  { %v21_v7 = vpop.permute.xlu0 %20 }
  0x83   :  { %v28_v8 = vmul.f32 %v21_v7, %v14_v5 }
  0x85   :  { %v42_v11 = vadd.f32 %v35_v6, %v28_v8  ;;  %v40_v13 = vpop.permute.xlu1 %39 }
  0x86   :  { %v26_v10 = vpop.permute.xlu0 %25 }
  0x87   :  { %v29_v12 = vmul.f32 %v26_v10, %v15_v9  ;;  %v44_v15 = vmax.f32 %v42_v11, 0.0 }
  0x89   :  { %v43_v14 = vadd.f32 %v40_v13, %v29_v12 }
  0x8b   :  { %v45_v16 = vmax.f32 %v43_v14, 0.0 }
  0x8d   :  { %v67_v17 = vpack.c.bf16 %v45_v16, %v44_v15 }
  0x8f   :  { %68 = vst [vmem:[%s117_s3] sm:$0xff] %v67_v17  }

// kernel: _lambda_.40
= control target key start
LH: loop header
LB: loop body
LE: loop exit
PB: predicated region body
PF: predicated region fallthrough
CT: control target
= control target key end

     0   :  { %v226_v0 = vmov 0   ;;  %vm101_vm0 = vcmask 130048   ;;  %s300_s1 = inlined_call_operand.vmem [shape: bf16[144,128], index: 1, kind: input, shape index: {}]   ;;  %s301_s0 = inlined_call_operand.vmem [shape: bf16[16,144], index: 0, kind: input, shape index: {}]   ;;  %s302_s2 = inlined_call_operand.vmem [shape: f32[16,1], index: 2, kind: input, shape index: {}]   ;;  %s303_s3 = inlined_call_operand.vmem [shape: f32[16,1], index: 3, kind: input, shape index: {}]   ;;  %s304_s4 = inlined_call_operand.vmem [shape: bf16[16,128], index: 4, kind: output, shape index: {}]  }
   0x1   :  { %105 = vmatprep.subr.bf16.mxu0 %v226_v0  ;;  %v214_v1 = vld [vmem:[%s300_s1] sm:$0xff]   ;;  %212 = vset.pattern.permute.xlu0 %v226_v0  ;;  %v215_v2 = vld [vmem:[%s300_s1 + $0x8] sm:$0xff]   ;;  %v216_v3 = vld [vmem:[%s300_s1 + $0x10] sm:$0xff]  }
   0x2   :  { %213 = vset.pattern.permute.xlu1 %v226_v0  ;;  %106 = vmatpush1.bf16.msra.mxu0 %v214_v1  ;;  %v217_v4 = vld [vmem:[%s300_s1 + $0x18] sm:$0xff]   ;;  %v225_v5 = vld [vmem:[%s301_s0 + $0x4] ss:$8 sps:$4 sm:$0xff]   ;;  %v220_v12 = vld [vmem:[%s300_s1 + $0x30] sm:$0xff]  }
   0x3   :  { %107 = vmatprep.subr.bf16.mxu0 %v226_v0  ;;  %v146_v6 = vld [vmem:[%s302_s2] sm:$0xff]  ;;  %201 = vmatprep.mubr.msk.bf16.mxu0 %vm101_vm0, %v225_v5  ;;  %v147_v8 = vld [vmem:[%s302_s2 + $0x8] sm:$0xff]  ;;  %v221_v13 = vld [vmem:[%s300_s1 + $0x38] sm:$0xff]  }
   0x4   :  { %v160_v7 = vld [vmem:[%s303_s3] sm:$0xff]  ;;  %150 = vperm.xlu0 %212, %v146_v6   ;;  %v161_v9 = vld [vmem:[%s303_s3 + $0x8] sm:$0xff] }
   0x5   :  { %164 = vperm.xlu1 %213, %v160_v7   ;;  %v218_v10 = vld [vmem:[%s300_s1 + $0x20] sm:$0xff]   ;;  %v219_v11 = vld [vmem:[%s300_s1 + $0x28] sm:$0xff]  }
   0x6   :  { %108 = vmatpush1.bf16.msra.mxu0 %v215_v2  ;;  %v222_v14 = vld [vmem:[%s300_s1 + $0x40] sm:$0xff]  }
   0x7   :  { %109 = vmatprep.subr.bf16.mxu0 %v226_v0  ;;  %v223_v15 = vld [vmem:[%s301_s0] ss:$8 sps:$4 sm:$0xff]  }
   0x8   :  { %155 = vperm.xlu0 %212, %v147_v8  }
   0x9   :  { %169 = vperm.xlu1 %213, %v161_v9  }
   0xa   :  { %110 = vmatpush1.bf16.msra.mxu0 %v216_v3 }
   0xb   :  { %111 = vmatprep.subr.bf16.mxu0 %v226_v0 }
   0xe   :  { %112 = vmatpush1.bf16.msra.mxu0 %v217_v4 }
   0xf   :  { %113 = vmatprep.subr.bf16.mxu0 %v226_v0 }
  0x12   :  { %114 = vmatpush1.bf16.msra.mxu0 %v218_v10 }
  0x13   :  { %115 = vmatprep.subr.bf16.mxu0 %v226_v0 }
  0x16   :  { %116 = vmatpush1.bf16.msra.mxu0 %v219_v11 }
  0x17   :  { %117 = vmatprep.subr.bf16.mxu0 %v226_v0 }
  0x1a   :  { %118 = vmatpush1.bf16.msra.mxu0 %v220_v12 }
  0x1b   :  { %119 = vmatprep.subr.bf16.mxu0 %v226_v0 }
  0x1e   :  { %120 = vmatpush1.bf16.msra.mxu0 %v221_v13 }
  0x1f   :  { %121 = vmatprep.subr.bf16.mxu0 %v226_v0 }
  0x22   :  { %122 = vmatpush1.bf16.msra.mxu0 %v222_v14 }
  0x25   :  { %138 = vmatmul.mubr.bf16.vlgmr.msra.gmra.mrb[0].mxu0 %v223_v15 }
  0x83   :  { %v151_v16 = vpop.permute.xlu0 %150 }
  0x84   :  { %v165_v17 = vpop.permute.xlu1 %164 }
  0x87   :  { %v156_v21 = vpop.permute.xlu0 %155 }
  0x88   :  { %v170_v26 = vpop.permute.xlu1 %169 }
  0xf8   :  { %v139_v18 = vpop.f32.mrb[0].mxu0 }
  0xf9   :  { %v158_v19 = vmul.f32 %v151_v16, %v139_v18  ;;  %v141_v20 = vpop.f32.mrb[1].mxu0 }
  0xfa   :  { %v142_v22 = vpop.f32.mrb[2].mxu0 }
  0xfb   :  { %v172_v23 = vadd.f32 %v165_v17, %v158_v19  ;;  %v159_v24 = vmul.f32 %v156_v21, %v142_v22  ;;  %v144_v25 = vpop.f32.mrb[3].mxu0 }
  0xfd   :  { %v173_v27 = vadd.f32 %v170_v26, %v159_v24  ;;  %v174_v28 = vmax.f32 %v172_v23, 0.0 }
  0xff   :  { %v175_v29 = vmax.f32 %v173_v27, 0.0 }
 0x101   :  { %v209_v30 = vpack.c.bf16 %v175_v29, %v174_v28 }
 0x103   :  { %210 = vst [vmem:[%s304_s4] sm:$0xff] %v209_v30  }

// kernel: _lambda_.44
= control target key start
LH: loop header
LB: loop body
LE: loop exit
PB: predicated region body
PF: predicated region fallthrough
CT: control target
= control target key end

     0   :  { %v312_v0 = vmov 0   ;;  %vm112_vm0 = vcmask 130048   ;;  %vm244_vm1 = vcmask 257024   ;;  %s433_s1 = inlined_call_operand.vmem [shape: bf16[144,32], index: 1, kind: input, shape index: {}]   ;;  %s434_s0 = inlined_call_operand.vmem [shape: bf16[32,144], index: 0, kind: input, shape index: {}]   ;;  %s435_s2 = inlined_call_operand.vmem [shape: f32[32,1], index: 2, kind: input, shape index: {}]   ;;  %s436_s3 = inlined_call_operand.vmem [shape: f32[32,1], index: 3, kind: input, shape index: {}]   ;;  %s437_s4 = inlined_call_operand.vmem [shape: bf16[32,32], index: 4, kind: output, shape index: {}]  }
   0x1   :  { %119 = vmatprep.subr.bf16.mxu0 %v312_v0  ;;  %276 = vmatprep.subr.bf16.mxu1 %v312_v0  ;;  %v297_v1 = vld [vmem:[%s433_s1] sm:$0xff]   ;;  %v298_v2 = vld [vmem:[%s433_s1 + $0x8] sm:$0xff]   ;;  %v299_v3 = vld [vmem:[%s433_s1 + $0x10] sm:$0xff]  }
   0x2   :  { %296 = vset.pattern.permute.xlu1 %v312_v0  ;;  %295 = vset.pattern.permute.xlu0 %v312_v0  ;;  %v300_v4 = vld [vmem:[%s433_s1 + $0x18] sm:$0xff]   ;;  %v308_v5 = vld [vmem:[%s434_s0 + $0x4] ss:$8 sps:$4 sm:$0xff]   ;;  %v170_v7 = vld [vmem:[%s435_s2 + $0x10] sm:$0xff] }
   0x3   :  { %120 = vmatpush1.bf16.msra.mxu0 %v297_v1  ;;  %285 = vmatpush1.bf16.msra.mxu1 %v297_v1  ;;  %v311_v6 = vld [vmem:[%s434_s0 + $0x14] ss:$8 sps:$4 sm:$0xff]   ;;  %v168_v8 = vld [vmem:[%s435_s2] sm:$0xff]  ;;  %v169_v11 = vld [vmem:[%s435_s2 + $0x8] sm:$0xff] }
   0x4   :  { %121 = vmatprep.subr.bf16.mxu0 %v312_v0  ;;  %277 = vmatprep.subr.bf16.mxu1 %v312_v0  ;;  %v171_v9 = vld [vmem:[%s435_s2 + $0x18] sm:$0xff]  ;;  %v301_v10 = vld [vmem:[%s433_s1 + $0x20] sm:$0xff]   ;;  %v197_v12 = vld [vmem:[%s436_s3 + $0x8] sm:$0xff] }
   0x5   :  { %266 = vmatprep.mubr.msk.bf16.mxu0 %vm112_vm0, %v308_v5  ;;  %184 = vperm.xlu1 %296, %v170_v7   ;;  %v302_v13 = vld [vmem:[%s433_s1 + $0x28] sm:$0xff]   ;;  %v196_v14 = vld [vmem:[%s436_s3] sm:$0xff]  ;;  %v199_v15 = vld [vmem:[%s436_s3 + $0x18] sm:$0xff] }
   0x6   :  { %267 = vmatprep.mubr.msk.bf16.mxu1 %vm112_vm0, %v311_v6  ;;  %174 = vperm.xlu0 %295, %v168_v8   ;;  %v303_v16 = vld [vmem:[%s433_s1 + $0x30] sm:$0xff]   ;;  %v304_v18 = vld [vmem:[%s433_s1 + $0x38] sm:$0xff]   ;;  %v305_v19 = vld [vmem:[%s433_s1 + $0x40] sm:$0xff]  }
   0x7   :  { %122 = vmatpush1.bf16.msra.mxu0 %v298_v2  ;;  %286 = vmatpush1.bf16.msra.mxu1 %v298_v2  ;;  %v198_v17 = vld [vmem:[%s436_s3 + $0x10] sm:$0xff]  ;;  %v306_v20 = vld [vmem:[%s434_s0] ss:$8 sps:$4 sm:$0xff]  }
   0x8   :  { %123 = vmatprep.subr.bf16.mxu0 %v312_v0  ;;  %278 = vmatprep.subr.bf16.mxu1 %v312_v0  ;;  %v309_v21 = vld [vmem:[%s434_s0 + $0x10] ss:$8 sps:$4 sm:$0xff]  }
   0x9   :  { %189 = vperm.xlu1 %296, %v171_v9  }
   0xa   :  { %179 = vperm.xlu0 %295, %v169_v11  }
   0xb   :  { %124 = vmatpush1.bf16.msra.mxu0 %v299_v3  ;;  %287 = vmatpush1.bf16.msra.mxu1 %v299_v3 }
   0xc   :  { %125 = vmatprep.subr.bf16.mxu0 %v312_v0  ;;  %279 = vmatprep.subr.bf16.mxu1 %v312_v0 }
   0xd   :  { %207 = vperm.xlu1 %296, %v197_v12  }
   0xe   :  { %202 = vperm.xlu0 %295, %v196_v14  }
   0xf   :  { %126 = vmatpush1.bf16.msra.mxu0 %v300_v4  ;;  %288 = vmatpush1.bf16.msra.mxu1 %v300_v4 }
  0x10   :  { %127 = vmatprep.subr.bf16.mxu0 %v312_v0  ;;  %280 = vmatprep.subr.bf16.mxu1 %v312_v0 }
  0x11   :  { %217 = vperm.xlu1 %296, %v199_v15  }
  0x12   :  { %212 = vperm.xlu0 %295, %v198_v17  }
  0x13   :  { %128 = vmatpush1.bf16.msra.mxu0 %v301_v10  ;;  %289 = vmatpush1.bf16.msra.mxu1 %v301_v10 }
  0x14   :  { %129 = vmatprep.subr.bf16.mxu0 %v312_v0  ;;  %281 = vmatprep.subr.bf16.mxu1 %v312_v0 }
  0x17   :  { %130 = vmatpush1.bf16.msra.mxu0 %v302_v13  ;;  %290 = vmatpush1.bf16.msra.mxu1 %v302_v13 }
  0x18   :  { %131 = vmatprep.subr.bf16.mxu0 %v312_v0  ;;  %282 = vmatprep.subr.bf16.mxu1 %v312_v0 }
  0x1b   :  { %132 = vmatpush1.bf16.msra.mxu0 %v303_v16  ;;  %291 = vmatpush1.bf16.msra.mxu1 %v303_v16 }
  0x1c   :  { %133 = vmatprep.subr.bf16.mxu0 %v312_v0  ;;  %283 = vmatprep.subr.bf16.mxu1 %v312_v0 }
  0x1f   :  { %134 = vmatpush1.bf16.msra.mxu0 %v304_v18  ;;  %292 = vmatpush1.bf16.msra.mxu1 %v304_v18 }
  0x20   :  { %135 = vmatprep.subr.bf16.mxu0 %v312_v0  ;;  %284 = vmatprep.subr.bf16.mxu1 %v312_v0 }
  0x23   :  { %136 = vmatpush1.bf16.msra.mxu0 %v305_v19  ;;  %293 = vmatpush1.bf16.msra.mxu1 %v305_v19 }
  0x26   :  { %152 = vmatmul.mubr.bf16.vlgmr.msra.gmra.mrb[0].mxu0 %v306_v20  ;;  %160 = vmatmul.mubr.bf16.vlgmr.msra.gmra.mrb[0].mxu1 %v309_v21 }
  0x84   :  { %v185_v23 = vpop.permute.xlu1 %184 }
  0x85   :  { %v175_v22 = vpop.permute.xlu0 %174 }
  0x88   :  { %v190_v25 = vpop.permute.xlu1 %189 }
  0x89   :  { %v180_v24 = vpop.permute.xlu0 %179 }
  0x8c   :  { %v208_v27 = vpop.permute.xlu1 %207 }
  0x8d   :  { %v203_v26 = vpop.permute.xlu0 %202 }
  0x90   :  { %v218_v43 = vpop.permute.xlu1 %217 }
  0x91   :  { %v213_v28 = vpop.permute.xlu0 %212 }
  0xf9   :  { %v153_v29 = vpop.f32.mrb[0].mxu0  ;;  %v161_v30 = vpop.f32.mrb[0].mxu1 }
  0xfa   :  { %v192_v31 = vmul.f32 %v175_v22, %v153_v29  ;;  %v194_v32 = vmul.f32 %v185_v23, %v161_v30  ;;  %v155_v33 = vpop.f32.mrb[1].mxu0  ;;  %v163_v34 = vpop.f32.mrb[1].mxu1 }
  0xfb   :  { %v156_v35 = vpop.f32.mrb[2].mxu0  ;;  %v164_v36 = vpop.f32.mrb[2].mxu1 }
  0xfc   :  { %v220_v37 = vadd.f32 %v203_v26, %v192_v31  ;;  %v222_v38 = vadd.f32 %v213_v28, %v194_v32  ;;  %v193_v39 = vmul.f32 %v180_v24, %v156_v35  ;;  %v195_v40 = vmul.f32 %v190_v25, %v164_v36  ;;  %v158_v41 = vpop.f32.mrb[3].mxu0  ;;  %v166_v42 = vpop.f32.mrb[3].mxu1 }
  0xfe   :  { %v224_v44 = vmax.f32 %v220_v37, 0.0  ;;  %v226_v45 = vmax.f32 %v222_v38, 0.0  ;;  %v221_v46 = vadd.f32 %v208_v27, %v193_v39  ;;  %v223_v47 = vadd.f32 %v218_v43, %v195_v40 }
 0x100   :  { %v272_v48 = vpack.c.bf16 %v224_v44, %v224_v44  ;;  %v274_v49 = vpack.c.bf16 %v226_v45, %v226_v45  ;;  %v225_v50 = vmax.f32 %v221_v46, 0.0  ;;  %v227_v51 = vmax.f32 %v223_v47, 0.0 }
 0x102   :  { %245 = vst.msk [vmem:[%s437_s4] sm:$0xf] %vm244_vm1, %v272_v48  ;;  %247 = vst.msk [vmem:[%s437_s4 + $0x8] sm:$0xf] %vm244_vm1, %v274_v49  ;;  %v273_v52 = vpack.c.bf16 %v225_v50, %v225_v50  ;;  %v275_v53 = vpack.c.bf16 %v227_v51, %v227_v51 }
 0x104   :  { %246 = vst.msk [vmem:[%s437_s4 + $0x4] sm:$0xf] %vm244_vm1, %v273_v52  ;;  %248 = vst.msk [vmem:[%s437_s4 + $0xc] sm:$0xf] %vm244_vm1, %v275_v53 }

// kernel: _lambda_.43
= control target key start
LH: loop header
LB: loop body
LE: loop exit
PB: predicated region body
PF: predicated region fallthrough
CT: control target
= control target key end

     0   :  { %vm34_vm0 = vcmask 130048   ;;  %vm90_vm1 = vcmask 261120   ;;  %s152_s1 = inlined_call_operand.vmem [shape: bf16[16,32], index: 1, kind: input, shape index: {}]   ;;  %s153_s0 = inlined_call_operand.vmem [shape: bf16[32,16], index: 0, kind: input, shape index: {}]   ;;  %s154_s2 = inlined_call_operand.vmem [shape: f32[32,32], index: 2, kind: output, shape index: {}]  }
   0x1   :  { %v113_v0 = vld [vmem:[%s152_s1] sm:$0xff]   ;;  %v115_v2 = vld [vmem:[%s153_s0 + $0x8] sm:$0xff]  }
   0x2   :  { %v114_v1 = vld [vmem:[%s153_s0] sm:$0xff]   ;;  %107 = vmatprep.subr.bf16.mxu0 %v113_v0 }
   0x3   :  { %108 = vmatpush3.bf16.msra.mxu0 %v113_v0  ;;  %109 = vmatprep.mubr.msk.bf16.mxu0 %vm34_vm0, %v114_v1 }
   0x6   :  { %110 = vmatmul.mubr.msk.bf16.vlgmr.msra.gmra.mrb[0].mxu0 %vm34_vm0, %v115_v2 }
  0xd9   :  { %v111_v3 = vpop.f32.mrb[0].mxu0 }
  0xda   :  { %93 = vst.msk [vmem:[%s154_s2 + $0x10] sm:$0xff] %vm90_vm1, %v111_v3  ;;  %v75_v4 = vpop.f32.mrb[1].mxu0 }
  0xdb   :  { %91 = vst.msk [vmem:[%s154_s2] sm:$0xff] %vm90_vm1, %v75_v4  ;;  %v112_v5 = vpop.f32.mrb[2].mxu0 }
  0xdc   :  { %94 = vst.msk [vmem:[%s154_s2 + $0x18] sm:$0xff] %vm90_vm1, %v112_v5  ;;  %v78_v6 = vpop.f32.mrb[3].mxu0 }
  0xdd   :  { %92 = vst.msk [vmem:[%s154_s2 + $0x8] sm:$0xff] %vm90_vm1, %v78_v6 }

// kernel: _lambda_.46
= control target key start
LH: loop header
LB: loop body
LE: loop exit
PB: predicated region body
PF: predicated region fallthrough
CT: control target
= control target key end

     0   :  { %v114_v0 = vmov 0   ;;  %vm94_vm0 = vcmask 257024   ;;  %s183_s1 = inlined_call_operand.vmem [shape: f32[32,1], index: 1, kind: input, shape index: {}]   ;;  %s184_s2 = inlined_call_operand.vmem [shape: f32[32,1], index: 2, kind: input, shape index: {}]   ;;  %s185_s0 = inlined_call_operand.vmem [shape: f32[32,32], index: 0, kind: input, shape index: {}]   ;;  %s186_s3 = inlined_call_operand.vmem [shape: bf16[32,32], index: 3, kind: output, shape index: {}]  }
   0x1   :  { %113 = vset.pattern.permute.xlu1 %v114_v0  ;;  %112 = vset.pattern.permute.xlu0 %v114_v0  ;;  %v20_v1 = vld [vmem:[%s183_s1 + $0x10] sm:$0xff]  ;;  %v18_v2 = vld [vmem:[%s183_s1] sm:$0xff]  ;;  %v21_v3 = vld [vmem:[%s183_s1 + $0x18] sm:$0xff] }
   0x2   :  { %34 = vperm.xlu1 %113, %v20_v1   ;;  %24 = vperm.xlu0 %112, %v18_v2   ;;  %v19_v4 = vld [vmem:[%s183_s1 + $0x8] sm:$0xff]  ;;  %v46_v6 = vld [vmem:[%s184_s2] sm:$0xff]  ;;  %v49_v7 = vld [vmem:[%s184_s2 + $0x18] sm:$0xff] }
   0x3   :  { %v47_v5 = vld [vmem:[%s184_s2 + $0x8] sm:$0xff]  ;;  %v48_v8 = vld [vmem:[%s184_s2 + $0x10] sm:$0xff]  ;;  %v14_v11 = vld [vmem:[%s185_s0] sm:$0xff] }
   0x4   :  { %v15_v14 = vld [vmem:[%s185_s0 + $0x8] sm:$0xff]  ;;  %v16_v17 = vld [vmem:[%s185_s0 + $0x10] sm:$0xff]  ;;  %v17_v18 = vld [vmem:[%s185_s0 + $0x18] sm:$0xff] }
   0x6   :  { %39 = vperm.xlu1 %113, %v21_v3   ;;  %29 = vperm.xlu0 %112, %v19_v4  }
   0xa   :  { %57 = vperm.xlu1 %113, %v47_v5   ;;  %52 = vperm.xlu0 %112, %v46_v6  }
   0xe   :  { %67 = vperm.xlu1 %113, %v49_v7   ;;  %62 = vperm.xlu0 %112, %v48_v8  }
  0x81   :  { %v35_v9 = vpop.permute.xlu1 %34  ;;  %v25_v10 = vpop.permute.xlu0 %24 }
  0x82   :  { %v42_v15 = vmul.f32 %v25_v10, %v14_v11  ;;  %v44_v23 = vmul.f32 %v35_v9, %v16_v17 }
  0x85   :  { %v40_v12 = vpop.permute.xlu1 %39  ;;  %v30_v13 = vpop.permute.xlu0 %29 }
  0x86   :  { %v43_v16 = vmul.f32 %v30_v13, %v15_v14  ;;  %v45_v24 = vmul.f32 %v40_v12, %v17_v18 }
  0x89   :  { %v58_v19 = vpop.permute.xlu1 %57  ;;  %v53_v20 = vpop.permute.xlu0 %52 }
  0x8a   :  { %v71_v21 = vadd.f32 %v58_v19, %v43_v16  ;;  %v70_v22 = vadd.f32 %v53_v20, %v42_v15 }
  0x8c   :  { %v75_v25 = vmax.f32 %v71_v21, 0.0  ;;  %v74_v26 = vmax.f32 %v70_v22, 0.0 }
  0x8d   :  { %v68_v27 = vpop.permute.xlu1 %67  ;;  %v63_v28 = vpop.permute.xlu0 %62 }
  0x8e   :  { %v108_v29 = vpack.c.bf16 %v75_v25, %v75_v25  ;;  %v107_v30 = vpack.c.bf16 %v74_v26, %v74_v26  ;;  %v73_v31 = vadd.f32 %v68_v27, %v45_v24  ;;  %v72_v32 = vadd.f32 %v63_v28, %v44_v23 }
  0x90   :  { %96 = vst.msk [vmem:[%s186_s3 + $0x4] sm:$0xf] %vm94_vm0, %v108_v29  ;;  %95 = vst.msk [vmem:[%s186_s3] sm:$0xf] %vm94_vm0, %v107_v30  ;;  %v77_v33 = vmax.f32 %v73_v31, 0.0  ;;  %v76_v34 = vmax.f32 %v72_v32, 0.0 }
  0x92   :  { %v110_v35 = vpack.c.bf16 %v77_v33, %v77_v33  ;;  %v109_v36 = vpack.c.bf16 %v76_v34, %v76_v34 }
  0x94   :  { %98 = vst.msk [vmem:[%s186_s3 + $0xc] sm:$0xf] %vm94_vm0, %v110_v35  ;;  %97 = vst.msk [vmem:[%s186_s3 + $0x8] sm:$0xf] %vm94_vm0, %v109_v36 }

// kernel: _lambda_.45
= control target key start
LH: loop header
LB: loop body
LE: loop exit
PB: predicated region body
PF: predicated region fallthrough
CT: control target
= control target key end

     0   :  { %vm201_vm0 = vcmask 261120   ;;  %s528_s1 = inlined_call_operand.vmem [shape: bf16[288,32], index: 1, kind: input, shape index: {}]   ;;  %s529_s0 = inlined_call_operand.vmem [shape: bf16[32,288], index: 0, kind: input, shape index: {}]   ;;  %s530_s2 = inlined_call_operand.vmem [shape: f32[32,32], index: 2, kind: input, shape index: {}]   ;;  %s531_s3 = inlined_call_operand.vmem [shape: f32[32,32], index: 3, kind: output, shape index: {}]  }
   0x1   :  { %v380_v0 = vld [vmem:[%s528_s1 + $0x40] sm:$0xff]   ;;  %v382_v2 = vld [vmem:[%s528_s1 + $0x48] sm:$0xff]   ;;  %v384_v4 = vld [vmem:[%s528_s1 + $0x50] sm:$0xff]  }
   0x2   :  { %v381_v1 = vld [vmem:[%s528_s1] sm:$0xff]   ;;  %340 = vmatprep.subr.bf16.mxu0 %v380_v0  ;;  %v383_v3 = vld [vmem:[%s528_s1 + $0x8] sm:$0xff]   ;;  %v385_v5 = vld [vmem:[%s528_s1 + $0x10] sm:$0xff]  }
   0x3   :  { %341 = vmatpush3.bf16.msra.mxu0 %v381_v1  ;;  %v386_v6 = vld [vmem:[%s528_s1 + $0x58] sm:$0xff]   ;;  %v388_v8 = vld [vmem:[%s528_s1 + $0x60] sm:$0xff]   ;;  %v390_v11 = vld [vmem:[%s528_s1 + $0x68] sm:$0xff]  }
   0x4   :  { %342 = vmatprep.subr.bf16.mxu0 %v382_v2  ;;  %v387_v7 = vld [vmem:[%s528_s1 + $0x18] sm:$0xff]   ;;  %v389_v9 = vld [vmem:[%s528_s1 + $0x20] sm:$0xff]   ;;  %v391_v12 = vld [vmem:[%s528_s1 + $0x28] sm:$0xff]  }
   0x5   :  { %v395_v10 = vld [vmem:[%s528_s1 + $0x80] sm:$0xff]   ;;  %v392_v13 = vld [vmem:[%s528_s1 + $0x70] sm:$0xff]   ;;  %v400_v15 = vld [vmem:[%s528_s1 + $0x88] sm:$0xff]  }
   0x6   :  { %372 = vmatprep.subr.bf16.mxu1 %v395_v10  ;;  %v399_v14 = vld [vmem:[%s529_s0 + $0x4] ss:$12 sps:$4 sm:$0xff]   ;;  %v401_v16 = vld [vmem:[%s529_s0 + $0x8] ss:$12 sps:$4 sm:$0xff]   ;;  %v402_v17 = vld [vmem:[%s529_s0 + $0x20] ss:$12 sps:$4 sm:$0xff]  }
   0x7   :  { %343 = vmatpush3.bf16.msra.mxu0 %v383_v3  ;;  %373 = vmatpush3.bf16.msra.mxu1 %v395_v10  ;;  %v393_v18 = vld [vmem:[%s528_s1 + $0x30] sm:$0xff]   ;;  %v394_v19 = vld [vmem:[%s528_s1 + $0x78] sm:$0xff]   ;;  %v397_v21 = vld [vmem:[%s529_s0] ss:$12 sps:$4 sm:$0xff]  }
   0x8   :  { %344 = vmatprep.subr.bf16.mxu0 %v384_v4  ;;  %240 = vmatprep.mubr.bf16.mxu0 %v399_v14  ;;  %v396_v20 = vld [vmem:[%s528_s1 + $0x38] sm:$0xff]   ;;  %v59_v30 = vld [vmem:[%s530_s2] sm:$0xff]  ;;  %v60_v34 = vld [vmem:[%s530_s2 + $0x8] sm:$0xff] }
   0x9   :  { %374 = vmatprep.subr.bf16.mxu1 %v400_v15  ;;  %376 = vmatprep.mubr.msk.bf16.mxu1 %vm201_vm0, %v401_v16  ;;  %v403_v22 = vld [vmem:[%s529_s0 + $0x1c] ss:$12 sps:$4 sm:$0xff]   ;;  %v405_v23 = vld [vmem:[%s529_s0 + $0x18] ss:$12 sps:$4 sm:$0xff]   ;;  %v61_v41 = vld [vmem:[%s530_s2 + $0x10] sm:$0xff] }
   0xa   :  { %v62_v45 = vld [vmem:[%s530_s2 + $0x18] sm:$0xff] }
   0xb   :  { %345 = vmatpush3.bf16.msra.mxu0 %v385_v5  ;;  %375 = vmatpush3.bf16.msra.mxu1 %v400_v15 }
   0xc   :  { %346 = vmatprep.subr.bf16.mxu0 %v386_v6 }
   0xe   :  { %377 = vmatmul.mubr.msk.bf16.vlgmr.msra.gmra.mrb[0].mxu1 %vm201_vm0, %v402_v17 }
   0xf   :  { %347 = vmatpush3.bf16.msra.mxu0 %v387_v7 }
  0x10   :  { %348 = vmatprep.subr.bf16.mxu0 %v388_v8 }
  0x13   :  { %349 = vmatpush3.bf16.msra.mxu0 %v389_v9 }
  0x14   :  { %350 = vmatprep.subr.bf16.mxu0 %v390_v11 }
  0x17   :  { %351 = vmatpush3.bf16.msra.mxu0 %v391_v12 }
  0x18   :  { %352 = vmatprep.subr.bf16.mxu0 %v392_v13 }
  0x1b   :  { %353 = vmatpush3.bf16.msra.mxu0 %v393_v18 }
  0x1c   :  { %354 = vmatprep.subr.bf16.mxu0 %v394_v19 }
  0x1f   :  { %355 = vmatpush3.bf16.msra.mxu0 %v396_v20 }
  0x22   :  { %241 = vmatmul.mubr.bf16.vlgmr.msra.gmra.mrb[0].mxu0 %v397_v21 }
  0x23   :  { %248 = vmatprep.mubr.bf16.mxu0 %v403_v22 }
  0x2a   :  { %249 = vmatmul.mubr.bf16.gmra.mrb[4].mxu0 %v405_v23 }
  0xe1   :  { %v378_v24 = vpop.f32.mrb[0].mxu1 }
  0xe2   :  { %v291_v25 = vpop.f32.mrb[1].mxu1 }
  0xe3   :  { %v379_v26 = vpop.f32.mrb[2].mxu1 }
  0xe4   :  { %v294_v27 = vpop.f32.mrb[3].mxu1 }
  0xf5   :  { %v356_v28 = vpop.f32.mrb[0].mxu0 }
  0xf6   :  { %v357_v29 = vpop.f32.mrb[1].mxu0 }
  0xf7   :  { %v358_v31 = vadd.f32 %v357_v29, %v356_v28  ;;  %v359_v32 = vpop.f32.mrb[2].mxu0 }
  0xf8   :  { %v360_v33 = vpop.f32.mrb[3].mxu0 }
  0xf9   :  { %v361_v35 = vadd.f32 %v360_v33, %v359_v32  ;;  %v243_v36 = vadd.f32 %v358_v31, %v59_v30 }
  0xfb   :  { %v292_v37 = vadd.f32 %v291_v25, %v243_v36  ;;  %v246_v38 = vadd.f32 %v361_v35, %v60_v34 }
  0xfd   :  { %306 = vst.msk [vmem:[%s531_s3] sm:$0xff] %vm201_vm0, %v292_v37  ;;  %v295_v39 = vadd.f32 %v294_v27, %v246_v38  ;;  %v362_v40 = vpop.f32.mrb[4].mxu0 }
  0xfe   :  { %v363_v42 = vpop.f32.mrb[5].mxu0 }
  0xff   :  { %307 = vst.msk [vmem:[%s531_s3 + $0x8] sm:$0xff] %vm201_vm0, %v295_v39  ;;  %v364_v43 = vadd.f32 %v363_v42, %v362_v40  ;;  %v365_v44 = vpop.f32.mrb[6].mxu0 }
 0x100   :  { %v366_v46 = vpop.f32.mrb[7].mxu0 }
 0x101   :  { %v251_v47 = vadd.f32 %v364_v43, %v61_v41  ;;  %v367_v48 = vadd.f32 %v366_v46, %v365_v44 }
 0x103   :  { %v300_v49 = vadd.f32 %v378_v24, %v251_v47  ;;  %v254_v50 = vadd.f32 %v367_v48, %v62_v45 }
 0x105   :  { %308 = vst.msk [vmem:[%s531_s3 + $0x10] sm:$0xff] %vm201_vm0, %v300_v49  ;;  %v303_v51 = vadd.f32 %v379_v26, %v254_v50 }
 0x107   :  { %309 = vst.msk [vmem:[%s531_s3 + $0x18] sm:$0xff] %vm201_vm0, %v303_v51 }

// kernel: _lambda_.47
= control target key start
LH: loop header
LB: loop body
LE: loop exit
PB: predicated region body
PF: predicated region fallthrough
CT: control target
= control target key end

     0   :  { %v493_v1 = vmov 0   ;;  %vm200_vm0 = vcmask 261120   ;;  %vm381_vm1 = vcmask 257024   ;;  %s633_s1 = inlined_call_operand.vmem [shape: bf16[288,32], index: 1, kind: input, shape index: {}]   ;;  %s634_s0 = inlined_call_operand.vmem [shape: bf16[32,288], index: 0, kind: input, shape index: {}]   ;;  %s635_s2 = inlined_call_operand.vmem [shape: f32[32,1], index: 2, kind: input, shape index: {}]   ;;  %s636_s3 = inlined_call_operand.vmem [shape: f32[32,1], index: 3, kind: input, shape index: {}]   ;;  %s637_s4 = inlined_call_operand.vmem [shape: bf16[32,32], index: 4, kind: output, shape index: {}]  }
   0x1   :  { %v467_v0 = vld [vmem:[%s633_s1 + $0x40] sm:$0xff]   ;;  %466 = vset.pattern.permute.xlu1 %v493_v1  ;;  %465 = vset.pattern.permute.xlu0 %v493_v1  ;;  %v469_v3 = vld [vmem:[%s633_s1 + $0x48] sm:$0xff]   ;;  %v471_v5 = vld [vmem:[%s633_s1 + $0x50] sm:$0xff]  }
   0x2   :  { %v468_v2 = vld [vmem:[%s633_s1] sm:$0xff]   ;;  %424 = vmatprep.subr.bf16.mxu0 %v467_v0  ;;  %v470_v4 = vld [vmem:[%s633_s1 + $0x8] sm:$0xff]   ;;  %v472_v6 = vld [vmem:[%s633_s1 + $0x10] sm:$0xff]  }
   0x3   :  { %425 = vmatpush3.bf16.msra.mxu0 %v468_v2  ;;  %v473_v7 = vld [vmem:[%s633_s1 + $0x58] sm:$0xff]   ;;  %v475_v9 = vld [vmem:[%s633_s1 + $0x60] sm:$0xff]   ;;  %v477_v12 = vld [vmem:[%s633_s1 + $0x68] sm:$0xff]  }
   0x4   :  { %426 = vmatprep.subr.bf16.mxu0 %v469_v3  ;;  %v474_v8 = vld [vmem:[%s633_s1 + $0x18] sm:$0xff]   ;;  %v481_v10 = vld [vmem:[%s633_s1 + $0x80] sm:$0xff]   ;;  %v478_v13 = vld [vmem:[%s633_s1 + $0x28] sm:$0xff]  }
   0x5   :  { %v476_v11 = vld [vmem:[%s633_s1 + $0x20] sm:$0xff]   ;;  %456 = vmatprep.subr.bf16.mxu1 %v481_v10  ;;  %v484_v14 = vld [vmem:[%s633_s1 + $0x88] sm:$0xff]   ;;  %v479_v15 = vld [vmem:[%s633_s1 + $0x70] sm:$0xff]  }
   0x6   :  { %457 = vmatpush3.bf16.msra.mxu1 %v481_v10  ;;  %v487_v16 = vld [vmem:[%s634_s0 + $0x4] ss:$12 sps:$4 sm:$0xff]   ;;  %v488_v17 = vld [vmem:[%s634_s0 + $0x8] ss:$12 sps:$4 sm:$0xff]   ;;  %v489_v18 = vld [vmem:[%s634_s0 + $0x20] ss:$12 sps:$4 sm:$0xff]  }
   0x7   :  { %427 = vmatpush3.bf16.msra.mxu0 %v470_v4  ;;  %458 = vmatprep.subr.bf16.mxu1 %v484_v14  ;;  %v307_v19 = vld [vmem:[%s635_s2 + $0x10] sm:$0xff]  ;;  %v305_v21 = vld [vmem:[%s635_s2] sm:$0xff]  ;;  %v482_v22 = vld [vmem:[%s633_s1 + $0x78] sm:$0xff]  }
   0x8   :  { %428 = vmatprep.subr.bf16.mxu0 %v471_v5  ;;  %239 = vmatprep.mubr.bf16.mxu0 %v487_v16  ;;  %v480_v20 = vld [vmem:[%s633_s1 + $0x30] sm:$0xff]   ;;  %v308_v23 = vld [vmem:[%s635_s2 + $0x18] sm:$0xff]  ;;  %v306_v24 = vld [vmem:[%s635_s2 + $0x8] sm:$0xff] }
   0x9   :  { %460 = vmatprep.mubr.msk.bf16.mxu1 %vm200_vm0, %v488_v17  ;;  %321 = vperm.xlu1 %466, %v307_v19   ;;  %v483_v25 = vld [vmem:[%s633_s1 + $0x38] sm:$0xff]   ;;  %v334_v26 = vld [vmem:[%s636_s3 + $0x8] sm:$0xff]  ;;  %v333_v28 = vld [vmem:[%s636_s3] sm:$0xff] }
   0xa   :  { %459 = vmatpush3.bf16.msra.mxu1 %v484_v14  ;;  %311 = vperm.xlu0 %465, %v305_v21   ;;  %v485_v27 = vld [vmem:[%s634_s0] ss:$12 sps:$4 sm:$0xff]   ;;  %v490_v29 = vld [vmem:[%s634_s0 + $0x1c] ss:$12 sps:$4 sm:$0xff]   ;;  %v335_v31 = vld [vmem:[%s636_s3 + $0x10] sm:$0xff] }
   0xb   :  { %429 = vmatpush3.bf16.msra.mxu0 %v472_v6  ;;  %v336_v30 = vld [vmem:[%s636_s3 + $0x18] sm:$0xff] }
   0xc   :  { %430 = vmatprep.subr.bf16.mxu0 %v473_v7  ;;  %v492_v32 = vld [vmem:[%s634_s0 + $0x18] ss:$12 sps:$4 sm:$0xff]  }
   0xd   :  { %461 = vmatmul.mubr.msk.bf16.vlgmr.msra.gmra.mrb[0].mxu1 %vm200_vm0, %v489_v18  ;;  %326 = vperm.xlu1 %466, %v308_v23  }
   0xe   :  { %316 = vperm.xlu0 %465, %v306_v24  }
   0xf   :  { %431 = vmatpush3.bf16.msra.mxu0 %v474_v8 }
  0x10   :  { %432 = vmatprep.subr.bf16.mxu0 %v475_v9 }
  0x11   :  { %344 = vperm.xlu1 %466, %v334_v26  }
  0x12   :  { %339 = vperm.xlu0 %465, %v333_v28  }
  0x13   :  { %433 = vmatpush3.bf16.msra.mxu0 %v476_v11 }
  0x14   :  { %434 = vmatprep.subr.bf16.mxu0 %v477_v12 }
  0x15   :  { %354 = vperm.xlu1 %466, %v336_v30  }
  0x16   :  { %349 = vperm.xlu0 %465, %v335_v31  }
  0x17   :  { %435 = vmatpush3.bf16.msra.mxu0 %v478_v13 }
  0x18   :  { %436 = vmatprep.subr.bf16.mxu0 %v479_v15 }
  0x1b   :  { %437 = vmatpush3.bf16.msra.mxu0 %v480_v20 }
  0x1c   :  { %438 = vmatprep.subr.bf16.mxu0 %v482_v22 }
  0x1f   :  { %439 = vmatpush3.bf16.msra.mxu0 %v483_v25 }
  0x22   :  { %240 = vmatmul.mubr.bf16.vlgmr.msra.gmra.mrb[0].mxu0 %v485_v27 }
  0x23   :  { %247 = vmatprep.mubr.bf16.mxu0 %v490_v29 }
  0x2a   :  { %248 = vmatmul.mubr.bf16.gmra.mrb[4].mxu0 %v492_v32 }
  0x88   :  { %v322_v38 = vpop.permute.xlu1 %321 }
  0x89   :  { %v312_v37 = vpop.permute.xlu0 %311 }
  0x8c   :  { %v327_v44 = vpop.permute.xlu1 %326 }
  0x8d   :  { %v317_v40 = vpop.permute.xlu0 %316 }
  0x90   :  { %v345_v54 = vpop.permute.xlu1 %344 }
  0x91   :  { %v340_v50 = vpop.permute.xlu0 %339 }
  0x94   :  { %v355_v7 = vpop.permute.xlu1 %354 }
  0x95   :  { %v350_v4 = vpop.permute.xlu0 %349 }
  0xe0   :  { %v462_v33 = vpop.f32.mrb[0].mxu1 }
  0xe1   :  { %v290_v34 = vpop.f32.mrb[1].mxu1 }
  0xe2   :  { %v463_v35 = vpop.f32.mrb[2].mxu1 }
  0xe3   :  { %v293_v36 = vpop.f32.mrb[3].mxu1 }
  0xf5   :  { %v440_v39 = vpop.f32.mrb[0].mxu0 }
  0xf6   :  { %v441_v41 = vpop.f32.mrb[1].mxu0 }
  0xf7   :  { %v442_v42 = vadd.f32 %v441_v41, %v440_v39  ;;  %v443_v43 = vpop.f32.mrb[2].mxu0 }
  0xf8   :  { %v444_v45 = vpop.f32.mrb[3].mxu0 }
  0xf9   :  { %v445_v46 = vadd.f32 %v444_v45, %v443_v43  ;;  %v291_v47 = vadd.f32 %v442_v42, %v290_v34 }
  0xfb   :  { %v329_v48 = vmul.f32 %v312_v37, %v291_v47  ;;  %v294_v49 = vadd.f32 %v445_v46, %v293_v36 }
  0xfd   :  { %v357_v51 = vadd.f32 %v340_v50, %v329_v48  ;;  %v330_v52 = vmul.f32 %v317_v40, %v294_v49  ;;  %v446_v53 = vpop.f32.mrb[4].mxu0 }
  0xfe   :  { %v447_v55 = vpop.f32.mrb[5].mxu0 }
  0xff   :  { %v361_v56 = vmax.f32 %v357_v51, 0.0  ;;  %v358_v57 = vadd.f32 %v345_v54, %v330_v52  ;;  %v448_v58 = vadd.f32 %v447_v55, %v446_v53  ;;  %v449_v59 = vpop.f32.mrb[6].mxu0 }
 0x100   :  { %v450_v60 = vpop.f32.mrb[7].mxu0 }
 0x101   :  { %v420_v61 = vpack.c.bf16 %v361_v56, %v361_v56  ;;  %v362_v62 = vmax.f32 %v358_v57, 0.0  ;;  %v299_v63 = vadd.f32 %v462_v33, %v448_v58  ;;  %v451_v0 = vadd.f32 %v450_v60, %v449_v59 }
 0x103   :  { %382 = vst.msk [vmem:[%s637_s4] sm:$0xf] %vm381_vm1, %v420_v61  ;;  %v421_v1 = vpack.c.bf16 %v362_v62, %v362_v62  ;;  %v331_v2 = vmul.f32 %v322_v38, %v299_v63  ;;  %v302_v3 = vadd.f32 %v463_v35, %v451_v0 }
 0x105   :  { %383 = vst.msk [vmem:[%s637_s4 + $0x4] sm:$0xf] %vm381_vm1, %v421_v1  ;;  %v359_v5 = vadd.f32 %v350_v4, %v331_v2  ;;  %v332_v6 = vmul.f32 %v327_v44, %v302_v3 }
 0x107   :  { %v363_v8 = vmax.f32 %v359_v5, 0.0  ;;  %v360_v9 = vadd.f32 %v355_v7, %v332_v6 }
 0x109   :  { %v422_v10 = vpack.c.bf16 %v363_v8, %v363_v8  ;;  %v364_v11 = vmax.f32 %v360_v9, 0.0 }
 0x10b   :  { %384 = vst.msk [vmem:[%s637_s4 + $0x8] sm:$0xf] %vm381_vm1, %v422_v10  ;;  %v423_v12 = vpack.c.bf16 %v364_v11, %v364_v11 }
 0x10d   :  { %385 = vst.msk [vmem:[%s637_s4 + $0xc] sm:$0xf] %vm381_vm1, %v423_v12 }

// kernel: _lambda_.51
= control target key start
LH: loop header
LB: loop body
LE: loop exit
PB: predicated region body
PF: predicated region fallthrough
CT: control target
= control target key end

     0   :  { %v707_v1 = vmov 0   ;;  %vm238_vm0 = vcmask 261120   ;;  %vm533_vm1 = vcmask 60416   ;;  %s916_s1 = inlined_call_operand.vmem [shape: bf16[288,8], index: 1, kind: input, shape index: {}]   ;;  %s917_s0 = inlined_call_operand.vmem [shape: bf16[64,288], index: 0, kind: input, shape index: {}]   ;;  %s918_s2 = inlined_call_operand.vmem [shape: f32[64,1], index: 2, kind: input, shape index: {}]   ;;  %s919_s3 = inlined_call_operand.vmem [shape: f32[64,1], index: 3, kind: input, shape index: {}]   ;;  %s920_s4 = inlined_call_operand.vmem [shape: bf16[64,8], index: 4, kind: output, shape index: {}]  }
   0x1   :  { %v673_v0 = vld [vmem:[%s916_s1 + $0x40] sm:$0xff]   ;;  %672 = vset.pattern.permute.xlu1 %v707_v1  ;;  %671 = vset.pattern.permute.xlu0 %v707_v1  ;;  %v675_v3 = vld [vmem:[%s916_s1 + $0x48] sm:$0xff]   ;;  %v677_v5 = vld [vmem:[%s916_s1 + $0x50] sm:$0xff]  }
   0x2   :  { %v674_v2 = vld [vmem:[%s916_s1] sm:$0xff]   ;;  %596 = vmatprep.subr.bf16.mxu0 %v673_v0  ;;  %654 = vmatprep.subr.bf16.mxu1 %v673_v0  ;;  %v676_v4 = vld [vmem:[%s916_s1 + $0x8] sm:$0xff]   ;;  %v678_v6 = vld [vmem:[%s916_s1 + $0x10] sm:$0xff]  }
   0x3   :  { %597 = vmatpush3.bf16.msra.mxu0 %v674_v2  ;;  %662 = vmatpush3.bf16.msra.mxu1 %v674_v2  ;;  %v679_v7 = vld [vmem:[%s916_s1 + $0x58] sm:$0xff]   ;;  %v681_v9 = vld [vmem:[%s916_s1 + $0x60] sm:$0xff]   ;;  %v683_v11 = vld [vmem:[%s916_s1 + $0x68] sm:$0xff]  }
   0x4   :  { %598 = vmatprep.subr.bf16.mxu0 %v675_v3  ;;  %655 = vmatprep.subr.bf16.mxu1 %v675_v3  ;;  %v680_v8 = vld [vmem:[%s916_s1 + $0x18] sm:$0xff]   ;;  %v682_v10 = vld [vmem:[%s916_s1 + $0x20] sm:$0xff]   ;;  %v684_v14 = vld [vmem:[%s916_s1 + $0x28] sm:$0xff]  }
   0x5   :  { %v691_v12 = vld [vmem:[%s917_s0 + $0x4] ss:$12 sps:$4 sm:$0xff]   ;;  %v694_v13 = vld [vmem:[%s917_s0 + $0x4c] ss:$12 sps:$4 sm:$0xff]   ;;  %v692_v23 = vld [vmem:[%s917_s0 + $0x48] ss:$12 sps:$4 sm:$0xff]  }
   0x6   :  { %v685_v15 = vld [vmem:[%s916_s1 + $0x70] sm:$0xff]   ;;  %283 = vmatprep.mubr.bf16.mxu0 %v691_v12  ;;  %307 = vmatprep.mubr.bf16.mxu1 %v694_v13  ;;  %v687_v17 = vld [vmem:[%s916_s1 + $0x78] sm:$0xff]   ;;  %v381_v20 = vld [vmem:[%s918_s2] sm:$0xff] }
   0x7   :  { %599 = vmatpush3.bf16.msra.mxu0 %v676_v4  ;;  %663 = vmatpush3.bf16.msra.mxu1 %v676_v4  ;;  %v686_v16 = vld [vmem:[%s916_s1 + $0x30] sm:$0xff]   ;;  %v688_v18 = vld [vmem:[%s916_s1 + $0x38] sm:$0xff]   ;;  %v695_v21 = vld [vmem:[%s916_s1 + $0x80] sm:$0xff]  }
   0x8   :  { %600 = vmatprep.subr.bf16.mxu0 %v677_v5  ;;  %656 = vmatprep.subr.bf16.mxu1 %v677_v5  ;;  %v383_v19 = vld [vmem:[%s918_s2 + $0x10] sm:$0xff]  ;;  %v689_v22 = vld [vmem:[%s917_s0] ss:$12 sps:$4 sm:$0xff]   ;;  %v384_v24 = vld [vmem:[%s918_s2 + $0x18] sm:$0xff] }
   0x9   :  { %401 = vperm.xlu1 %672, %v383_v19   ;;  %391 = vperm.xlu0 %671, %v381_v20   ;;  %v382_v25 = vld [vmem:[%s918_s2 + $0x8] sm:$0xff]  ;;  %v385_v30 = vld [vmem:[%s918_s2 + $0x20] sm:$0xff]  ;;  %v388_v33 = vld [vmem:[%s918_s2 + $0x38] sm:$0xff] }
   0xa   :  { %v697_v26 = vld [vmem:[%s917_s0 + $0x1c] ss:$12 sps:$4 sm:$0xff]   ;;  %v700_v31 = vld [vmem:[%s917_s0 + $0x18] ss:$12 sps:$4 sm:$0xff]   ;;  %v701_v32 = vld [vmem:[%s917_s0 + $0x20] ss:$12 sps:$4 sm:$0xff]  }
   0xb   :  { %601 = vmatpush3.bf16.msra.mxu0 %v678_v6  ;;  %664 = vmatpush3.bf16.msra.mxu1 %v678_v6  ;;  %v696_v27 = vld [vmem:[%s916_s1 + $0x88] sm:$0xff]   ;;  %v387_v34 = vld [vmem:[%s918_s2 + $0x30] sm:$0xff]  ;;  %v704_v36 = vld [vmem:[%s917_s0 + $0x38] ss:$12 sps:$4 sm:$0xff]  }
   0xc   :  { %602 = vmatprep.subr.bf16.mxu0 %v679_v7  ;;  %657 = vmatprep.subr.bf16.mxu1 %v679_v7  ;;  %v699_v28 = vld [vmem:[%s917_s0 + $0x8] ss:$12 sps:$4 sm:$0xff]   ;;  %v437_v38 = vld [vmem:[%s919_s3] sm:$0xff]  ;;  %v705_v39 = vld [vmem:[%s917_s0 + $0x30] ss:$12 sps:$4 sm:$0xff]  }
   0xd   :  { %406 = vperm.xlu1 %672, %v384_v24   ;;  %396 = vperm.xlu0 %671, %v382_v25   ;;  %v386_v29 = vld [vmem:[%s918_s2 + $0x28] sm:$0xff]  ;;  %v702_v35 = vld [vmem:[%s917_s0 + $0x34] ss:$12 sps:$4 sm:$0xff]   ;;  %v706_v40 = vld [vmem:[%s917_s0 + $0x50] ss:$12 sps:$4 sm:$0xff]  }
   0xe   :  { %v438_v37 = vld [vmem:[%s919_s3 + $0x8] sm:$0xff]  ;;  %v440_v41 = vld [vmem:[%s919_s3 + $0x18] sm:$0xff]  ;;  %v439_v42 = vld [vmem:[%s919_s3 + $0x10] sm:$0xff] }
   0xf   :  { %603 = vmatpush3.bf16.msra.mxu0 %v680_v8  ;;  %665 = vmatpush3.bf16.msra.mxu1 %v680_v8  ;;  %v442_v43 = vld [vmem:[%s919_s3 + $0x28] sm:$0xff]  ;;  %v441_v44 = vld [vmem:[%s919_s3 + $0x20] sm:$0xff]  ;;  %v444_v45 = vld [vmem:[%s919_s3 + $0x38] sm:$0xff] }
  0x10   :  { %604 = vmatprep.subr.bf16.mxu0 %v681_v9  ;;  %658 = vmatprep.subr.bf16.mxu1 %v681_v9  ;;  %v443_v46 = vld [vmem:[%s919_s3 + $0x30] sm:$0xff] }
  0x11   :  { %416 = vperm.xlu1 %672, %v386_v29   ;;  %411 = vperm.xlu0 %671, %v385_v30  }
  0x13   :  { %605 = vmatpush3.bf16.msra.mxu0 %v682_v10  ;;  %666 = vmatpush3.bf16.msra.mxu1 %v682_v10 }
  0x14   :  { %606 = vmatprep.subr.bf16.mxu0 %v683_v11  ;;  %659 = vmatprep.subr.bf16.mxu1 %v683_v11 }
  0x15   :  { %426 = vperm.xlu1 %672, %v388_v33   ;;  %421 = vperm.xlu0 %671, %v387_v34  }
  0x17   :  { %607 = vmatpush3.bf16.msra.mxu0 %v684_v14  ;;  %667 = vmatpush3.bf16.msra.mxu1 %v684_v14 }
  0x18   :  { %608 = vmatprep.subr.bf16.mxu0 %v685_v15  ;;  %660 = vmatprep.subr.bf16.mxu1 %v685_v15 }
  0x19   :  { %452 = vperm.xlu1 %672, %v438_v37   ;;  %447 = vperm.xlu0 %671, %v437_v38  }
  0x1b   :  { %609 = vmatpush3.bf16.msra.mxu0 %v686_v16  ;;  %668 = vmatpush3.bf16.msra.mxu1 %v686_v16 }
  0x1c   :  { %610 = vmatprep.subr.bf16.mxu0 %v687_v17  ;;  %661 = vmatprep.subr.bf16.mxu1 %v687_v17 }
  0x1d   :  { %462 = vperm.xlu1 %672, %v440_v41   ;;  %457 = vperm.xlu0 %671, %v439_v42  }
  0x1f   :  { %611 = vmatpush3.bf16.msra.mxu0 %v688_v18  ;;  %669 = vmatpush3.bf16.msra.mxu1 %v688_v18 }
  0x20   :  { %642 = vmatprep.subr.bf16.mxu1 %v695_v21 }
  0x21   :  { %472 = vperm.xlu1 %672, %v442_v43   ;;  %467 = vperm.xlu0 %671, %v441_v44  }
  0x22   :  { %284 = vmatmul.mubr.bf16.vlgmr.msra.gmra.mrb[0].mxu0 %v689_v22  ;;  %308 = vmatmul.mubr.bf16.vlgmr.msra.gmra.mrb[0].mxu1 %v692_v23 }
  0x23   :  { %643 = vmatpush3.bf16.msra.mxu1 %v695_v21  ;;  %291 = vmatprep.mubr.bf16.mxu0 %v697_v26 }
  0x24   :  { %644 = vmatprep.subr.bf16.mxu1 %v696_v27  ;;  %646 = vmatprep.mubr.msk.bf16.mxu1 %vm238_vm0, %v699_v28 }
  0x25   :  { %482 = vperm.xlu1 %672, %v444_v45   ;;  %477 = vperm.xlu0 %671, %v443_v46  }
  0x27   :  { %645 = vmatpush3.bf16.msra.mxu1 %v696_v27 }
  0x2a   :  { %292 = vmatmul.mubr.bf16.gmra.mrb[4].mxu0 %v700_v31  ;;  %647 = vmatmul.mubr.msk.bf16.vlgmr.msra.gmra.mrb[4].mxu1 %vm238_vm0, %v701_v32 }
  0x2b   :  { %299 = vmatprep.mubr.bf16.mxu0 %v702_v35  ;;  %650 = vmatprep.mubr.msk.bf16.mxu1 %vm238_vm0, %v704_v36 }
  0x32   :  { %300 = vmatmul.mubr.bf16.gmra.mrb[8].mxu0 %v705_v39  ;;  %651 = vmatmul.mubr.msk.bf16.gmra.mrb[8].mxu1 %vm238_vm0, %v706_v40 }
  0x88   :  { %v402_v47 = vpop.permute.xlu1 %401  ;;  %v392_v48 = vpop.permute.xlu0 %391 }
  0x8c   :  { %v407_v49 = vpop.permute.xlu1 %406  ;;  %v397_v50 = vpop.permute.xlu0 %396 }
  0x90   :  { %v875_v51 = vpop.permute.xlu1 %416  ;;  %v877_v52 = vpop.permute.xlu0 %411 }
  0x94   :  { %v879_v53 = vpop.permute.xlu1 %426  ;;  %v422_v54 = vpop.permute.xlu0 %421 }
  0x98   :  { %v453_v55 = vpop.permute.xlu1 %452  ;;  %v448_v56 = vpop.permute.xlu0 %447 }
  0x9c   :  { %v463_v5 = vpop.permute.xlu1 %462  ;;  %v458_v6 = vpop.permute.xlu0 %457 }
  0xa0   :  { %v468_v21 = vpop.permute.xlu0 %467  ;;  %v473_v26 = vpop.permute.xlu1 %472 }
  0xf5   :  { %v612_v57 = vpop.f32.mrb[0].mxu0  ;;  %v630_v58 = vpop.f32.mrb[0].mxu1 }
  0xf6   :  { %v613_v59 = vpop.f32.mrb[1].mxu0  ;;  %v631_v60 = vpop.f32.mrb[1].mxu1 }
  0xf7   :  { %v614_v61 = vadd.f32 %v613_v59, %v612_v57  ;;  %v632_v62 = vadd.f32 %v631_v60, %v630_v58  ;;  %v615_v63 = vpop.f32.mrb[2].mxu0  ;;  %v633_v0 = vpop.f32.mrb[2].mxu1 }
  0xf8   :  { %v616_v1 = vpop.f32.mrb[3].mxu0  ;;  %v634_v2 = vpop.f32.mrb[3].mxu1 }
  0xf9   :  { %v617_v3 = vadd.f32 %v616_v1, %v615_v63  ;;  %v635_v4 = vadd.f32 %v634_v2, %v633_v0  ;;  %v483_v59 = vpop.permute.xlu1 %482 }
  0xfd   :  { %v618_v7 = vpop.f32.mrb[4].mxu0  ;;  %v648_v8 = vpop.f32.mrb[4].mxu1 }
  0xfe   :  { %v619_v9 = vpop.f32.mrb[5].mxu0  ;;  %v350_v10 = vpop.f32.mrb[5].mxu1 }
  0xff   :  { %v620_v11 = vadd.f32 %v619_v9, %v618_v7  ;;  %v351_v12 = vadd.f32 %v614_v61, %v350_v10  ;;  %v621_v13 = vpop.f32.mrb[6].mxu0  ;;  %v649_v14 = vpop.f32.mrb[6].mxu1 }
 0x100   :  { %v622_v15 = vpop.f32.mrb[7].mxu0  ;;  %v353_v16 = vpop.f32.mrb[7].mxu1 }
 0x101   :  { %v359_v17 = vadd.f32 %v648_v8, %v620_v11  ;;  %v429_v18 = vmul.f32 %v392_v48, %v351_v12  ;;  %v623_v19 = vadd.f32 %v622_v15, %v621_v13  ;;  %v354_v20 = vadd.f32 %v617_v3, %v353_v16 }
 0x103   :  { %v431_v22 = vmul.f32 %v402_v47, %v359_v17  ;;  %v485_v23 = vadd.f32 %v448_v56, %v429_v18  ;;  %v362_v24 = vadd.f32 %v649_v14, %v623_v19  ;;  %v430_v25 = vmul.f32 %v397_v50, %v354_v20  ;;  %v478_v47 = vpop.permute.xlu0 %477 }
 0x105   :  { %v487_v27 = vadd.f32 %v458_v6, %v431_v22  ;;  %v493_v28 = vmax.f32 %v485_v23, 0.0  ;;  %v432_v29 = vmul.f32 %v407_v49, %v362_v24  ;;  %v486_v30 = vadd.f32 %v453_v55, %v430_v25  ;;  %v624_v31 = vpop.f32.mrb[8].mxu0  ;;  %v652_v32 = vpop.f32.mrb[8].mxu1 }
 0x106   :  { %v375_v33 = vadd.f32 %v652_v32, %v632_v62  ;;  %v625_v34 = vpop.f32.mrb[9].mxu0  ;;  %v366_v35 = vpop.f32.mrb[9].mxu1 }
 0x107   :  { %v495_v36 = vmax.f32 %v487_v27, 0.0  ;;  %v588_v37 = vpack.c.bf16 %v493_v28, %v493_v28  ;;  %v488_v38 = vadd.f32 %v463_v5, %v432_v29  ;;  %v494_v39 = vmax.f32 %v486_v30, 0.0  ;;  %v627_v40 = vpop.f32.mrb[10].mxu0  ;;  %v653_v41 = vpop.f32.mrb[10].mxu1 }
 0x108   :  { %v435_v42 = vmul.f32 %v422_v54, %v375_v33  ;;  %v626_v43 = vadd.f32 %v625_v34, %v624_v31  ;;  %v378_v44 = vadd.f32 %v653_v41, %v635_v4  ;;  %v628_v45 = vpop.f32.mrb[11].mxu0  ;;  %v369_v46 = vpop.f32.mrb[11].mxu1 }
 0x109   :  { %v590_v48 = vpack.c.bf16 %v495_v36, %v495_v36  ;;  %534 = vst.msk [vmem:[%s920_s4] sm:$0xf] %vm533_vm1, %v588_v37  ;;  %v496_v49 = vmax.f32 %v488_v38, 0.0  ;;  %v589_v50 = vpack.c.bf16 %v494_v39, %v494_v39  ;;  %v629_v55 = vadd.f32 %v628_v45, %v627_v40 }
 0x10a   :  { %v491_v56 = vadd.f32 %v478_v47, %v435_v42  ;;  %v367_v57 = vadd.f32 %v626_v43, %v366_v35  ;;  %v436_v58 = vmul.f32 %v879_v53, %v378_v44 }
 0x10b   :  { %536 = vst.msk [vmem:[%s920_s4 + $0x8] sm:$0xf] %vm533_vm1, %v590_v48  ;;  %v591_v54 = vpack.c.bf16 %v496_v49, %v496_v49  ;;  %535 = vst.msk [vmem:[%s920_s4 + $0x4] sm:$0xf] %vm533_vm1, %v589_v50  ;;  %v370_v60 = vadd.f32 %v629_v55, %v369_v46 }
 0x10c   :  { %v499_v61 = vmax.f32 %v491_v56, 0.0  ;;  %v433_v62 = vmul.f32 %v877_v52, %v367_v57  ;;  %v492_v63 = vadd.f32 %v483_v59, %v436_v58 }
 0x10d   :  { %537 = vst.msk [vmem:[%s920_s4 + $0xc] sm:$0xf] %vm533_vm1, %v591_v54  ;;  %v434_v53 = vmul.f32 %v875_v51, %v370_v60 }
 0x10e   :  { %v594_v0 = vpack.c.bf16 %v499_v61, %v499_v61  ;;  %v489_v1 = vadd.f32 %v468_v21, %v433_v62  ;;  %v500_v2 = vmax.f32 %v492_v63, 0.0 }
 0x10f   :  { %v490_v3 = vadd.f32 %v473_v26, %v434_v53 }
 0x110   :  { %540 = vst.msk [vmem:[%s920_s4 + $0x18] sm:$0xf] %vm533_vm1, %v594_v0  ;;  %v497_v4 = vmax.f32 %v489_v1, 0.0  ;;  %v595_v5 = vpack.c.bf16 %v500_v2, %v500_v2 }
 0x111   :  { %v498_v52 = vmax.f32 %v490_v3, 0.0 }
 0x112   :  { %v592_v6 = vpack.c.bf16 %v497_v4, %v497_v4  ;;  %541 = vst.msk [vmem:[%s920_s4 + $0x1c] sm:$0xf] %vm533_vm1, %v595_v5 }
 0x113   :  { %v593_v7 = vpack.c.bf16 %v498_v52, %v498_v52 }
 0x114   :  { %538 = vst.msk [vmem:[%s920_s4 + $0x10] sm:$0xf] %vm533_vm1, %v592_v6 }
 0x115   :  { %539 = vst.msk [vmem:[%s920_s4 + $0x14] sm:$0xf] %vm533_vm1, %v593_v7 }

// kernel: _lambda_.50
= control target key start
LH: loop header
LB: loop body
LE: loop exit
PB: predicated region body
PF: predicated region fallthrough
CT: control target
= control target key end

     0   :  { %vm56_vm0 = vcmask 261120   ;;  %vm134_vm1 = vcmask 64512   ;;  %s250_s1 = inlined_call_operand.vmem [shape: bf16[32,8], index: 1, kind: input, shape index: {}]   ;;  %s251_s0 = inlined_call_operand.vmem [shape: bf16[64,32], index: 0, kind: input, shape index: {}]   ;;  %s252_s2 = inlined_call_operand.vmem [shape: f32[64,8], index: 2, kind: output, shape index: {}]  }
   0x1   :  { %v179_v0 = vld [vmem:[%s250_s1] sm:$0xff]   ;;  %v180_v1 = vld [vmem:[%s250_s1 + $0x8] sm:$0xff]   ;;  %v182_v3 = vld [vmem:[%s251_s0 + $0x10] sm:$0xff]  }
   0x2   :  { %163 = vmatprep.subr.bf16.mxu0 %v179_v0  ;;  %175 = vmatprep.subr.bf16.mxu1 %v179_v0  ;;  %v181_v2 = vld [vmem:[%s251_s0] sm:$0xff]   ;;  %v183_v4 = vld [vmem:[%s251_s0 + $0x8] sm:$0xff]   ;;  %v184_v5 = vld [vmem:[%s251_s0 + $0x18] sm:$0xff]  }
   0x3   :  { %164 = vmatpush3.bf16.msra.mxu0 %v179_v0  ;;  %177 = vmatpush3.bf16.msra.mxu1 %v179_v0 }
   0x4   :  { %165 = vmatprep.subr.bf16.mxu0 %v180_v1  ;;  %176 = vmatprep.subr.bf16.mxu1 %v180_v1 }
   0x5   :  { %167 = vmatprep.mubr.msk.bf16.mxu0 %vm56_vm0, %v181_v2  ;;  %171 = vmatprep.mubr.msk.bf16.mxu1 %vm56_vm0, %v182_v3 }
   0x7   :  { %166 = vmatpush3.bf16.msra.mxu0 %v180_v1  ;;  %178 = vmatpush3.bf16.msra.mxu1 %v180_v1 }
   0xa   :  { %168 = vmatmul.mubr.msk.bf16.vlgmr.msra.gmra.mrb[0].mxu0 %vm56_vm0, %v183_v4  ;;  %172 = vmatmul.mubr.msk.bf16.vlgmr.msra.gmra.mrb[0].mxu1 %vm56_vm0, %v184_v5 }
  0xdd   :  { %v169_v6 = vpop.f32.mrb[0].mxu0  ;;  %v173_v7 = vpop.f32.mrb[0].mxu1 }
  0xde   :  { %137 = vst.msk [vmem:[%s252_s2 + $0x10] sm:$0xff] %vm134_vm1, %v169_v6  ;;  %141 = vst.msk [vmem:[%s252_s2 + $0x30] sm:$0xff] %vm134_vm1, %v173_v7  ;;  %v103_v8 = vpop.f32.mrb[1].mxu0  ;;  %v119_v9 = vpop.f32.mrb[1].mxu1 }
  0xdf   :  { %135 = vst.msk [vmem:[%s252_s2] sm:$0xff] %vm134_vm1, %v103_v8  ;;  %139 = vst.msk [vmem:[%s252_s2 + $0x20] sm:$0xff] %vm134_vm1, %v119_v9  ;;  %v170_v10 = vpop.f32.mrb[2].mxu0  ;;  %v174_v11 = vpop.f32.mrb[2].mxu1 }
  0xe0   :  { %138 = vst.msk [vmem:[%s252_s2 + $0x18] sm:$0xff] %vm134_vm1, %v170_v10  ;;  %142 = vst.msk [vmem:[%s252_s2 + $0x38] sm:$0xff] %vm134_vm1, %v174_v11  ;;  %v106_v12 = vpop.f32.mrb[3].mxu0  ;;  %v122_v13 = vpop.f32.mrb[3].mxu1 }
  0xe1   :  { %136 = vst.msk [vmem:[%s252_s2 + $0x8] sm:$0xff] %vm134_vm1, %v106_v12  ;;  %140 = vst.msk [vmem:[%s252_s2 + $0x28] sm:$0xff] %vm134_vm1, %v122_v13 }

// kernel: _lambda_.53
= control target key start
LH: loop header
LB: loop body
LE: loop exit
PB: predicated region body
PF: predicated region fallthrough
CT: control target
= control target key end

     0   :  { %v206_v0 = vmov 0   ;;  %vm174_vm0 = vcmask 60416   ;;  %s331_s1 = inlined_call_operand.vmem [shape: f32[64,1], index: 1, kind: input, shape index: {}]   ;;  %s332_s2 = inlined_call_operand.vmem [shape: f32[64,1], index: 2, kind: input, shape index: {}]   ;;  %s333_s0 = inlined_call_operand.vmem [shape: f32[64,8], index: 0, kind: input, shape index: {}]   ;;  %s334_s3 = inlined_call_operand.vmem [shape: bf16[64,8], index: 3, kind: output, shape index: {}]  }
   0x1   :  { %205 = vset.pattern.permute.xlu1 %v206_v0  ;;  %204 = vset.pattern.permute.xlu0 %v206_v0  ;;  %v24_v1 = vld [vmem:[%s331_s1 + $0x10] sm:$0xff]  ;;  %v22_v2 = vld [vmem:[%s331_s1] sm:$0xff]  ;;  %v25_v3 = vld [vmem:[%s331_s1 + $0x18] sm:$0xff] }
   0x2   :  { %42 = vperm.xlu1 %205, %v24_v1   ;;  %32 = vperm.xlu0 %204, %v22_v2   ;;  %v23_v4 = vld [vmem:[%s331_s1 + $0x8] sm:$0xff]  ;;  %v26_v6 = vld [vmem:[%s331_s1 + $0x20] sm:$0xff]  ;;  %v29_v7 = vld [vmem:[%s331_s1 + $0x38] sm:$0xff] }
   0x3   :  { %v27_v5 = vld [vmem:[%s331_s1 + $0x28] sm:$0xff]  ;;  %v28_v8 = vld [vmem:[%s331_s1 + $0x30] sm:$0xff]  ;;  %v78_v10 = vld [vmem:[%s332_s2] sm:$0xff] }
   0x4   :  { %v79_v9 = vld [vmem:[%s332_s2 + $0x8] sm:$0xff]  ;;  %v81_v11 = vld [vmem:[%s332_s2 + $0x18] sm:$0xff]  ;;  %v80_v12 = vld [vmem:[%s332_s2 + $0x10] sm:$0xff] }
   0x5   :  { %v83_v13 = vld [vmem:[%s332_s2 + $0x28] sm:$0xff]  ;;  %v82_v14 = vld [vmem:[%s332_s2 + $0x20] sm:$0xff]  ;;  %v85_v15 = vld [vmem:[%s332_s2 + $0x38] sm:$0xff] }
   0x6   :  { %47 = vperm.xlu1 %205, %v25_v3   ;;  %37 = vperm.xlu0 %204, %v23_v4   ;;  %v84_v16 = vld [vmem:[%s332_s2 + $0x30] sm:$0xff]  ;;  %v14_v23 = vld [vmem:[%s333_s0] sm:$0xff]  ;;  %v15_v24 = vld [vmem:[%s333_s0 + $0x8] sm:$0xff] }
   0x7   :  { %v16_v29 = vld [vmem:[%s333_s0 + $0x10] sm:$0xff]  ;;  %v17_v30 = vld [vmem:[%s333_s0 + $0x18] sm:$0xff]  ;;  %v19_v39 = vld [vmem:[%s333_s0 + $0x28] sm:$0xff] }
   0x8   :  { %v18_v40 = vld [vmem:[%s333_s0 + $0x20] sm:$0xff]  ;;  %v21_v51 = vld [vmem:[%s333_s0 + $0x38] sm:$0xff]  ;;  %v20_v52 = vld [vmem:[%s333_s0 + $0x30] sm:$0xff] }
   0xa   :  { %57 = vperm.xlu1 %205, %v27_v5   ;;  %52 = vperm.xlu0 %204, %v26_v6  }
   0xe   :  { %67 = vperm.xlu1 %205, %v29_v7   ;;  %62 = vperm.xlu0 %204, %v28_v8  }
  0x12   :  { %93 = vperm.xlu1 %205, %v79_v9   ;;  %88 = vperm.xlu0 %204, %v78_v10  }
  0x16   :  { %103 = vperm.xlu1 %205, %v81_v11   ;;  %98 = vperm.xlu0 %204, %v80_v12  }
  0x1a   :  { %113 = vperm.xlu1 %205, %v83_v13   ;;  %108 = vperm.xlu0 %204, %v82_v14  }
  0x1e   :  { %123 = vperm.xlu1 %205, %v85_v15   ;;  %118 = vperm.xlu0 %204, %v84_v16  }
  0x81   :  { %v43_v17 = vpop.permute.xlu1 %42  ;;  %v33_v18 = vpop.permute.xlu0 %32 }
  0x82   :  { %v70_v27 = vmul.f32 %v33_v18, %v14_v23  ;;  %v72_v35 = vmul.f32 %v43_v17, %v16_v29 }
  0x85   :  { %v48_v19 = vpop.permute.xlu1 %47  ;;  %v38_v20 = vpop.permute.xlu0 %37 }
  0x86   :  { %v71_v28 = vmul.f32 %v38_v20, %v15_v24  ;;  %v73_v36 = vmul.f32 %v48_v19, %v17_v30 }
  0x89   :  { %v58_v21 = vpop.permute.xlu1 %57  ;;  %v53_v22 = vpop.permute.xlu0 %52 }
  0x8a   :  { %v75_v47 = vmul.f32 %v58_v21, %v19_v39  ;;  %v74_v48 = vmul.f32 %v53_v22, %v18_v40 }
  0x8d   :  { %v68_v25 = vpop.permute.xlu1 %67  ;;  %v63_v26 = vpop.permute.xlu0 %62 }
  0x8e   :  { %v77_v59 = vmul.f32 %v68_v25, %v21_v51  ;;  %v76_v60 = vmul.f32 %v63_v26, %v20_v52 }
  0x91   :  { %v94_v31 = vpop.permute.xlu1 %93  ;;  %v89_v32 = vpop.permute.xlu0 %88 }
  0x92   :  { %v127_v33 = vadd.f32 %v94_v31, %v71_v28  ;;  %v126_v34 = vadd.f32 %v89_v32, %v70_v27 }
  0x94   :  { %v135_v37 = vmax.f32 %v127_v33, 0.0  ;;  %v134_v38 = vmax.f32 %v126_v34, 0.0 }
  0x95   :  { %v104_v41 = vpop.permute.xlu1 %103  ;;  %v99_v42 = vpop.permute.xlu0 %98 }
  0x96   :  { %v196_v43 = vpack.c.bf16 %v135_v37, %v135_v37  ;;  %v195_v44 = vpack.c.bf16 %v134_v38, %v134_v38  ;;  %v129_v45 = vadd.f32 %v104_v41, %v73_v36  ;;  %v128_v46 = vadd.f32 %v99_v42, %v72_v35 }
  0x98   :  { %176 = vst.msk [vmem:[%s334_s3 + $0x4] sm:$0xf] %vm174_vm0, %v196_v43  ;;  %175 = vst.msk [vmem:[%s334_s3] sm:$0xf] %vm174_vm0, %v195_v44  ;;  %v137_v49 = vmax.f32 %v129_v45, 0.0  ;;  %v136_v50 = vmax.f32 %v128_v46, 0.0 }
  0x99   :  { %v114_v53 = vpop.permute.xlu1 %113  ;;  %v109_v54 = vpop.permute.xlu0 %108 }
  0x9a   :  { %v198_v55 = vpack.c.bf16 %v137_v49, %v137_v49  ;;  %v197_v56 = vpack.c.bf16 %v136_v50, %v136_v50  ;;  %v131_v57 = vadd.f32 %v114_v53, %v75_v47  ;;  %v130_v58 = vadd.f32 %v109_v54, %v74_v48 }
  0x9c   :  { %178 = vst.msk [vmem:[%s334_s3 + $0xc] sm:$0xf] %vm174_vm0, %v198_v55  ;;  %177 = vst.msk [vmem:[%s334_s3 + $0x8] sm:$0xf] %vm174_vm0, %v197_v56  ;;  %v139_v61 = vmax.f32 %v131_v57, 0.0  ;;  %v138_v62 = vmax.f32 %v130_v58, 0.0 }
  0x9d   :  { %v124_v63 = vpop.permute.xlu1 %123  ;;  %v119_v0 = vpop.permute.xlu0 %118 }
  0x9e   :  { %v200_v1 = vpack.c.bf16 %v139_v61, %v139_v61  ;;  %v199_v2 = vpack.c.bf16 %v138_v62, %v138_v62  ;;  %v133_v3 = vadd.f32 %v124_v63, %v77_v59  ;;  %v132_v4 = vadd.f32 %v119_v0, %v76_v60 }
  0xa0   :  { %180 = vst.msk [vmem:[%s334_s3 + $0x14] sm:$0xf] %vm174_vm0, %v200_v1  ;;  %179 = vst.msk [vmem:[%s334_s3 + $0x10] sm:$0xf] %vm174_vm0, %v199_v2  ;;  %v141_v5 = vmax.f32 %v133_v3, 0.0  ;;  %v140_v6 = vmax.f32 %v132_v4, 0.0 }
  0xa2   :  { %v202_v7 = vpack.c.bf16 %v141_v5, %v141_v5  ;;  %v201_v8 = vpack.c.bf16 %v140_v6, %v140_v6 }
  0xa4   :  { %182 = vst.msk [vmem:[%s334_s3 + $0x1c] sm:$0xf] %vm174_vm0, %v202_v7  ;;  %181 = vst.msk [vmem:[%s334_s3 + $0x18] sm:$0xf] %vm174_vm0, %v201_v8 }

// kernel: _lambda_.52
= control target key start
LH: loop header
LB: loop body
LE: loop exit
PB: predicated region body
PF: predicated region fallthrough
CT: control target
= control target key end

     0   :  { %vm435_vm0 = vcmask 523264   ;;  %vm643_vm1 = vcmask 64512   ;;  %s1142_s1 = inlined_call_operand.vmem [shape: bf16[576,8], index: 1, kind: input, shape index: {}]   ;;  %s1143_s0 = inlined_call_operand.vmem [shape: bf16[64,576], index: 0, kind: input, shape index: {}]   ;;  %s1144_s2 = inlined_call_operand.vmem [shape: f32[64,8], index: 2, kind: input, shape index: {}]   ;;  %s1145_s3 = inlined_call_operand.vmem [shape: f32[64,8], index: 3, kind: output, shape index: {}]  }
   0x1   :  { %v828_v0 = vld [vmem:[%s1142_s1 + $0x40] sm:$0xff]   ;;  %v832_v4 = vld [vmem:[%s1142_s1 + $0x48] sm:$0xff]   ;;  %v836_v8 = vld [vmem:[%s1142_s1 + $0x50] sm:$0xff]  }
   0x2   :  { %v829_v1 = vld [vmem:[%s1142_s1 + $0xc0] sm:$0xff]   ;;  %716 = vmatprep.subr.bf16.mxu0 %v828_v0  ;;  %v833_v5 = vld [vmem:[%s1142_s1 + $0xc8] sm:$0xff]   ;;  %v837_v9 = vld [vmem:[%s1142_s1 + $0xd0] sm:$0xff]  }
   0x3   :  { %v830_v2 = vld [vmem:[%s1142_s1] sm:$0xff]   ;;  %756 = vmatprep.subr.bf16.mxu1 %v829_v1  ;;  %v834_v6 = vld [vmem:[%s1142_s1 + $0x8] sm:$0xff]   ;;  %v838_v10 = vld [vmem:[%s1142_s1 + $0x10] sm:$0xff]  }
   0x4   :  { %v831_v3 = vld [vmem:[%s1142_s1 + $0x80] sm:$0xff]   ;;  %717 = vmatpush3.bf16.msra.mxu0 %v830_v2  ;;  %v835_v7 = vld [vmem:[%s1142_s1 + $0x88] sm:$0xff]   ;;  %v839_v11 = vld [vmem:[%s1142_s1 + $0x90] sm:$0xff]  }
   0x5   :  { %757 = vmatpush3.bf16.msra.mxu1 %v831_v3  ;;  %718 = vmatprep.subr.bf16.mxu0 %v832_v4  ;;  %v840_v12 = vld [vmem:[%s1142_s1 + $0x58] sm:$0xff]   ;;  %v844_v16 = vld [vmem:[%s1142_s1 + $0x60] sm:$0xff]   ;;  %v848_v20 = vld [vmem:[%s1142_s1 + $0x68] sm:$0xff]  }
   0x6   :  { %758 = vmatprep.subr.bf16.mxu1 %v833_v5  ;;  %v841_v13 = vld [vmem:[%s1142_s1 + $0xd8] sm:$0xff]   ;;  %v845_v17 = vld [vmem:[%s1142_s1 + $0xe0] sm:$0xff]   ;;  %v849_v21 = vld [vmem:[%s1142_s1 + $0xe8] sm:$0xff]  }
   0x7   :  { %v842_v14 = vld [vmem:[%s1142_s1 + $0x18] sm:$0xff]   ;;  %v846_v18 = vld [vmem:[%s1142_s1 + $0x20] sm:$0xff]   ;;  %v850_v22 = vld [vmem:[%s1142_s1 + $0x28] sm:$0xff]  }
   0x8   :  { %719 = vmatpush3.bf16.msra.mxu0 %v834_v6  ;;  %v843_v15 = vld [vmem:[%s1142_s1 + $0x98] sm:$0xff]   ;;  %v847_v19 = vld [vmem:[%s1142_s1 + $0xa0] sm:$0xff]   ;;  %v851_v23 = vld [vmem:[%s1142_s1 + $0xa8] sm:$0xff]  }
   0x9   :  { %759 = vmatpush3.bf16.msra.mxu1 %v835_v7  ;;  %720 = vmatprep.subr.bf16.mxu0 %v836_v8  ;;  %v852_v24 = vld [vmem:[%s1142_s1 + $0x70] sm:$0xff]   ;;  %v856_v28 = vld [vmem:[%s1142_s1 + $0x78] sm:$0xff]   ;;  %v865_v35 = vld [vmem:[%s1143_s0 + $0xc] ss:$20 sps:$4 sm:$0xff]  }
   0xa   :  { %760 = vmatprep.subr.bf16.mxu1 %v837_v9  ;;  %v853_v25 = vld [vmem:[%s1142_s1 + $0xf0] sm:$0xff]   ;;  %v857_v29 = vld [vmem:[%s1142_s1 + $0xf8] sm:$0xff]   ;;  %v866_v36 = vld [vmem:[%s1142_s1 + $0x100] sm:$0xff]   ;;  %545 = vmatprep.mubr.bf16.mxu1 %v865_v35 }
   0xb   :  { %v854_v26 = vld [vmem:[%s1142_s1 + $0x30] sm:$0xff]   ;;  %v858_v30 = vld [vmem:[%s1142_s1 + $0x38] sm:$0xff]   ;;  %v867_v37 = vld [vmem:[%s1143_s0 + $0x2c] ss:$20 sps:$4 sm:$0xff]  }
   0xc   :  { %721 = vmatpush3.bf16.msra.mxu0 %v838_v10  ;;  %v855_v27 = vld [vmem:[%s1142_s1 + $0xb0] sm:$0xff]   ;;  %v859_v31 = vld [vmem:[%s1142_s1 + $0xb8] sm:$0xff]   ;;  %v873_v39 = vld [vmem:[%s1142_s1 + $0x108] sm:$0xff]  }
   0xd   :  { %761 = vmatpush3.bf16.msra.mxu1 %v839_v11  ;;  %722 = vmatprep.subr.bf16.mxu0 %v840_v12  ;;  %v860_v32 = vld [vmem:[%s1143_s0] ss:$20 sps:$4 sm:$0xff]   ;;  %v862_v33 = vld [vmem:[%s1143_s0 + $0x4] ss:$20 sps:$4 sm:$0xff]   ;;  %v863_v34 = vld [vmem:[%s1143_s0 + $0x8] ss:$20 sps:$4 sm:$0xff]  }
   0xe   :  { %762 = vmatprep.subr.bf16.mxu1 %v841_v13  ;;  %480 = vmatprep.mubr.bf16.mxu0 %v862_v33  ;;  %v869_v38 = vld [vmem:[%s1143_s0 + $0x34] ss:$20 sps:$4 sm:$0xff]   ;;  %v872_v41 = vld [vmem:[%s1143_s0 + $0x30] ss:$20 sps:$4 sm:$0xff]   ;;  %v887_v45 = vld [vmem:[%s1142_s1 + $0x118] sm:$0xff]  }
   0xf   :  { %v871_v40 = vld [vmem:[%s1143_s0 + $0x28] ss:$20 sps:$4 sm:$0xff]   ;;  %v880_v44 = vld [vmem:[%s1142_s1 + $0x110] sm:$0xff]   ;;  %v879_v47 = vld [vmem:[%s1143_s0 + $0x58] ss:$20 sps:$4 sm:$0xff]  }
  0x10   :  { %723 = vmatpush3.bf16.msra.mxu0 %v842_v14  ;;  %v874_v42 = vld [vmem:[%s1143_s0 + $0x54] ss:$20 sps:$4 sm:$0xff]   ;;  %v876_v43 = vld [vmem:[%s1143_s0 + $0x5c] ss:$20 sps:$4 sm:$0xff]   ;;  %v883_v49 = vld [vmem:[%s1143_s0 + $0x84] ss:$20 sps:$4 sm:$0xff]  }
  0x11   :  { %763 = vmatpush3.bf16.msra.mxu1 %v843_v15  ;;  %724 = vmatprep.subr.bf16.mxu0 %v844_v16  ;;  %v878_v46 = vld [vmem:[%s1143_s0 + $0x50] ss:$20 sps:$4 sm:$0xff]   ;;  %v885_v50 = vld [vmem:[%s1143_s0 + $0x78] ss:$20 sps:$4 sm:$0xff]   ;;  %v886_v51 = vld [vmem:[%s1143_s0 + $0x80] ss:$20 sps:$4 sm:$0xff]  }
  0x12   :  { %764 = vmatprep.subr.bf16.mxu1 %v845_v17  ;;  %v881_v48 = vld [vmem:[%s1143_s0 + $0x7c] ss:$20 sps:$4 sm:$0xff]   ;;  %v889_v53 = vld [vmem:[%s1143_s0 + $0x60] ss:$20 sps:$4 sm:$0xff]   ;;  %v890_v54 = vld [vmem:[%s1143_s0 + $0x38] ss:$20 sps:$4 sm:$0xff]  }
  0x13   :  { %v888_v52 = vld [vmem:[%s1143_s0 + $0x10] ss:$20 sps:$4 sm:$0xff]   ;;  %v891_v55 = vld [vmem:[%s1143_s0 + $0x88] ss:$20 sps:$4 sm:$0xff]  }
  0x14   :  { %725 = vmatpush3.bf16.msra.mxu0 %v846_v18  ;;  %v111_v58 = vld [vmem:[%s1144_s2] sm:$0xff]  ;;  %v112_v1 = vld [vmem:[%s1144_s2 + $0x8] sm:$0xff]  ;;  %v113_v12 = vld [vmem:[%s1144_s2 + $0x10] sm:$0xff] }
  0x15   :  { %765 = vmatpush3.bf16.msra.mxu1 %v847_v19  ;;  %726 = vmatprep.subr.bf16.mxu0 %v848_v20  ;;  %v114_v19 = vld [vmem:[%s1144_s2 + $0x18] sm:$0xff] }
  0x16   :  { %766 = vmatprep.subr.bf16.mxu1 %v849_v21 }
  0x18   :  { %727 = vmatpush3.bf16.msra.mxu0 %v850_v22 }
  0x19   :  { %767 = vmatpush3.bf16.msra.mxu1 %v851_v23  ;;  %728 = vmatprep.subr.bf16.mxu0 %v852_v24 }
  0x1a   :  { %768 = vmatprep.subr.bf16.mxu1 %v853_v25 }
  0x1c   :  { %729 = vmatpush3.bf16.msra.mxu0 %v854_v26 }
  0x1d   :  { %769 = vmatpush3.bf16.msra.mxu1 %v855_v27  ;;  %730 = vmatprep.subr.bf16.mxu0 %v856_v28 }
  0x1e   :  { %770 = vmatprep.subr.bf16.mxu1 %v857_v29 }
  0x20   :  { %731 = vmatpush3.bf16.msra.mxu0 %v858_v30  ;;  %v115_v30 = vld [vmem:[%s1144_s2 + $0x20] sm:$0xff] }
  0x21   :  { %771 = vmatpush3.bf16.msra.mxu1 %v859_v31  ;;  %804 = vmatprep.subr.bf16.mxu0 %v866_v36 }
  0x22   :  { %820 = vmatprep.subr.bf16.mxu1 %v866_v36 }
  0x23   :  { %481 = vmatmul.mubr.bf16.vlgmr.msra.gmra.mrb[0].mxu0 %v860_v32 }
  0x24   :  { %546 = vmatmul.mubr.bf16.vlgmr.msra.gmra.mrb[0].mxu1 %v863_v34  ;;  %805 = vmatpush3.bf16.msra.mxu0 %v866_v36 }
  0x25   :  { %824 = vmatpush3.bf16.msra.mxu1 %v866_v36  ;;  %488 = vmatprep.mubr.bf16.mxu0 %v867_v37  ;;  %v116_v37 = vld [vmem:[%s1144_s2 + $0x28] sm:$0xff] }
  0x26   :  { %553 = vmatprep.mubr.bf16.mxu1 %v869_v38  ;;  %806 = vmatprep.subr.bf16.mxu0 %v873_v39 }
  0x27   :  { %821 = vmatprep.subr.bf16.mxu1 %v873_v39 }
  0x28   :  { %807 = vmatpush3.bf16.msra.mxu0 %v873_v39 }
  0x29   :  { %825 = vmatpush3.bf16.msra.mxu1 %v873_v39  ;;  %808 = vmatprep.subr.bf16.mxu0 %v880_v44 }
  0x2a   :  { %822 = vmatprep.subr.bf16.mxu1 %v880_v44 }
  0x2b   :  { %489 = vmatmul.mubr.bf16.gmra.mrb[4].mxu0 %v871_v40 }
  0x2c   :  { %554 = vmatmul.mubr.bf16.gmra.mrb[4].mxu1 %v872_v41  ;;  %496 = vmatprep.mubr.bf16.mxu0 %v874_v42 }
  0x2d   :  { %561 = vmatprep.mubr.bf16.mxu1 %v876_v43  ;;  %809 = vmatpush3.bf16.msra.mxu0 %v880_v44 }
  0x2e   :  { %826 = vmatpush3.bf16.msra.mxu1 %v880_v44  ;;  %810 = vmatprep.subr.bf16.mxu0 %v887_v45 }
  0x2f   :  { %823 = vmatprep.subr.bf16.mxu1 %v887_v45 }
  0x31   :  { %811 = vmatpush3.bf16.msra.mxu0 %v887_v45 }
  0x32   :  { %827 = vmatpush3.bf16.msra.mxu1 %v887_v45 }
  0x33   :  { %497 = vmatmul.mubr.bf16.gmra.mrb[8].mxu0 %v878_v46 }
  0x34   :  { %562 = vmatmul.mubr.bf16.gmra.mrb[8].mxu1 %v879_v47  ;;  %504 = vmatprep.mubr.bf16.mxu0 %v881_v48  ;;  %v117_v48 = vld [vmem:[%s1144_s2 + $0x30] sm:$0xff] }
  0x35   :  { %569 = vmatprep.mubr.bf16.mxu1 %v883_v49 }
  0x3b   :  { %505 = vmatmul.mubr.bf16.gmra.mrb[12].mxu0 %v885_v50 }
  0x3c   :  { %570 = vmatmul.mubr.bf16.gmra.mrb[12].mxu1 %v886_v51  ;;  %812 = vmatprep.mubr.msk.bf16.mxu0 %vm435_vm0, %v888_v52 }
  0x3d   :  { %816 = vmatprep.mubr.msk.bf16.mxu1 %vm435_vm0, %v889_v53 }
  0x43   :  { %813 = vmatmul.mubr.msk.bf16.vlgmr.msra.gmra.mrb[16].mxu0 %vm435_vm0, %v890_v54 }
  0x44   :  { %817 = vmatmul.mubr.msk.bf16.vlgmr.msra.gmra.mrb[16].mxu1 %vm435_vm0, %v891_v55  ;;  %v118_v55 = vld [vmem:[%s1144_s2 + $0x38] sm:$0xff] }
  0xf6   :  { %v732_v56 = vpop.f32.mrb[0].mxu0 }
  0xf7   :  { %v772_v57 = vpop.f32.mrb[0].mxu1  ;;  %v733_v59 = vpop.f32.mrb[1].mxu0 }
  0xf8   :  { %v734_v60 = vadd.f32 %v733_v59, %v732_v56  ;;  %v773_v61 = vpop.f32.mrb[1].mxu1  ;;  %v735_v62 = vpop.f32.mrb[2].mxu0 }
  0xf9   :  { %v774_v63 = vadd.f32 %v773_v61, %v772_v57  ;;  %v775_v0 = vpop.f32.mrb[2].mxu1  ;;  %v736_v2 = vpop.f32.mrb[3].mxu0 }
  0xfa   :  { %v483_v3 = vadd.f32 %v734_v60, %v111_v58  ;;  %v737_v4 = vadd.f32 %v736_v2, %v735_v62  ;;  %v776_v5 = vpop.f32.mrb[3].mxu1 }
  0xfb   :  { %v777_v6 = vadd.f32 %v776_v5, %v775_v0 }
  0xfc   :  { %v486_v7 = vadd.f32 %v737_v4, %v112_v1  ;;  %v1086_v8 = vadd.f32 %v774_v63, %v483_v3 }
  0xfe   :  { %v738_v9 = vpop.f32.mrb[4].mxu0  ;;  %v1088_v10 = vadd.f32 %v777_v6, %v486_v7 }
  0xff   :  { %v778_v11 = vpop.f32.mrb[4].mxu1  ;;  %v739_v13 = vpop.f32.mrb[5].mxu0 }
 0x100   :  { %v740_v14 = vadd.f32 %v739_v13, %v738_v9  ;;  %v779_v15 = vpop.f32.mrb[5].mxu1  ;;  %v741_v16 = vpop.f32.mrb[6].mxu0 }
 0x101   :  { %v780_v17 = vadd.f32 %v779_v15, %v778_v11  ;;  %v781_v18 = vpop.f32.mrb[6].mxu1  ;;  %v742_v20 = vpop.f32.mrb[7].mxu0 }
 0x102   :  { %v491_v21 = vadd.f32 %v740_v14, %v113_v12  ;;  %v743_v22 = vadd.f32 %v742_v20, %v741_v16  ;;  %v782_v23 = vpop.f32.mrb[7].mxu1 }
 0x103   :  { %v783_v24 = vadd.f32 %v782_v23, %v781_v18 }
 0x104   :  { %v494_v25 = vadd.f32 %v743_v22, %v114_v19  ;;  %v556_v26 = vadd.f32 %v780_v17, %v491_v21 }
 0x106   :  { %v744_v27 = vpop.f32.mrb[8].mxu0  ;;  %v559_v28 = vadd.f32 %v783_v24, %v494_v25 }
 0x107   :  { %v784_v29 = vpop.f32.mrb[8].mxu1  ;;  %v745_v31 = vpop.f32.mrb[9].mxu0 }
 0x108   :  { %v746_v32 = vadd.f32 %v745_v31, %v744_v27  ;;  %v785_v33 = vpop.f32.mrb[9].mxu1  ;;  %v747_v34 = vpop.f32.mrb[10].mxu0 }
 0x109   :  { %v786_v35 = vadd.f32 %v785_v33, %v784_v29  ;;  %v787_v36 = vpop.f32.mrb[10].mxu1  ;;  %v748_v38 = vpop.f32.mrb[11].mxu0 }
 0x10a   :  { %v499_v39 = vadd.f32 %v746_v32, %v115_v30  ;;  %v749_v40 = vadd.f32 %v748_v38, %v747_v34  ;;  %v788_v41 = vpop.f32.mrb[11].mxu1 }
 0x10b   :  { %v789_v42 = vadd.f32 %v788_v41, %v787_v36 }
 0x10c   :  { %v502_v43 = vadd.f32 %v749_v40, %v116_v37  ;;  %v564_v44 = vadd.f32 %v786_v35, %v499_v39 }
 0x10e   :  { %v750_v45 = vpop.f32.mrb[12].mxu0  ;;  %v567_v46 = vadd.f32 %v789_v42, %v502_v43 }
 0x10f   :  { %v790_v47 = vpop.f32.mrb[12].mxu1  ;;  %v751_v49 = vpop.f32.mrb[13].mxu0 }
 0x110   :  { %v752_v50 = vadd.f32 %v751_v49, %v750_v45  ;;  %v791_v51 = vpop.f32.mrb[13].mxu1  ;;  %v753_v52 = vpop.f32.mrb[14].mxu0 }
 0x111   :  { %v792_v53 = vadd.f32 %v791_v51, %v790_v47  ;;  %v793_v54 = vpop.f32.mrb[14].mxu1  ;;  %v754_v56 = vpop.f32.mrb[15].mxu0 }
 0x112   :  { %v507_v57 = vadd.f32 %v752_v50, %v117_v48  ;;  %v755_v58 = vadd.f32 %v754_v56, %v753_v52  ;;  %v794_v59 = vpop.f32.mrb[15].mxu1 }
 0x113   :  { %v795_v60 = vadd.f32 %v794_v59, %v793_v54 }
 0x114   :  { %v510_v61 = vadd.f32 %v755_v58, %v118_v55  ;;  %v572_v62 = vadd.f32 %v792_v53, %v507_v57 }
 0x116   :  { %v814_v63 = vpop.f32.mrb[16].mxu0  ;;  %v575_v0 = vadd.f32 %v795_v60, %v510_v61 }
 0x117   :  { %v621_v1 = vadd.f32 %v814_v63, %v556_v26  ;;  %v818_v2 = vpop.f32.mrb[16].mxu1  ;;  %v612_v3 = vpop.f32.mrb[17].mxu0 }
 0x118   :  { %v637_v4 = vadd.f32 %v818_v2, %v572_v62  ;;  %v613_v5 = vadd.f32 %v612_v3, %v1086_v8  ;;  %v628_v6 = vpop.f32.mrb[17].mxu1  ;;  %v815_v7 = vpop.f32.mrb[18].mxu0 }
 0x119   :  { %646 = vst.msk [vmem:[%s1145_s3 + $0x10] sm:$0xff] %vm643_vm1, %v621_v1  ;;  %v629_v9 = vadd.f32 %v628_v6, %v564_v44  ;;  %v624_v11 = vadd.f32 %v815_v7, %v559_v28  ;;  %v819_v12 = vpop.f32.mrb[18].mxu1  ;;  %v615_v13 = vpop.f32.mrb[19].mxu0 }
 0x11a   :  { %650 = vst.msk [vmem:[%s1145_s3 + $0x30] sm:$0xff] %vm643_vm1, %v637_v4  ;;  %644 = vst.msk [vmem:[%s1145_s3] sm:$0xff] %vm643_vm1, %v613_v5  ;;  %v640_v8 = vadd.f32 %v819_v12, %v575_v0  ;;  %v616_v14 = vadd.f32 %v615_v13, %v1088_v10  ;;  %v631_v15 = vpop.f32.mrb[19].mxu1 }
 0x11b   :  { %648 = vst.msk [vmem:[%s1145_s3 + $0x20] sm:$0xff] %vm643_vm1, %v629_v9  ;;  %647 = vst.msk [vmem:[%s1145_s3 + $0x18] sm:$0xff] %vm643_vm1, %v624_v11  ;;  %v632_v16 = vadd.f32 %v631_v15, %v567_v46 }
 0x11c   :  { %651 = vst.msk [vmem:[%s1145_s3 + $0x38] sm:$0xff] %vm643_vm1, %v640_v8  ;;  %645 = vst.msk [vmem:[%s1145_s3 + $0x8] sm:$0xff] %vm643_vm1, %v616_v14 }
 0x11d   :  { %649 = vst.msk [vmem:[%s1145_s3 + $0x28] sm:$0xff] %vm643_vm1, %v632_v16 }

// kernel: _lambda_.54
= control target key start
LH: loop header
LB: loop body
LE: loop exit
PB: predicated region body
PF: predicated region fallthrough
CT: control target
= control target key end

     0   :  { %v1058_v1 = vmov 0   ;;  %vm430_vm0 = vcmask 523264   ;;  %vm790_vm1 = vcmask 60416   ;;  %s1366_s1 = inlined_call_operand.vmem [shape: bf16[576,8], index: 1, kind: input, shape index: {}]   ;;  %s1367_s0 = inlined_call_operand.vmem [shape: bf16[64,576], index: 0, kind: input, shape index: {}]   ;;  %s1368_s2 = inlined_call_operand.vmem [shape: f32[64,1], index: 2, kind: input, shape index: {}]   ;;  %s1369_s3 = inlined_call_operand.vmem [shape: f32[64,1], index: 3, kind: input, shape index: {}]   ;;  %s1370_s4 = inlined_call_operand.vmem [shape: bf16[64,8], index: 4, kind: output, shape index: {}]  }
   0x1   :  { %v994_v0 = vld [vmem:[%s1366_s1 + $0x40] sm:$0xff]   ;;  %993 = vset.pattern.permute.xlu1 %v1058_v1  ;;  %992 = vset.pattern.permute.xlu0 %v1058_v1  ;;  %v998_v5 = vld [vmem:[%s1366_s1 + $0x48] sm:$0xff]   ;;  %v1002_v9 = vld [vmem:[%s1366_s1 + $0x50] sm:$0xff]  }
   0x2   :  { %v995_v2 = vld [vmem:[%s1366_s1 + $0xc0] sm:$0xff]   ;;  %879 = vmatprep.subr.bf16.mxu0 %v994_v0  ;;  %v999_v6 = vld [vmem:[%s1366_s1 + $0xc8] sm:$0xff]   ;;  %v1003_v10 = vld [vmem:[%s1366_s1 + $0xd0] sm:$0xff]  }
   0x3   :  { %v996_v3 = vld [vmem:[%s1366_s1] sm:$0xff]   ;;  %919 = vmatprep.subr.bf16.mxu1 %v995_v2  ;;  %v1000_v7 = vld [vmem:[%s1366_s1 + $0x8] sm:$0xff]   ;;  %v1004_v11 = vld [vmem:[%s1366_s1 + $0x10] sm:$0xff]  }
   0x4   :  { %v997_v4 = vld [vmem:[%s1366_s1 + $0x80] sm:$0xff]   ;;  %880 = vmatpush3.bf16.msra.mxu0 %v996_v3  ;;  %v1001_v8 = vld [vmem:[%s1366_s1 + $0x88] sm:$0xff]   ;;  %v1005_v12 = vld [vmem:[%s1366_s1 + $0x90] sm:$0xff]  }
   0x5   :  { %920 = vmatpush3.bf16.msra.mxu1 %v997_v4  ;;  %881 = vmatprep.subr.bf16.mxu0 %v998_v5  ;;  %v1006_v13 = vld [vmem:[%s1366_s1 + $0x58] sm:$0xff]   ;;  %v1010_v17 = vld [vmem:[%s1366_s1 + $0x60] sm:$0xff]   ;;  %v1014_v21 = vld [vmem:[%s1366_s1 + $0x68] sm:$0xff]  }
   0x6   :  { %921 = vmatprep.subr.bf16.mxu1 %v999_v6  ;;  %v1007_v14 = vld [vmem:[%s1366_s1 + $0xd8] sm:$0xff]   ;;  %v1011_v18 = vld [vmem:[%s1366_s1 + $0xe0] sm:$0xff]   ;;  %v1015_v22 = vld [vmem:[%s1366_s1 + $0xe8] sm:$0xff]  }
   0x7   :  { %v1008_v15 = vld [vmem:[%s1366_s1 + $0x18] sm:$0xff]   ;;  %v1012_v19 = vld [vmem:[%s1366_s1 + $0x20] sm:$0xff]   ;;  %v1016_v23 = vld [vmem:[%s1366_s1 + $0x28] sm:$0xff]  }
   0x8   :  { %882 = vmatpush3.bf16.msra.mxu0 %v1000_v7  ;;  %v1009_v16 = vld [vmem:[%s1366_s1 + $0x98] sm:$0xff]   ;;  %v1013_v20 = vld [vmem:[%s1366_s1 + $0xa0] sm:$0xff]   ;;  %v1017_v24 = vld [vmem:[%s1366_s1 + $0xa8] sm:$0xff]  }
   0x9   :  { %922 = vmatpush3.bf16.msra.mxu1 %v1001_v8  ;;  %883 = vmatprep.subr.bf16.mxu0 %v1002_v9  ;;  %v1018_v25 = vld [vmem:[%s1366_s1 + $0x70] sm:$0xff]   ;;  %v1022_v29 = vld [vmem:[%s1366_s1 + $0x78] sm:$0xff]   ;;  %v1031_v36 = vld [vmem:[%s1367_s0 + $0xc] ss:$20 sps:$4 sm:$0xff]  }
   0xa   :  { %923 = vmatprep.subr.bf16.mxu1 %v1003_v10  ;;  %v1019_v26 = vld [vmem:[%s1366_s1 + $0xf0] sm:$0xff]   ;;  %v1023_v30 = vld [vmem:[%s1366_s1 + $0xf8] sm:$0xff]   ;;  %v1032_v37 = vld [vmem:[%s1366_s1 + $0x100] sm:$0xff]   ;;  %540 = vmatprep.mubr.bf16.mxu1 %v1031_v36 }
   0xb   :  { %v1020_v27 = vld [vmem:[%s1366_s1 + $0x30] sm:$0xff]   ;;  %v1024_v31 = vld [vmem:[%s1366_s1 + $0x38] sm:$0xff]   ;;  %v1033_v38 = vld [vmem:[%s1367_s0 + $0x2c] ss:$20 sps:$4 sm:$0xff]  }
   0xc   :  { %884 = vmatpush3.bf16.msra.mxu0 %v1004_v11  ;;  %v1021_v28 = vld [vmem:[%s1366_s1 + $0xb0] sm:$0xff]   ;;  %v1025_v32 = vld [vmem:[%s1366_s1 + $0xb8] sm:$0xff]   ;;  %v1039_v40 = vld [vmem:[%s1366_s1 + $0x108] sm:$0xff]  }
   0xd   :  { %924 = vmatpush3.bf16.msra.mxu1 %v1005_v12  ;;  %885 = vmatprep.subr.bf16.mxu0 %v1006_v13  ;;  %v1026_v33 = vld [vmem:[%s1367_s0] ss:$20 sps:$4 sm:$0xff]   ;;  %v1028_v34 = vld [vmem:[%s1367_s0 + $0x4] ss:$20 sps:$4 sm:$0xff]   ;;  %v1029_v35 = vld [vmem:[%s1367_s0 + $0x8] ss:$20 sps:$4 sm:$0xff]  }
   0xe   :  { %925 = vmatprep.subr.bf16.mxu1 %v1007_v14  ;;  %475 = vmatprep.mubr.bf16.mxu0 %v1028_v34  ;;  %v1035_v39 = vld [vmem:[%s1367_s0 + $0x34] ss:$20 sps:$4 sm:$0xff]   ;;  %v1038_v42 = vld [vmem:[%s1367_s0 + $0x30] ss:$20 sps:$4 sm:$0xff]   ;;  %v1053_v46 = vld [vmem:[%s1366_s1 + $0x118] sm:$0xff]  }
   0xf   :  { %v1037_v41 = vld [vmem:[%s1367_s0 + $0x28] ss:$20 sps:$4 sm:$0xff]   ;;  %v1046_v45 = vld [vmem:[%s1366_s1 + $0x110] sm:$0xff]   ;;  %v1045_v48 = vld [vmem:[%s1367_s0 + $0x58] ss:$20 sps:$4 sm:$0xff]  }
  0x10   :  { %886 = vmatpush3.bf16.msra.mxu0 %v1008_v15  ;;  %v1040_v43 = vld [vmem:[%s1367_s0 + $0x54] ss:$20 sps:$4 sm:$0xff]   ;;  %v1042_v44 = vld [vmem:[%s1367_s0 + $0x5c] ss:$20 sps:$4 sm:$0xff]   ;;  %v1049_v50 = vld [vmem:[%s1367_s0 + $0x84] ss:$20 sps:$4 sm:$0xff]  }
  0x11   :  { %926 = vmatpush3.bf16.msra.mxu1 %v1009_v16  ;;  %887 = vmatprep.subr.bf16.mxu0 %v1010_v17  ;;  %v1044_v47 = vld [vmem:[%s1367_s0 + $0x50] ss:$20 sps:$4 sm:$0xff]   ;;  %v641_v53 = vld [vmem:[%s1368_s2 + $0x18] sm:$0xff]  ;;  %v639_v54 = vld [vmem:[%s1368_s2 + $0x8] sm:$0xff] }
  0x12   :  { %927 = vmatprep.subr.bf16.mxu1 %v1011_v18  ;;  %v1047_v49 = vld [vmem:[%s1367_s0 + $0x7c] ss:$20 sps:$4 sm:$0xff]   ;;  %v638_v52 = vld [vmem:[%s1368_s2] sm:$0xff]  ;;  %v1051_v55 = vld [vmem:[%s1367_s0 + $0x78] ss:$20 sps:$4 sm:$0xff]  }
  0x13   :  { %v640_v51 = vld [vmem:[%s1368_s2 + $0x10] sm:$0xff]  ;;  %648 = vperm.xlu0 %992, %v638_v52   ;;  %v643_v58 = vld [vmem:[%s1368_s2 + $0x28] sm:$0xff]  ;;  %v642_v60 = vld [vmem:[%s1368_s2 + $0x20] sm:$0xff] }
  0x14   :  { %888 = vmatpush3.bf16.msra.mxu0 %v1012_v19  ;;  %658 = vperm.xlu1 %993, %v640_v51   ;;  %v1052_v56 = vld [vmem:[%s1367_s0 + $0x80] ss:$20 sps:$4 sm:$0xff]   ;;  %v1054_v57 = vld [vmem:[%s1367_s0 + $0x10] ss:$20 sps:$4 sm:$0xff]   ;;  %v645_v61 = vld [vmem:[%s1368_s2 + $0x38] sm:$0xff] }
  0x15   :  { %928 = vmatpush3.bf16.msra.mxu1 %v1013_v20  ;;  %889 = vmatprep.subr.bf16.mxu0 %v1014_v21  ;;  %v1055_v59 = vld [vmem:[%s1367_s0 + $0x60] ss:$20 sps:$4 sm:$0xff]   ;;  %v1056_v63 = vld [vmem:[%s1367_s0 + $0x38] ss:$20 sps:$4 sm:$0xff]   ;;  %v1057_v0 = vld [vmem:[%s1367_s0 + $0x88] ss:$20 sps:$4 sm:$0xff]  }
  0x16   :  { %929 = vmatprep.subr.bf16.mxu1 %v1015_v22  ;;  %v644_v62 = vld [vmem:[%s1368_s2 + $0x30] sm:$0xff]  ;;  %v695_v1 = vld [vmem:[%s1369_s3 + $0x8] sm:$0xff]  ;;  %v694_v2 = vld [vmem:[%s1369_s3] sm:$0xff] }
  0x17   :  { %653 = vperm.xlu0 %992, %v639_v54   ;;  %v697_v3 = vld [vmem:[%s1369_s3 + $0x18] sm:$0xff]  ;;  %v696_v4 = vld [vmem:[%s1369_s3 + $0x10] sm:$0xff]  ;;  %v699_v5 = vld [vmem:[%s1369_s3 + $0x28] sm:$0xff] }
  0x18   :  { %890 = vmatpush3.bf16.msra.mxu0 %v1016_v23  ;;  %663 = vperm.xlu1 %993, %v641_v53   ;;  %v698_v6 = vld [vmem:[%s1369_s3 + $0x20] sm:$0xff]  ;;  %v701_v7 = vld [vmem:[%s1369_s3 + $0x38] sm:$0xff]  ;;  %v700_v8 = vld [vmem:[%s1369_s3 + $0x30] sm:$0xff] }
  0x19   :  { %930 = vmatpush3.bf16.msra.mxu1 %v1017_v24  ;;  %891 = vmatprep.subr.bf16.mxu0 %v1018_v25 }
  0x1a   :  { %931 = vmatprep.subr.bf16.mxu1 %v1019_v26 }
  0x1b   :  { %668 = vperm.xlu0 %992, %v642_v60  }
  0x1c   :  { %892 = vmatpush3.bf16.msra.mxu0 %v1020_v27  ;;  %673 = vperm.xlu1 %993, %v643_v58  }
  0x1d   :  { %932 = vmatpush3.bf16.msra.mxu1 %v1021_v28  ;;  %893 = vmatprep.subr.bf16.mxu0 %v1022_v29 }
  0x1e   :  { %933 = vmatprep.subr.bf16.mxu1 %v1023_v30 }
  0x1f   :  { %678 = vperm.xlu0 %992, %v644_v62  }
  0x20   :  { %894 = vmatpush3.bf16.msra.mxu0 %v1024_v31  ;;  %683 = vperm.xlu1 %993, %v645_v61  }
  0x21   :  { %934 = vmatpush3.bf16.msra.mxu1 %v1025_v32  ;;  %967 = vmatprep.subr.bf16.mxu0 %v1032_v37 }
  0x22   :  { %983 = vmatprep.subr.bf16.mxu1 %v1032_v37 }
  0x23   :  { %476 = vmatmul.mubr.bf16.vlgmr.msra.gmra.mrb[0].mxu0 %v1026_v33  ;;  %704 = vperm.xlu0 %992, %v694_v2  }
  0x24   :  { %541 = vmatmul.mubr.bf16.vlgmr.msra.gmra.mrb[0].mxu1 %v1029_v35  ;;  %968 = vmatpush3.bf16.msra.mxu0 %v1032_v37 }
  0x25   :  { %987 = vmatpush3.bf16.msra.mxu1 %v1032_v37  ;;  %483 = vmatprep.mubr.bf16.mxu0 %v1033_v38 }
  0x26   :  { %548 = vmatprep.mubr.bf16.mxu1 %v1035_v39  ;;  %969 = vmatprep.subr.bf16.mxu0 %v1039_v40 }
  0x27   :  { %984 = vmatprep.subr.bf16.mxu1 %v1039_v40  ;;  %709 = vperm.xlu1 %993, %v695_v1  }
  0x28   :  { %970 = vmatpush3.bf16.msra.mxu0 %v1039_v40  ;;  %714 = vperm.xlu0 %992, %v696_v4  }
  0x29   :  { %988 = vmatpush3.bf16.msra.mxu1 %v1039_v40  ;;  %971 = vmatprep.subr.bf16.mxu0 %v1046_v45 }
  0x2a   :  { %985 = vmatprep.subr.bf16.mxu1 %v1046_v45 }
  0x2b   :  { %484 = vmatmul.mubr.bf16.gmra.mrb[4].mxu0 %v1037_v41  ;;  %719 = vperm.xlu1 %993, %v697_v3  }
  0x2c   :  { %549 = vmatmul.mubr.bf16.gmra.mrb[4].mxu1 %v1038_v42  ;;  %491 = vmatprep.mubr.bf16.mxu0 %v1040_v43 }
  0x2d   :  { %556 = vmatprep.mubr.bf16.mxu1 %v1042_v44  ;;  %972 = vmatpush3.bf16.msra.mxu0 %v1046_v45 }
  0x2e   :  { %989 = vmatpush3.bf16.msra.mxu1 %v1046_v45  ;;  %973 = vmatprep.subr.bf16.mxu0 %v1053_v46 }
  0x2f   :  { %986 = vmatprep.subr.bf16.mxu1 %v1053_v46  ;;  %729 = vperm.xlu1 %993, %v699_v5  }
  0x30   :  { %724 = vperm.xlu0 %992, %v698_v6  }
  0x31   :  { %974 = vmatpush3.bf16.msra.mxu0 %v1053_v46 }
  0x32   :  { %990 = vmatpush3.bf16.msra.mxu1 %v1053_v46 }
  0x33   :  { %492 = vmatmul.mubr.bf16.gmra.mrb[8].mxu0 %v1044_v47  ;;  %739 = vperm.xlu1 %993, %v701_v7  }
  0x34   :  { %557 = vmatmul.mubr.bf16.gmra.mrb[8].mxu1 %v1045_v48  ;;  %499 = vmatprep.mubr.bf16.mxu0 %v1047_v49 }
  0x35   :  { %564 = vmatprep.mubr.bf16.mxu1 %v1049_v50  ;;  %734 = vperm.xlu0 %992, %v700_v8  }
  0x3b   :  { %500 = vmatmul.mubr.bf16.gmra.mrb[12].mxu0 %v1051_v55 }
  0x3c   :  { %565 = vmatmul.mubr.bf16.gmra.mrb[12].mxu1 %v1052_v56  ;;  %975 = vmatprep.mubr.msk.bf16.mxu0 %vm430_vm0, %v1054_v57 }
  0x3d   :  { %979 = vmatprep.mubr.msk.bf16.mxu1 %vm430_vm0, %v1055_v59 }
  0x43   :  { %976 = vmatmul.mubr.msk.bf16.vlgmr.msra.gmra.mrb[16].mxu0 %vm430_vm0, %v1056_v63 }
  0x44   :  { %980 = vmatmul.mubr.msk.bf16.vlgmr.msra.gmra.mrb[16].mxu1 %vm430_vm0, %v1057_v0 }
  0x92   :  { %v1306_v10 = vpop.permute.xlu0 %648 }
  0x93   :  { %v1304_v9 = vpop.permute.xlu1 %658 }
  0x96   :  { %v1310_v12 = vpop.permute.xlu0 %653 }
  0x97   :  { %v1308_v11 = vpop.permute.xlu1 %663 }
  0x9a   :  { %v1314_v14 = vpop.permute.xlu0 %668 }
  0x9b   :  { %v1312_v13 = vpop.permute.xlu1 %673 }
  0x9e   :  { %v1320_v30 = vpop.permute.xlu0 %678 }
  0x9f   :  { %v1316_v28 = vpop.permute.xlu1 %683 }
  0xa2   :  { %v705_v46 = vpop.permute.xlu0 %704 }
  0xa6   :  { %v1322_v44 = vpop.permute.xlu1 %709 }
  0xa7   :  { %v715_v62 = vpop.permute.xlu0 %714 }
  0xaa   :  { %v720_v60 = vpop.permute.xlu1 %719 }
  0xf6   :  { %v895_v15 = vpop.f32.mrb[0].mxu0 }
  0xf7   :  { %v935_v16 = vpop.f32.mrb[0].mxu1  ;;  %v896_v17 = vpop.f32.mrb[1].mxu0 }
  0xf8   :  { %v897_v18 = vadd.f32 %v896_v17, %v895_v15  ;;  %v936_v19 = vpop.f32.mrb[1].mxu1  ;;  %v898_v20 = vpop.f32.mrb[2].mxu0 }
  0xf9   :  { %v937_v21 = vadd.f32 %v936_v19, %v935_v16  ;;  %v938_v22 = vpop.f32.mrb[2].mxu1  ;;  %v899_v23 = vpop.f32.mrb[3].mxu0 }
  0xfa   :  { %v900_v24 = vadd.f32 %v899_v23, %v898_v20  ;;  %v939_v25 = vpop.f32.mrb[3].mxu1  ;;  %v730_v20 = vpop.permute.xlu1 %729 }
  0xfb   :  { %v940_v26 = vadd.f32 %v939_v25, %v938_v22  ;;  %v543_v27 = vadd.f32 %v937_v21, %v897_v18  ;;  %v725_v18 = vpop.permute.xlu0 %724 }
  0xfd   :  { %v1318_v29 = vadd.f32 %v940_v26, %v900_v24 }
  0xfe   :  { %v901_v31 = vpop.f32.mrb[4].mxu0 }
  0xff   :  { %v941_v32 = vpop.f32.mrb[4].mxu1  ;;  %v902_v33 = vpop.f32.mrb[5].mxu0 }
 0x100   :  { %v903_v34 = vadd.f32 %v902_v33, %v901_v31  ;;  %v942_v35 = vpop.f32.mrb[5].mxu1  ;;  %v904_v36 = vpop.f32.mrb[6].mxu0 }
 0x101   :  { %v943_v37 = vadd.f32 %v942_v35, %v941_v32  ;;  %v944_v38 = vpop.f32.mrb[6].mxu1  ;;  %v905_v39 = vpop.f32.mrb[7].mxu0 }
 0x102   :  { %v906_v40 = vadd.f32 %v905_v39, %v904_v36  ;;  %v945_v41 = vpop.f32.mrb[7].mxu1 }
 0x103   :  { %v946_v42 = vadd.f32 %v945_v41, %v944_v38  ;;  %v551_v43 = vadd.f32 %v943_v37, %v903_v34 }
 0x105   :  { %v554_v45 = vadd.f32 %v946_v42, %v906_v40 }
 0x106   :  { %v907_v47 = vpop.f32.mrb[8].mxu0 }
 0x107   :  { %v947_v48 = vpop.f32.mrb[8].mxu1  ;;  %v908_v49 = vpop.f32.mrb[9].mxu0 }
 0x108   :  { %v909_v50 = vadd.f32 %v908_v49, %v907_v47  ;;  %v948_v51 = vpop.f32.mrb[9].mxu1  ;;  %v910_v52 = vpop.f32.mrb[10].mxu0 }
 0x109   :  { %v949_v53 = vadd.f32 %v948_v51, %v947_v48  ;;  %v950_v54 = vpop.f32.mrb[10].mxu1  ;;  %v911_v55 = vpop.f32.mrb[11].mxu0 }
 0x10a   :  { %v912_v56 = vadd.f32 %v911_v55, %v910_v52  ;;  %v951_v57 = vpop.f32.mrb[11].mxu1 }
 0x10b   :  { %v952_v58 = vadd.f32 %v951_v57, %v950_v54  ;;  %v559_v59 = vadd.f32 %v949_v53, %v909_v50 }
 0x10d   :  { %v562_v61 = vadd.f32 %v952_v58, %v912_v56 }
 0x10e   :  { %v913_v63 = vpop.f32.mrb[12].mxu0 }
 0x10f   :  { %v953_v0 = vpop.f32.mrb[12].mxu1  ;;  %v914_v1 = vpop.f32.mrb[13].mxu0 }
 0x110   :  { %v915_v2 = vadd.f32 %v914_v1, %v913_v63  ;;  %v954_v3 = vpop.f32.mrb[13].mxu1  ;;  %v916_v4 = vpop.f32.mrb[14].mxu0 }
 0x111   :  { %v955_v5 = vadd.f32 %v954_v3, %v953_v0  ;;  %v956_v6 = vpop.f32.mrb[14].mxu1  ;;  %v917_v7 = vpop.f32.mrb[15].mxu0 }
 0x112   :  { %v918_v8 = vadd.f32 %v917_v7, %v916_v4  ;;  %v957_v15 = vpop.f32.mrb[15].mxu1 }
 0x113   :  { %v958_v16 = vadd.f32 %v957_v15, %v956_v6  ;;  %v567_v17 = vadd.f32 %v955_v5, %v915_v2 }
 0x115   :  { %v570_v19 = vadd.f32 %v958_v16, %v918_v8 }
 0x116   :  { %v977_v21 = vpop.f32.mrb[16].mxu0 }
 0x117   :  { %v616_v22 = vadd.f32 %v977_v21, %v551_v43  ;;  %v981_v23 = vpop.f32.mrb[16].mxu1  ;;  %v607_v24 = vpop.f32.mrb[17].mxu0 }
 0x118   :  { %v632_v25 = vadd.f32 %v981_v23, %v567_v17  ;;  %v608_v26 = vadd.f32 %v607_v24, %v543_v27  ;;  %v623_v31 = vpop.f32.mrb[17].mxu1  ;;  %v978_v32 = vpop.f32.mrb[18].mxu0 }
 0x119   :  { %v688_v33 = vmul.f32 %v1304_v9, %v616_v22  ;;  %v624_v34 = vadd.f32 %v623_v31, %v559_v59  ;;  %v619_v35 = vadd.f32 %v978_v32, %v554_v45  ;;  %v982_v36 = vpop.f32.mrb[18].mxu1  ;;  %v610_v37 = vpop.f32.mrb[19].mxu0 }
 0x11a   :  { %v692_v38 = vmul.f32 %v1320_v30, %v632_v25  ;;  %v686_v39 = vmul.f32 %v1306_v10, %v608_v26  ;;  %v635_v40 = vadd.f32 %v982_v36, %v570_v19  ;;  %v611_v41 = vadd.f32 %v610_v37, %v1318_v29  ;;  %v626_v42 = vpop.f32.mrb[19].mxu1  ;;  %v735_v43 = vpop.permute.xlu0 %734 }
 0x11b   :  { %v744_v47 = vadd.f32 %v715_v62, %v688_v33  ;;  %v690_v27 = vmul.f32 %v1314_v14, %v624_v34  ;;  %v689_v48 = vmul.f32 %v1308_v11, %v619_v35  ;;  %v627_v9 = vadd.f32 %v626_v42, %v562_v61  ;;  %v740_v30 = vpop.permute.xlu1 %739 }
 0x11c   :  { %v748_v49 = vadd.f32 %v735_v43, %v692_v38  ;;  %v742_v50 = vadd.f32 %v705_v46, %v686_v39  ;;  %v693_v45 = vmul.f32 %v1316_v28, %v635_v40  ;;  %v687_v51 = vmul.f32 %v1310_v12, %v611_v41 }
 0x11d   :  { %v752_v52 = vmax.f32 %v744_v47, 0.0  ;;  %v746_v10 = vadd.f32 %v725_v18, %v690_v27  ;;  %v745_v53 = vadd.f32 %v720_v60, %v689_v48  ;;  %v691_v29 = vmul.f32 %v1312_v13, %v627_v9 }
 0x11e   :  { %v756_v54 = vmax.f32 %v748_v49, 0.0  ;;  %v750_v55 = vmax.f32 %v742_v50, 0.0  ;;  %v749_v56 = vadd.f32 %v740_v30, %v693_v45  ;;  %v743_v14 = vadd.f32 %v1322_v44, %v687_v51 }
 0x11f   :  { %v873_v57 = vpack.c.bf16 %v752_v52, %v752_v52  ;;  %v754_v11 = vmax.f32 %v746_v10, 0.0  ;;  %v753_v58 = vmax.f32 %v745_v53, 0.0  ;;  %v747_v59 = vadd.f32 %v730_v20, %v691_v29 }
 0x120   :  { %v877_v46 = vpack.c.bf16 %v756_v54, %v756_v54  ;;  %v871_v61 = vpack.c.bf16 %v750_v55, %v750_v55  ;;  %v757_v28 = vmax.f32 %v749_v56, 0.0  ;;  %v751_v62 = vmax.f32 %v743_v14, 0.0 }
 0x121   :  { %793 = vst.msk [vmem:[%s1370_s4 + $0x8] sm:$0xf] %vm790_vm1, %v873_v57  ;;  %v875_v12 = vpack.c.bf16 %v754_v11, %v754_v11  ;;  %v874_v13 = vpack.c.bf16 %v753_v58, %v753_v58  ;;  %v755_v60 = vmax.f32 %v747_v59, 0.0 }
 0x122   :  { %797 = vst.msk [vmem:[%s1370_s4 + $0x18] sm:$0xf] %vm790_vm1, %v877_v46  ;;  %791 = vst.msk [vmem:[%s1370_s4] sm:$0xf] %vm790_vm1, %v871_v61  ;;  %v878_v44 = vpack.c.bf16 %v757_v28, %v757_v28  ;;  %v872_v63 = vpack.c.bf16 %v751_v62, %v751_v62 }
 0x123   :  { %795 = vst.msk [vmem:[%s1370_s4 + $0x10] sm:$0xf] %vm790_vm1, %v875_v12  ;;  %794 = vst.msk [vmem:[%s1370_s4 + $0xc] sm:$0xf] %vm790_vm1, %v874_v13  ;;  %v876_v0 = vpack.c.bf16 %v755_v60, %v755_v60 }
 0x124   :  { %798 = vst.msk [vmem:[%s1370_s4 + $0x1c] sm:$0xf] %vm790_vm1, %v878_v44  ;;  %792 = vst.msk [vmem:[%s1370_s4 + $0x4] sm:$0xf] %vm790_vm1, %v872_v63 }
 0x125   :  { %796 = vst.msk [vmem:[%s1370_s4 + $0x14] sm:$0xf] %vm790_vm1, %v876_v0 }

// kernel: _lambda_.55
= control target key start
LH: loop header
LB: loop body
LE: loop exit
PB: predicated region body
PF: predicated region fallthrough
CT: control target
= control target key end

     0   :  { %vm438_vm0 = vcmask 523264   ;;  %vm655_vm1 = vcmask 64512   ;;  %vm785_vm2 = vcmask 15360   ;;  %s1317_s1 = inlined_call_operand.vmem [shape: bf16[576,8], index: 1, kind: input, shape index: {}]   ;;  %s1318_s0 = inlined_call_operand.vmem [shape: bf16[64,576], index: 0, kind: input, shape index: {}]   ;;  %s1319_s3 = inlined_call_operand.vmem [shape: f32[8,2], index: 3, kind: input, shape index: {}]   ;;  %s1320_s2 = inlined_call_operand.vmem [shape: f32[64,8], index: 2, kind: input, shape index: {}]   ;;  %s1321_s4 = inlined_call_operand.vmem [shape: f32[64,2], index: 4, kind: output, shape index: {}]  }
   0x1   :  { %v993_v0 = vld [vmem:[%s1317_s1 + $0x40] sm:$0xff]   ;;  %v997_v4 = vld [vmem:[%s1317_s1 + $0x48] sm:$0xff]   ;;  %v1001_v8 = vld [vmem:[%s1317_s1 + $0x50] sm:$0xff]  }
   0x2   :  { %v994_v1 = vld [vmem:[%s1317_s1] sm:$0xff]   ;;  %866 = vmatprep.subr.bf16.mxu0 %v993_v0  ;;  %v998_v5 = vld [vmem:[%s1317_s1 + $0x8] sm:$0xff]   ;;  %v1002_v9 = vld [vmem:[%s1317_s1 + $0x10] sm:$0xff]  }
   0x3   :  { %v995_v2 = vld [vmem:[%s1317_s1 + $0xc0] sm:$0xff]   ;;  %867 = vmatpush3.bf16.msra.mxu0 %v994_v1  ;;  %v999_v6 = vld [vmem:[%s1317_s1 + $0xc8] sm:$0xff]   ;;  %v1003_v10 = vld [vmem:[%s1317_s1 + $0xd0] sm:$0xff]  }
   0x4   :  { %v996_v3 = vld [vmem:[%s1317_s1 + $0x80] sm:$0xff]   ;;  %906 = vmatprep.subr.bf16.mxu1 %v995_v2  ;;  %868 = vmatprep.subr.bf16.mxu0 %v997_v4  ;;  %v1000_v7 = vld [vmem:[%s1317_s1 + $0x88] sm:$0xff]   ;;  %v1004_v11 = vld [vmem:[%s1317_s1 + $0x90] sm:$0xff]  }
   0x5   :  { %907 = vmatpush3.bf16.msra.mxu1 %v996_v3  ;;  %v1005_v12 = vld [vmem:[%s1317_s1 + $0x58] sm:$0xff]   ;;  %v1009_v16 = vld [vmem:[%s1317_s1 + $0x60] sm:$0xff]   ;;  %v1013_v20 = vld [vmem:[%s1317_s1 + $0x68] sm:$0xff]  }
   0x6   :  { %908 = vmatprep.subr.bf16.mxu1 %v999_v6  ;;  %v1006_v13 = vld [vmem:[%s1317_s1 + $0x18] sm:$0xff]   ;;  %v1010_v17 = vld [vmem:[%s1317_s1 + $0x20] sm:$0xff]   ;;  %v1014_v21 = vld [vmem:[%s1317_s1 + $0x28] sm:$0xff]  }
   0x7   :  { %869 = vmatpush3.bf16.msra.mxu0 %v998_v5  ;;  %v1007_v14 = vld [vmem:[%s1317_s1 + $0xd8] sm:$0xff]   ;;  %v1011_v18 = vld [vmem:[%s1317_s1 + $0xe0] sm:$0xff]   ;;  %v1015_v22 = vld [vmem:[%s1317_s1 + $0xe8] sm:$0xff]  }
   0x8   :  { %870 = vmatprep.subr.bf16.mxu0 %v1001_v8  ;;  %v1008_v15 = vld [vmem:[%s1317_s1 + $0x98] sm:$0xff]   ;;  %v1012_v19 = vld [vmem:[%s1317_s1 + $0xa0] sm:$0xff]   ;;  %v1016_v23 = vld [vmem:[%s1317_s1 + $0xa8] sm:$0xff]  }
   0x9   :  { %909 = vmatpush3.bf16.msra.mxu1 %v1000_v7  ;;  %v1017_v24 = vld [vmem:[%s1317_s1 + $0x70] sm:$0xff]   ;;  %v1021_v28 = vld [vmem:[%s1317_s1 + $0x78] sm:$0xff]   ;;  %v1028_v34 = vld [vmem:[%s1317_s1 + $0x100] sm:$0xff]  }
   0xa   :  { %910 = vmatprep.subr.bf16.mxu1 %v1003_v10  ;;  %v1018_v25 = vld [vmem:[%s1317_s1 + $0x30] sm:$0xff]   ;;  %v1022_v29 = vld [vmem:[%s1317_s1 + $0x38] sm:$0xff]   ;;  %v1031_v36 = vld [vmem:[%s1318_s0 + $0xc] ss:$20 sps:$4 sm:$0xff]  }
   0xb   :  { %871 = vmatpush3.bf16.msra.mxu0 %v1002_v9  ;;  %v1019_v26 = vld [vmem:[%s1317_s1 + $0xf0] sm:$0xff]   ;;  %v1023_v30 = vld [vmem:[%s1317_s1 + $0xf8] sm:$0xff]   ;;  %v1032_v37 = vld [vmem:[%s1318_s0 + $0x2c] ss:$20 sps:$4 sm:$0xff]   ;;  %548 = vmatprep.mubr.bf16.mxu1 %v1031_v36 }
   0xc   :  { %872 = vmatprep.subr.bf16.mxu0 %v1005_v12  ;;  %v1020_v27 = vld [vmem:[%s1317_s1 + $0xb0] sm:$0xff]   ;;  %v1026_v32 = vld [vmem:[%s1318_s0 + $0x4] ss:$20 sps:$4 sm:$0xff]   ;;  %v1029_v35 = vld [vmem:[%s1318_s0 + $0x8] ss:$20 sps:$4 sm:$0xff]  }
   0xd   :  { %911 = vmatpush3.bf16.msra.mxu1 %v1004_v11  ;;  %v1024_v31 = vld [vmem:[%s1318_s0] ss:$20 sps:$4 sm:$0xff]   ;;  %v1027_v33 = vld [vmem:[%s1317_s1 + $0xb8] sm:$0xff]   ;;  %483 = vmatprep.mubr.bf16.mxu0 %v1026_v32  ;;  %v1035_v38 = vld [vmem:[%s1317_s1 + $0x108] sm:$0xff]  }
   0xe   :  { %912 = vmatprep.subr.bf16.mxu1 %v1007_v14  ;;  %v1036_v39 = vld [vmem:[%s1318_s0 + $0x34] ss:$20 sps:$4 sm:$0xff]   ;;  %v1038_v43 = vld [vmem:[%s1318_s0 + $0x30] ss:$20 sps:$4 sm:$0xff]   ;;  %v1049_v45 = vld [vmem:[%s1317_s1 + $0x118] sm:$0xff]  }
   0xf   :  { %873 = vmatpush3.bf16.msra.mxu0 %v1006_v13  ;;  %v1034_v40 = vld [vmem:[%s1318_s0 + $0x28] ss:$20 sps:$4 sm:$0xff]   ;;  %v1042_v42 = vld [vmem:[%s1317_s1 + $0x110] sm:$0xff]   ;;  %v1045_v48 = vld [vmem:[%s1318_s0 + $0x58] ss:$20 sps:$4 sm:$0xff]  }
  0x10   :  { %874 = vmatprep.subr.bf16.mxu0 %v1009_v16  ;;  %v1039_v41 = vld [vmem:[%s1318_s0 + $0x54] ss:$20 sps:$4 sm:$0xff]   ;;  %v1043_v44 = vld [vmem:[%s1318_s0 + $0x5c] ss:$20 sps:$4 sm:$0xff]   ;;  %v1050_v49 = vld [vmem:[%s1318_s0 + $0x84] ss:$20 sps:$4 sm:$0xff]  }
  0x11   :  { %913 = vmatpush3.bf16.msra.mxu1 %v1008_v15  ;;  %v1041_v46 = vld [vmem:[%s1318_s0 + $0x50] ss:$20 sps:$4 sm:$0xff]   ;;  %v1048_v50 = vld [vmem:[%s1318_s0 + $0x78] ss:$20 sps:$4 sm:$0xff]   ;;  %v1052_v52 = vld [vmem:[%s1318_s0 + $0x80] ss:$20 sps:$4 sm:$0xff]  }
  0x12   :  { %914 = vmatprep.subr.bf16.mxu1 %v1011_v18  ;;  %v1046_v47 = vld [vmem:[%s1318_s0 + $0x7c] ss:$20 sps:$4 sm:$0xff]   ;;  %v1054_v53 = vld [vmem:[%s1318_s0 + $0x38] ss:$20 sps:$4 sm:$0xff]   ;;  %v1055_v54 = vld [vmem:[%s1318_s0 + $0x60] ss:$20 sps:$4 sm:$0xff]  }
  0x13   :  { %875 = vmatpush3.bf16.msra.mxu0 %v1010_v17  ;;  %v1053_v51 = vld [vmem:[%s1318_s0 + $0x10] ss:$20 sps:$4 sm:$0xff]   ;;  %v1056_v55 = vld [vmem:[%s1318_s0 + $0x88] ss:$20 sps:$4 sm:$0xff]  }
  0x14   :  { %876 = vmatprep.subr.bf16.mxu0 %v1013_v20  ;;  %v654_v56 = vld [vmem:[%s1319_s3] sm:$0xff]  ;;  %v115_v63 = vld [vmem:[%s1320_s2 + $0x8] sm:$0xff]  ;;  %v116_v11 = vld [vmem:[%s1320_s2 + $0x10] sm:$0xff] }
  0x15   :  { %915 = vmatpush3.bf16.msra.mxu1 %v1012_v19  ;;  %v114_v58 = vld [vmem:[%s1320_s2] sm:$0xff]  ;;  %v117_v17 = vld [vmem:[%s1320_s2 + $0x18] sm:$0xff] }
  0x16   :  { %916 = vmatprep.subr.bf16.mxu1 %v1015_v22 }
  0x17   :  { %877 = vmatpush3.bf16.msra.mxu0 %v1014_v21 }
  0x18   :  { %878 = vmatprep.subr.bf16.mxu0 %v1017_v24 }
  0x19   :  { %917 = vmatpush3.bf16.msra.mxu1 %v1016_v23 }
  0x1a   :  { %918 = vmatprep.subr.bf16.mxu1 %v1019_v26 }
  0x1b   :  { %879 = vmatpush3.bf16.msra.mxu0 %v1018_v25 }
  0x1c   :  { %880 = vmatprep.subr.bf16.mxu0 %v1021_v28 }
  0x1d   :  { %919 = vmatpush3.bf16.msra.mxu1 %v1020_v27 }
  0x1e   :  { %920 = vmatprep.subr.bf16.mxu1 %v1023_v30 }
  0x1f   :  { %881 = vmatpush3.bf16.msra.mxu0 %v1022_v29  ;;  %v118_v29 = vld [vmem:[%s1320_s2 + $0x20] sm:$0xff] }
  0x20   :  { %963 = vmatprep.subr.bf16.mxu0 %v1028_v34 }
  0x21   :  { %921 = vmatpush3.bf16.msra.mxu1 %v1027_v33 }
  0x22   :  { %484 = vmatmul.mubr.bf16.vlgmr.msra.gmra.mrb[0].mxu0 %v1024_v31  ;;  %979 = vmatprep.subr.mxu1 %v654_v56 }
  0x23   :  { %964 = vmatpush3.bf16.msra.mxu0 %v1028_v34  ;;  %491 = vmatprep.mubr.bf16.mxu0 %v1032_v37 }
  0x24   :  { %549 = vmatmul.mubr.bf16.vlgmr.msra.gmra.mrb[0].mxu1 %v1029_v35  ;;  %965 = vmatprep.subr.bf16.mxu0 %v1035_v38  ;;  %v119_v35 = vld [vmem:[%s1320_s2 + $0x28] sm:$0xff] }
  0x25   :  { %556 = vmatprep.mubr.bf16.mxu1 %v1036_v39  ;;  %980 = vmatpush3.msra.mxu1 %v654_v56 }
  0x27   :  { %966 = vmatpush3.bf16.msra.mxu0 %v1035_v38 }
  0x28   :  { %967 = vmatprep.subr.bf16.mxu0 %v1042_v42 }
  0x2a   :  { %492 = vmatmul.mubr.bf16.gmra.mrb[4].mxu0 %v1034_v40 }
  0x2b   :  { %499 = vmatprep.mubr.bf16.mxu0 %v1039_v41  ;;  %968 = vmatpush3.bf16.msra.mxu0 %v1042_v42 }
  0x2c   :  { %557 = vmatmul.mubr.bf16.gmra.mrb[4].mxu1 %v1038_v43  ;;  %969 = vmatprep.subr.bf16.mxu0 %v1049_v45 }
  0x2d   :  { %564 = vmatprep.mubr.bf16.mxu1 %v1043_v44 }
  0x2f   :  { %970 = vmatpush3.bf16.msra.mxu0 %v1049_v45 }
  0x32   :  { %500 = vmatmul.mubr.bf16.gmra.mrb[8].mxu0 %v1041_v46 }
  0x33   :  { %507 = vmatprep.mubr.bf16.mxu0 %v1046_v47  ;;  %v120_v47 = vld [vmem:[%s1320_s2 + $0x30] sm:$0xff] }
  0x34   :  { %565 = vmatmul.mubr.bf16.gmra.mrb[8].mxu1 %v1045_v48 }
  0x35   :  { %572 = vmatprep.mubr.bf16.mxu1 %v1050_v49 }
  0x3a   :  { %508 = vmatmul.mubr.bf16.gmra.mrb[12].mxu0 %v1048_v50 }
  0x3b   :  { %971 = vmatprep.mubr.msk.bf16.mxu0 %vm438_vm0, %v1053_v51 }
  0x3c   :  { %573 = vmatmul.mubr.bf16.gmra.mrb[12].mxu1 %v1052_v52 }
  0x42   :  { %972 = vmatmul.mubr.msk.bf16.vlgmr.msra.gmra.mrb[16].mxu0 %vm438_vm0, %v1054_v53  ;;  %v121_v53 = vld [vmem:[%s1320_s2 + $0x38] sm:$0xff] }
  0x43   :  { %975 = vmatprep.mubr.msk.bf16.mxu0 %vm438_vm0, %v1055_v54 }
  0x4a   :  { %976 = vmatmul.mubr.msk.bf16.gmra.mrb[20].mxu0 %vm438_vm0, %v1056_v55 }
  0xf5   :  { %v882_v57 = vpop.f32.mrb[0].mxu0 }
  0xf6   :  { %v883_v59 = vpop.f32.mrb[1].mxu0 }
  0xf7   :  { %v884_v60 = vadd.f32 %v883_v59, %v882_v57  ;;  %v885_v61 = vpop.f32.mrb[2].mxu0  ;;  %v922_v62 = vpop.f32.mrb[0].mxu1 }
  0xf8   :  { %v886_v0 = vpop.f32.mrb[3].mxu0  ;;  %v923_v3 = vpop.f32.mrb[1].mxu1 }
  0xf9   :  { %v486_v1 = vadd.f32 %v884_v60, %v114_v58  ;;  %v887_v2 = vadd.f32 %v886_v0, %v885_v61  ;;  %v924_v4 = vadd.f32 %v923_v3, %v922_v62  ;;  %v925_v5 = vpop.f32.mrb[2].mxu1 }
  0xfa   :  { %v926_v7 = vpop.f32.mrb[3].mxu1 }
  0xfb   :  { %v489_v6 = vadd.f32 %v887_v2, %v115_v63  ;;  %v927_v8 = vadd.f32 %v926_v7, %v925_v5  ;;  %v551_v9 = vadd.f32 %v924_v4, %v486_v1 }
  0xfd   :  { %v888_v10 = vpop.f32.mrb[4].mxu0  ;;  %v554_v13 = vadd.f32 %v927_v8, %v489_v6 }
  0xfe   :  { %v889_v12 = vpop.f32.mrb[5].mxu0 }
  0xff   :  { %v890_v14 = vadd.f32 %v889_v12, %v888_v10  ;;  %v891_v15 = vpop.f32.mrb[6].mxu0  ;;  %v928_v16 = vpop.f32.mrb[4].mxu1 }
 0x100   :  { %v892_v18 = vpop.f32.mrb[7].mxu0  ;;  %v929_v21 = vpop.f32.mrb[5].mxu1 }
 0x101   :  { %v494_v19 = vadd.f32 %v890_v14, %v116_v11  ;;  %v893_v20 = vadd.f32 %v892_v18, %v891_v15  ;;  %v930_v22 = vadd.f32 %v929_v21, %v928_v16  ;;  %v931_v23 = vpop.f32.mrb[6].mxu1 }
 0x102   :  { %v932_v25 = vpop.f32.mrb[7].mxu1 }
 0x103   :  { %v497_v24 = vadd.f32 %v893_v20, %v117_v17  ;;  %v933_v26 = vadd.f32 %v932_v25, %v931_v23  ;;  %v559_v27 = vadd.f32 %v930_v22, %v494_v19 }
 0x105   :  { %v894_v28 = vpop.f32.mrb[8].mxu0  ;;  %v562_v31 = vadd.f32 %v933_v26, %v497_v24 }
 0x106   :  { %v895_v30 = vpop.f32.mrb[9].mxu0 }
 0x107   :  { %v896_v32 = vadd.f32 %v895_v30, %v894_v28  ;;  %v897_v33 = vpop.f32.mrb[10].mxu0  ;;  %v934_v34 = vpop.f32.mrb[8].mxu1 }
 0x108   :  { %v898_v36 = vpop.f32.mrb[11].mxu0  ;;  %v935_v39 = vpop.f32.mrb[9].mxu1 }
 0x109   :  { %v502_v37 = vadd.f32 %v896_v32, %v118_v29  ;;  %v899_v38 = vadd.f32 %v898_v36, %v897_v33  ;;  %v936_v40 = vadd.f32 %v935_v39, %v934_v34  ;;  %v937_v41 = vpop.f32.mrb[10].mxu1 }
 0x10a   :  { %v938_v43 = vpop.f32.mrb[11].mxu1 }
 0x10b   :  { %v505_v42 = vadd.f32 %v899_v38, %v119_v35  ;;  %v939_v44 = vadd.f32 %v938_v43, %v937_v41  ;;  %v567_v45 = vadd.f32 %v936_v40, %v502_v37 }
 0x10d   :  { %v900_v46 = vpop.f32.mrb[12].mxu0  ;;  %v570_v49 = vadd.f32 %v939_v44, %v505_v42 }
 0x10e   :  { %v901_v48 = vpop.f32.mrb[13].mxu0 }
 0x10f   :  { %v902_v50 = vadd.f32 %v901_v48, %v900_v46  ;;  %v903_v51 = vpop.f32.mrb[14].mxu0  ;;  %v940_v52 = vpop.f32.mrb[12].mxu1 }
 0x110   :  { %v904_v54 = vpop.f32.mrb[15].mxu0  ;;  %v941_v57 = vpop.f32.mrb[13].mxu1 }
 0x111   :  { %v510_v55 = vadd.f32 %v902_v50, %v120_v47  ;;  %v905_v56 = vadd.f32 %v904_v54, %v903_v51  ;;  %v942_v58 = vadd.f32 %v941_v57, %v940_v52  ;;  %v943_v59 = vpop.f32.mrb[14].mxu1 }
 0x112   :  { %v944_v61 = vpop.f32.mrb[15].mxu1 }
 0x113   :  { %v513_v60 = vadd.f32 %v905_v56, %v121_v53  ;;  %v945_v62 = vadd.f32 %v944_v61, %v943_v59  ;;  %v575_v63 = vadd.f32 %v942_v58, %v510_v55 }
 0x115   :  { %v973_v0 = vpop.f32.mrb[16].mxu0  ;;  %v578_v3 = vadd.f32 %v945_v62, %v513_v60 }
 0x116   :  { %v624_v1 = vadd.f32 %v973_v0, %v559_v27  ;;  %v615_v2 = vpop.f32.mrb[17].mxu0 }
 0x117   :  { %v616_v4 = vadd.f32 %v615_v2, %v551_v9  ;;  %v974_v5 = vpop.f32.mrb[18].mxu0 }
 0x118   :  { %v627_v6 = vadd.f32 %v974_v5, %v562_v31  ;;  %v618_v7 = vpop.f32.mrb[19].mxu0  ;;  %v648_v12 = vmax.f32 %v624_v1, 0.0 }
 0x119   :  { %v646_v8 = vmax.f32 %v616_v4, 0.0  ;;  %v619_v10 = vadd.f32 %v618_v7, %v554_v13 }
 0x11a   :  { %v649_v17 = vmax.f32 %v627_v6, 0.0 }
 0x11b   :  { %v647_v11 = vmax.f32 %v619_v10, 0.0  ;;  %981 = vmatprep.mubr.msk.f32.mxu1 %vm655_vm1, %v646_v8 }
 0x11d   :  { %v977_v14 = vpop.f32.mrb[20].mxu0  ;;  %982 = vmatmul.mubr.msk.f32.vlgmr.msra.gmra.mrb[16].mxu1 %vm655_vm1, %v647_v11 }
 0x11e   :  { %v640_v15 = vadd.f32 %v977_v14, %v575_v63  ;;  %v631_v16 = vpop.f32.mrb[21].mxu0  ;;  %984 = vmatprep.mubr.msk.f32.mxu1 %vm655_vm1, %v648_v12 }
 0x11f   :  { %v632_v18 = vadd.f32 %v631_v16, %v567_v45  ;;  %v978_v9 = vpop.f32.mrb[22].mxu0 }
 0x120   :  { %v643_v19 = vadd.f32 %v978_v9, %v578_v3  ;;  %v634_v20 = vpop.f32.mrb[23].mxu0  ;;  %v652_v23 = vmax.f32 %v640_v15, 0.0 }
 0x121   :  { %v650_v21 = vmax.f32 %v632_v18, 0.0  ;;  %v635_v22 = vadd.f32 %v634_v20, %v570_v49  ;;  %985 = vmatmul.mubr.msk.f32.gmra.mrb[18].mxu1 %vm655_vm1, %v649_v17 }
 0x122   :  { %v653_v24 = vmax.f32 %v643_v19, 0.0 }
 0x123   :  { %v651_v13 = vmax.f32 %v635_v22, 0.0  ;;  %987 = vmatprep.mubr.msk.f32.mxu1 %vm655_vm1, %v650_v21 }
 0x125   :  { %988 = vmatmul.mubr.msk.f32.gmra.mrb[20].mxu1 %vm655_vm1, %v651_v13 }
 0x126   :  { %990 = vmatprep.mubr.msk.f32.mxu1 %vm655_vm1, %v652_v23 }
 0x129   :  { %991 = vmatmul.mubr.msk.f32.gmra.mrb[22].mxu1 %vm655_vm1, %v653_v24 }
 0x1f0   :  { %v983_v25 = vpop.f32.mrb[16].mxu1 }
 0x1f1   :  { %787 = vst.msk [vmem:[%s1321_s4 + $0x8] sm:$0xff] %vm785_vm2, %v983_v25  ;;  %v746_v26 = vpop.f32.mrb[17].mxu1 }
 0x1f2   :  { %786 = vst.msk [vmem:[%s1321_s4] sm:$0xff] %vm785_vm2, %v746_v26 }
 0x1f4   :  { %v986_v27 = vpop.f32.mrb[18].mxu1 }
 0x1f5   :  { %789 = vst.msk [vmem:[%s1321_s4 + $0x18] sm:$0xff] %vm785_vm2, %v986_v27  ;;  %v756_v28 = vpop.f32.mrb[19].mxu1 }
 0x1f6   :  { %788 = vst.msk [vmem:[%s1321_s4 + $0x10] sm:$0xff] %vm785_vm2, %v756_v28 }
 0x1f8   :  { %v989_v29 = vpop.f32.mrb[20].mxu1 }
 0x1f9   :  { %791 = vst.msk [vmem:[%s1321_s4 + $0x28] sm:$0xff] %vm785_vm2, %v989_v29  ;;  %v766_v30 = vpop.f32.mrb[21].mxu1 }
 0x1fa   :  { %790 = vst.msk [vmem:[%s1321_s4 + $0x20] sm:$0xff] %vm785_vm2, %v766_v30 }
 0x1fc   :  { %v992_v31 = vpop.f32.mrb[22].mxu1 }
 0x1fd   :  { %793 = vst.msk [vmem:[%s1321_s4 + $0x38] sm:$0xff] %vm785_vm2, %v992_v31  ;;  %v776_v32 = vpop.f32.mrb[23].mxu1 }
 0x1fe   :  { %792 = vst.msk [vmem:[%s1321_s4 + $0x30] sm:$0xff] %vm785_vm2, %v776_v32 }

</bundles_post_ra>
